<compile_context>
chip_gen: v7x
topology: tpu7x:2x2x1
jax: 0.10.0
libtpu: 0.0.40
codegen_flags: <defaults>
</compile_context>

<pallas_src>
import functools
import math

import jax
import jax.numpy as jnp
from jax import lax
from jax.experimental import pallas as pl
from jax.experimental.pallas import tpu as pltpu


def _layernorm(v, w, b, eps=1e-5):
    mu = jnp.mean(v, axis=-1, keepdims=True)
    var = jnp.mean((v - mu) ** 2, axis=-1, keepdims=True)
    return (v - mu) * lax.rsqrt(var + eps) * w + b


def _gelu_exact(v):
    # nn.GELU default (exact erf form).  TODO(synk): tanh-approx GELU would move work
    # from the VPU (erf polynomial) onto the EUP slot but changes module semantics.
    return 0.5 * v * (1.0 + lax.erf(v * (1.0 / math.sqrt(2.0))))


# --------------------------------------------------------------------------------------
# Kernel
# --------------------------------------------------------------------------------------
def block_kernel(x_ref,
                 ln1w_ref, ln1b_ref,
                 wqkv_ref, wproj_ref, bproj_ref,
                 ln2w_ref, ln2b_ref,
                 wfc1_ref, bfc1_ref, wfc2_ref, bfc2_ref,
                 o_ref,
                 k_sc, v_sc,
                 *, num_heads, kv_tile):
    bB, N, C = x_ref.shape
    H = num_heads
    Dh = C // H
    bf16 = jnp.bfloat16
    num_kv = N // kv_tile                      # static at trace time

    # Hoist all (grid-constant) parameter loads out of the row loop.
    ln1w, ln1b = ln1w_ref[0], ln1b_ref[0]
    ln2w, ln2b = ln2w_ref[0], ln2b_ref[0]
    wqkv, wproj, bproj = wqkv_ref[...], wproj_ref[...], bproj_ref[0]
    wfc1, bfc1 = wfc1_ref[...], bfc1_ref[0]
    wfc2, bfc2 = wfc2_ref[...], bfc2_ref[0]

    for r in range(bB):                        # static unroll: rows are independent
        x = x_ref[r]                                                        # (N, C) f32

        # ---------------- attention branch ----------------
        xn = _layernorm(x, ln1w, ln1b)
        qkv = jnp.dot(xn.astype(bf16), wqkv,
                      preferred_element_type=jnp.float32)                  # (N, 3C) f32
        # attention scale is folded into the q-columns of wqkv at weight-prep time.
        qh = jnp.transpose(qkv[:, 0 * C:1 * C].reshape(N, H, Dh), (1, 0, 2)).astype(bf16)
        kh = jnp.transpose(qkv[:, 1 * C:2 * C].reshape(N, H, Dh), (1, 0, 2)).astype(bf16)
        vh = jnp.transpose(qkv[:, 2 * C:3 * C].reshape(N, H, Dh), (1, 0, 2)).astype(bf16)

        if num_kv == 1:
            # Single kv tile: direct (deferred-normalization) softmax.
            s = jnp.einsum('hnd,hmd->hnm', qh, kh,
                           preferred_element_type=jnp.float32)             # (H, N, N)
            m = jnp.max(s, axis=-1, keepdims=True)
            p = jnp.exp(s - m)
            l = jnp.sum(p, axis=-1, keepdims=True)
            acc = jnp.einsum('hnm,hmd->hnd', p.astype(bf16), vh,
                             preferred_element_type=jnp.float32)           # (H, N, Dh)
        else:
            # Streaming (online) softmax over kv tiles: the full (H, N, N) score
            # tensor is never materialized -- live block is (H, N, kv_tile).
            k_sc[...] = kh
            v_sc[...] = vh

            def body(i, carry):
                m, l, acc = carry
                off = pl.multiple_of(i * kv_tile, kv_tile)
                kt = k_sc[:, pl.ds(off, kv_tile), :]                       # (H, t, Dh)
                vt = v_sc[:, pl.ds(off, kv_tile), :]
                s = jnp.einsum('hnd,hmd->hnm', qh, kt,
                               preferred_element_type=jnp.float32)         # (H, N, t)
                m_new = jnp.maximum(m, jnp.max(s, axis=-1, keepdims=True))
                alpha = jnp.exp(m - m_new)
                p = jnp.exp(s - m_new)
                l = alpha * l + jnp.sum(p, axis=-1, keepdims=True)
                acc = alpha * acc + jnp.einsum('hnm,hmd->hnd', p.astype(bf16), vt,
                                               preferred_element_type=jnp.float32)
                return m_new, l, acc

            m0 = jnp.full((H, N, 1), -jnp.inf, jnp.float32)
            l0 = jnp.zeros((H, N, 1), jnp.float32)
            a0 = jnp.zeros((H, N, Dh), jnp.float32)
            _, l, acc = lax.fori_loop(0, num_kv, body, (m0, l0, a0))

        # Deferred softmax normalization on the small (H, N, Dh) tile (EUP reciprocal).
        pv = acc * pl.reciprocal(l, approx=True)
        av = jnp.transpose(pv, (1, 0, 2)).reshape(N, C)                    # (N, C) f32
        attn_out = jnp.dot(av.astype(bf16), wproj,
                           preferred_element_type=jnp.float32) + bproj
        x1 = x + attn_out

        # ---------------- MLP branch ----------------
        xn2 = _layernorm(x1, ln2w, ln2b)
        hdn = jnp.dot(xn2.astype(bf16), wfc1,
                      preferred_element_type=jnp.float32) + bfc1
        hdn = _gelu_exact(hdn)                                             # f32 elementwise
        mlp_out = jnp.dot(hdn.astype(bf16), wfc2,
                          preferred_element_type=jnp.float32) + bfc2

        o_ref[r] = (x1 + mlp_out).astype(o_ref.dtype)


# --------------------------------------------------------------------------------------
# Wrapper / tiling decisions
# --------------------------------------------------------------------------------------
def _choose_kv_tile(N):
    # Stream the kv axis in tiles so the live score block is (H, N, kv_tile) rather
    # than (H, N, N).  Falls back to a single tile when N has no suitable divisor
    # (e.g. N=197 for ViT-B/16 @ 224, where the full block is small anyway).
    for t in (512, 256, 128):
        if N % t == 0 and N // t >= 2:
            return t
    return N


def _choose_block_b(B, N, C):
    # Amortize the ~0.35us per-grid-step overhead when a single (N, C) row is tiny.
    row_bytes = N * C * 4
    best = 1
    for cand in range(1, min(B, 8) + 1):
        if B % cand == 0 and cand * row_bytes <= (1 << 20):
            best = cand
    return best


def _vmem_capacity_bytes():
    try:
        return int(pltpu.get_tpu_info().vmem_capacity_bytes)
    except Exception:
        return 64 * 1024 * 1024   # conservative fallback (v7x per-TensorCore VMEM)


def _estimate_vmem_bytes(bB, N, C, Hid, H, kv_tile, single_buffer_weights):
    Dh = C // H
    f32, bf16 = 4, 2
    wbuf = 1 if single_buffer_weights else 2
    weights = wbuf * bf16 * (3 * C * C + C * C + C * Hid + Hid * C)   # matmul weights
    small = wbuf * f32 * (6 * C + Hid)                                # LN params + biases
    io = 2 * 2 * bB * N * C * f32                                     # double-buffered x / out
    kv_scratch = 2 * H * N * Dh * bf16                                # K/V streaming scratch
    act = (
        3 * N * C * f32                                               # qkv
        + 3 * N * C * bf16                                            # q / k / v bf16
        + H * N * kv_tile * (f32 + bf16)                              # score tile + bf16 copy
        + H * N * Dh * f32                                            # attention accumulator
        + 2 * H * N * f32                                             # running max / sum
        + 4 * N * C * f32                                             # xn, x1, av, residuals
        + N * Hid * (f32 + bf16)                                      # MLP hidden + bf16 cast
    )
    return weights + small + io + kv_scratch + 2 * act                # 2x activation headroom


def prepare_block_params(params, *, num_heads):
    """One-time weight prep (cache & reuse): bf16 MXU weights, attn scale folded into
    the q-columns of wqkv, f32 LayerNorm params / biases."""
    C = params["wqkv"].shape[0]
    scale = (C // num_heads) ** -0.5
    f32 = jnp.float32
    wqkv = params["wqkv"].astype(f32)
    wqkv = jnp.concatenate([wqkv[:, :C] * scale, wqkv[:, C:]], axis=1)
    return {
        "ln1_w": params["ln1_w"].astype(f32), "ln1_b": params["ln1_b"].astype(f32),
        "wqkv": wqkv.astype(jnp.bfloat16),
        "wproj": params["wproj"].astype(jnp.bfloat16),
        "bproj": params["bproj"].astype(f32),
        "ln2_w": params["ln2_w"].astype(f32), "ln2_b": params["ln2_b"].astype(f32),
        "wfc1": params["wfc1"].astype(jnp.bfloat16), "bfc1": params["bfc1"].astype(f32),
        "wfc2": params["wfc2"].astype(jnp.bfloat16), "bfc2": params["bfc2"].astype(f32),
    }


def vit_block(x, prep, *, num_heads, single_buffer_weights=True):
    B, N, C = x.shape
    H = num_heads
    Dh = C // H
    Hid = prep["wfc1"].shape[1]
    bB = _choose_block_b(B, N, C)
    kv_tile = _choose_kv_tile(N)
    assert B % bB == 0 and N % kv_tile == 0 and C % H == 0

    weight_shapes = [
        (1, C), (1, C),                       # ln1 w / b
        (C, 3 * C), (C, C), (1, C),           # wqkv, wproj, bproj
        (1, C), (1, C),                       # ln2 w / b
        (C, Hid), (1, Hid), (Hid, C), (1, C)  # fc1 w/b, fc2 w/b
    ]
    if single_buffer_weights:
        # Grid-constant operands -> whole-array VMEM residents: single-buffered,
        # copied in once (halves resident weight footprint vs. pipelined specs).
        w_specs = [pl.BlockSpec(memory_space=pltpu.MemorySpace.VMEM)
                   for _ in weight_shapes]
    else:
        # Fallback: classic blocked specs with a constant index_map.
        w_specs = [pl.BlockSpec(s, lambda b: (0, 0)) for s in weight_shapes]

    est = _estimate_vmem_bytes(bB, N, C, Hid, H, kv_tile, single_buffer_weights)
    cap = _vmem_capacity_bytes()
    # ~15% headroom for compiler-internal scratch/semaphores; no artificial 64 MiB clamp
    # on 128 MiB parts (v5e/v6e) -- the cap is derived from the actual chip.
    vmem_limit = int(min(max(est, 32 * 1024 * 1024), int(0.85 * cap)))

    grid_spec = pltpu.PrefetchScalarGridSpec(
        num_scalar_prefetch=0,
        grid=(B // bB,),
        in_specs=[pl.BlockSpec((bB, N, C), lambda b: (b, 0, 0))] + w_specs,
        out_specs=pl.BlockSpec((bB, N, C), lambda b: (b, 0, 0)),
        scratch_shapes=[pltpu.VMEM((H, N, Dh), jnp.bfloat16),   # K tiles (streaming path)
                        pltpu.VMEM((H, N, Dh), jnp.bfloat16)],  # V tiles (streaming path)
    )

    return pl.pallas_call(
        functools.partial(block_kernel, num_heads=H, kv_tile=kv_tile),
        out_shape=jax.ShapeDtypeStruct((B, N, C), x.dtype),
        grid_spec=grid_spec,
        compiler_params=pltpu.CompilerParams(
            # Independent batch-row blocks -> megacore sharding on multi-TC parts.
            # TODO(synk): for B=1 inference on v7x a second parallel (query-tile) grid
            # axis would be needed to keep both TensorCores busy.
            dimension_semantics=("parallel",),
            vmem_limit_bytes=vmem_limit,
        ),
    )(x,
      prep["ln1_w"], prep["ln1_b"],
      prep["wqkv"], prep["wproj"], prep["bproj"],
      prep["ln2_w"], prep["ln2_b"],
      prep["wfc1"], prep["bfc1"], prep["wfc2"], prep["bfc2"])


# --------------------------------------------------------------------------------------
# Pure-JAX f32 reference (mirrors the PyTorch Block forward)
# --------------------------------------------------------------------------------------
def vit_block_ref(x, params, *, num_heads):
    B, N, C = x.shape
    Dh = C // num_heads

    xn = _layernorm(x, params["ln1_w"][0], params["ln1_b"][0])
    qkv = xn @ params["wqkv"]
    q, k, v = jnp.split(qkv, 3, axis=-1)
    q = q.reshape(B, N, num_heads, Dh).transpose(0, 2, 1, 3)
    k = k.reshape(B, N, num_heads, Dh).transpose(0, 2, 1, 3)
    v = v.reshape(B, N, num_heads, Dh).transpose(0, 2, 1, 3)
    attn = jax.nn.softmax((q * (Dh ** -0.5)) @ jnp.swapaxes(k, -2, -1), axis=-1)
    av = (attn @ v).transpose(0, 2, 1, 3).reshape(B, N, C)
    x1 = x + av @ params["wproj"] + params["bproj"][0]

    xn2 = _layernorm(x1, params["ln2_w"][0], params["ln2_b"][0])
    h = _gelu_exact(xn2 @ params["wfc1"] + params["bfc1"][0])
    return x1 + h @ params["wfc2"] + params["bfc2"][0]


# --------------------------------------------------------------------------------------
if __name__ == "__main__":
    def make_params(key, C, Hid):
        ks = jax.random.split(key, 7)
        return {
            "ln1_w": jnp.ones((1, C), jnp.float32),
            "ln1_b": jnp.zeros((1, C), jnp.float32),
            "wqkv":  0.02 * jax.random.normal(ks[0], (C, 3 * C), jnp.float32),
            "wproj": 0.02 * jax.random.normal(ks[1], (C, C), jnp.float32),
            "bproj": 0.02 * jax.random.normal(ks[2], (1, C), jnp.float32),
            "ln2_w": jnp.ones((1, C), jnp.float32),
            "ln2_b": jnp.zeros((1, C), jnp.float32),
            "wfc1":  0.02 * jax.random.normal(ks[3], (C, Hid), jnp.float32),
            "bfc1":  0.02 * jax.random.normal(ks[4], (1, Hid), jnp.float32),
            "wfc2":  0.02 * jax.random.normal(ks[5], (Hid, C), jnp.float32),
            "bfc2":  0.02 * jax.random.normal(ks[6], (1, C), jnp.float32),
        }

    def run_case(key, *, B, N, C, H, mlp_ratio=4.0):
        Hid = int(C * mlp_ratio)
        kp, kx = jax.random.split(key)
        params = make_params(kp, C, Hid)
        prep = prepare_block_params(params, num_heads=H)   # bf16 cast + scale fold, once
        x = jax.random.normal(kx, (B, N, C), jnp.float32)
        try:
            out = jax.block_until_ready(vit_block(x, prep, num_heads=H))
        except Exception:
            # Fallback if this Pallas build rejects whole-array VMEM operands.
            out = jax.block_until_ready(
                vit_block(x, prep, num_heads=H, single_buffer_weights=False))
        ref = vit_block_ref(x, params, num_heads=H)
        assert out.shape == (B, N, C)
        assert jnp.allclose(out, ref, atol=2e-2, rtol=2e-2), (
            f"mismatch vs reference at B={B} N={N} C={C} H={H}")

    root = jax.random.PRNGKey(0)
    k_small, k_stream = jax.random.split(root)
    # Small shape: single kv tile -> direct softmax path.
    run_case(k_small, B=2, N=8, C=32, H=4)
    # Shape exercising the streaming (kv-tiled online-softmax) path: N=256 -> 2 tiles of 128.
    run_case(k_stream, B=1, N=256, C=64, H=4)

    print("KERNEL_OK")
</pallas_src>

<mosaic_0001>
module attributes {stable_mosaic.version = 11 : i64} {
  func.func @block_kernel(%arg0: i32, %arg1: memref<2x8x32xf32, #tpu.memory_space<vmem>>, %arg2: memref<1x32xf32, #tpu.memory_space<vmem>>, %arg3: memref<1x32xf32, #tpu.memory_space<vmem>>, %arg4: memref<32x96xbf16, #tpu.memory_space<vmem>>, %arg5: memref<32x32xbf16, #tpu.memory_space<vmem>>, %arg6: memref<1x32xf32, #tpu.memory_space<vmem>>, %arg7: memref<1x32xf32, #tpu.memory_space<vmem>>, %arg8: memref<1x32xf32, #tpu.memory_space<vmem>>, %arg9: memref<32x128xbf16, #tpu.memory_space<vmem>>, %arg10: memref<1x128xf32, #tpu.memory_space<vmem>>, %arg11: memref<128x32xbf16, #tpu.memory_space<vmem>>, %arg12: memref<1x32xf32, #tpu.memory_space<vmem>>, %arg13: memref<2x8x32xf32, #tpu.memory_space<vmem>>, %arg14: memref<4x8x8xbf16, #tpu.memory_space<vmem>>, %arg15: memref<4x8x8xbf16, #tpu.memory_space<vmem>>) attributes {dimension_semantics = [#tpu.dimension_semantics<parallel>], iteration_bounds = array<i64: 1>, scalar_prefetch = 0 : i64, scratch_operands = 2 : i64, tpu.core_type = #tpu.core_type<tc>, window_params = [{transform_indices = @transform_0, window_bounds = array<i64: 2, 8, 32>}, {pipeline_mode = #tpu.pipeline_mode<synchronous>, transform_indices = @transform_1, window_bounds = array<i64: 1, 32>}, {pipeline_mode = #tpu.pipeline_mode<synchronous>, transform_indices = @transform_2, window_bounds = array<i64: 1, 32>}, {pipeline_mode = #tpu.pipeline_mode<synchronous>, transform_indices = @transform_3, window_bounds = array<i64: 32, 96>}, {pipeline_mode = #tpu.pipeline_mode<synchronous>, transform_indices = @transform_4, window_bounds = array<i64: 32, 32>}, {pipeline_mode = #tpu.pipeline_mode<synchronous>, transform_indices = @transform_5, window_bounds = array<i64: 1, 32>}, {pipeline_mode = #tpu.pipeline_mode<synchronous>, transform_indices = @transform_6, window_bounds = array<i64: 1, 32>}, {pipeline_mode = #tpu.pipeline_mode<synchronous>, transform_indices = @transform_7, window_bounds = array<i64: 1, 32>}, {pipeline_mode = #tpu.pipeline_mode<synchronous>, transform_indices = @transform_8, window_bounds = array<i64: 32, 128>}, {pipeline_mode = #tpu.pipeline_mode<synchronous>, transform_indices = @transform_9, window_bounds = array<i64: 1, 128>}, {pipeline_mode = #tpu.pipeline_mode<synchronous>, transform_indices = @transform_10, window_bounds = array<i64: 128, 32>}, {pipeline_mode = #tpu.pipeline_mode<synchronous>, transform_indices = @transform_11, window_bounds = array<i64: 1, 32>}, {transform_indices = @transform_12, window_bounds = array<i64: 2, 8, 32>}]} {
    %c0 = arith.constant 0 : index
    %c0_0 = arith.constant 0 : index
    %0 = vector.load %arg2[%c0, %c0_0] : memref<1x32xf32, #tpu.memory_space<vmem>>, vector<1x32xf32>
    %1 = vector.shape_cast %0 : vector<1x32xf32> to vector<32xf32>
    %c0_1 = arith.constant 0 : index
    %c0_2 = arith.constant 0 : index
    %2 = vector.load %arg3[%c0_1, %c0_2] : memref<1x32xf32, #tpu.memory_space<vmem>>, vector<1x32xf32>
    %3 = vector.shape_cast %2 : vector<1x32xf32> to vector<32xf32>
    %c0_3 = arith.constant 0 : index
    %c0_4 = arith.constant 0 : index
    %4 = vector.load %arg7[%c0_3, %c0_4] : memref<1x32xf32, #tpu.memory_space<vmem>>, vector<1x32xf32>
    %5 = vector.shape_cast %4 : vector<1x32xf32> to vector<32xf32>
    %c0_5 = arith.constant 0 : index
    %c0_6 = arith.constant 0 : index
    %6 = vector.load %arg8[%c0_5, %c0_6] : memref<1x32xf32, #tpu.memory_space<vmem>>, vector<1x32xf32>
    %7 = vector.shape_cast %6 : vector<1x32xf32> to vector<32xf32>
    %c0_7 = arith.constant 0 : index
    %c0_8 = arith.constant 0 : index
    %8 = vector.load %arg4[%c0_7, %c0_8] : memref<32x96xbf16, #tpu.memory_space<vmem>>, vector<32x96xbf16>
    %c0_9 = arith.constant 0 : index
    %c0_10 = arith.constant 0 : index
    %9 = vector.load %arg5[%c0_9, %c0_10] : memref<32x32xbf16, #tpu.memory_space<vmem>>, vector<32x32xbf16>
    %c0_11 = arith.constant 0 : index
    %c0_12 = arith.constant 0 : index
    %10 = vector.load %arg6[%c0_11, %c0_12] : memref<1x32xf32, #tpu.memory_space<vmem>>, vector<1x32xf32>
    %11 = vector.shape_cast %10 : vector<1x32xf32> to vector<32xf32>
    %c0_13 = arith.constant 0 : index
    %c0_14 = arith.constant 0 : index
    %12 = vector.load %arg9[%c0_13, %c0_14] : memref<32x128xbf16, #tpu.memory_space<vmem>>, vector<32x128xbf16>
    %c0_15 = arith.constant 0 : index
    %c0_16 = arith.constant 0 : index
    %13 = vector.load %arg10[%c0_15, %c0_16] : memref<1x128xf32, #tpu.memory_space<vmem>>, vector<1x128xf32>
    %14 = vector.shape_cast %13 : vector<1x128xf32> to vector<128xf32>
    %c0_17 = arith.constant 0 : index
    %c0_18 = arith.constant 0 : index
    %15 = vector.load %arg11[%c0_17, %c0_18] : memref<128x32xbf16, #tpu.memory_space<vmem>>, vector<128x32xbf16>
    %c0_19 = arith.constant 0 : index
    %c0_20 = arith.constant 0 : index
    %16 = vector.load %arg12[%c0_19, %c0_20] : memref<1x32xf32, #tpu.memory_space<vmem>>, vector<1x32xf32>
    %17 = vector.shape_cast %16 : vector<1x32xf32> to vector<32xf32>
    %c0_21 = arith.constant 0 : index
    %c0_22 = arith.constant 0 : index
    %c0_23 = arith.constant 0 : index
    %18 = vector.load %arg1[%c0_21, %c0_22, %c0_23] : memref<2x8x32xf32, #tpu.memory_space<vmem>>, vector<1x8x32xf32>
    %19 = vector.shape_cast %18 : vector<1x8x32xf32> to vector<8x32xf32>
    %cst = arith.constant dense<0.000000e+00> : vector<8xf32>
    %20 = vector.multi_reduction <add>, %19, %cst [1] : vector<8x32xf32> to vector<8xf32>
    %21 = vector.shape_cast %20 : vector<8xf32> to vector<8x1xf32>
    %cst_24 = arith.constant 3.200000e+01 : f32
    %22 = vector.broadcast %cst_24 : f32 to vector<8x1xf32>
    %23 = arith.divf %21, %22 : vector<8x1xf32>
    %24 = vector.broadcast %23 : vector<8x1xf32> to vector<8x32xf32>
    %25 = arith.subf %19, %24 : vector<8x32xf32>
    %26 = arith.mulf %25, %25 : vector<8x32xf32>
    %cst_25 = arith.constant dense<0.000000e+00> : vector<8xf32>
    %27 = vector.multi_reduction <add>, %26, %cst_25 [1] : vector<8x32xf32> to vector<8xf32>
    %28 = vector.shape_cast %27 : vector<8xf32> to vector<8x1xf32>
    %cst_26 = arith.constant 3.200000e+01 : f32
    %29 = vector.broadcast %cst_26 : f32 to vector<8x1xf32>
    %30 = arith.divf %28, %29 : vector<8x1xf32>
    %31 = vector.broadcast %23 : vector<8x1xf32> to vector<8x32xf32>
    %32 = arith.subf %19, %31 : vector<8x32xf32>
    %cst_27 = arith.constant 9.99999974E-6 : f32
    %33 = vector.broadcast %cst_27 : f32 to vector<8x1xf32>
    %34 = arith.addf %30, %33 : vector<8x1xf32>
    %35 = math.rsqrt %34 : vector<8x1xf32>
    %36 = vector.broadcast %35 : vector<8x1xf32> to vector<8x32xf32>
    %37 = arith.mulf %32, %36 : vector<8x32xf32>
    %38 = vector.shape_cast %1 : vector<32xf32> to vector<1x32xf32>
    %39 = vector.broadcast %38 : vector<1x32xf32> to vector<8x32xf32>
    %40 = arith.mulf %37, %39 : vector<8x32xf32>
    %41 = vector.shape_cast %3 : vector<32xf32> to vector<1x32xf32>
    %42 = vector.broadcast %41 : vector<1x32xf32> to vector<8x32xf32>
    %43 = arith.addf %40, %42 : vector<8x32xf32>
    %44 = arith.truncf %43 : vector<8x32xf32> to vector<8x32xbf16>
    %cst_28 = arith.constant dense<0.000000e+00> : vector<8x96xf32>
    %45 = tpu.matmul %44, %8, %cst_28 {dimension_numbers = #tpu.dot_dimension_numbers<[1], [0], [0], [1], [0, 0, 1, 1], [], []>} : vector<8x32xbf16>, vector<32x96xbf16>, vector<8x96xf32> -> vector<8x96xf32>
    %46 = vector.extract_strided_slice %45 {offsets = [0, 0], sizes = [8, 32], strides = [1, 1]} : vector<8x96xf32> to vector<8x32xf32>
    %47 = vector.shape_cast %46 : vector<8x32xf32> to vector<8x4x8xf32>
    %48 = tpu.transpose %47, [1, 0, 2] : vector<8x4x8xf32> -> vector<4x8x8xf32>
    %49 = arith.truncf %48 : vector<4x8x8xf32> to vector<4x8x8xbf16>
    %50 = vector.extract_strided_slice %45 {offsets = [0, 32], sizes = [8, 32], strides = [1, 1]} : vector<8x96xf32> to vector<8x32xf32>
    %51 = vector.shape_cast %50 : vector<8x32xf32> to vector<8x4x8xf32>
    %52 = tpu.transpose %51, [1, 0, 2] : vector<8x4x8xf32> -> vector<4x8x8xf32>
    %53 = arith.truncf %52 : vector<4x8x8xf32> to vector<4x8x8xbf16>
    %54 = vector.extract_strided_slice %45 {offsets = [0, 64], sizes = [8, 32], strides = [1, 1]} : vector<8x96xf32> to vector<8x32xf32>
    %55 = vector.shape_cast %54 : vector<8x32xf32> to vector<8x4x8xf32>
    %56 = tpu.transpose %55, [1, 0, 2] : vector<8x4x8xf32> -> vector<4x8x8xf32>
    %57 = arith.truncf %56 : vector<4x8x8xf32> to vector<4x8x8xbf16>
    "tpu.trace_start"() <{level = 10 : i32, message = "hnd,hmd->hnm"}> : () -> ()
    %cst_29 = arith.constant dense<0.000000e+00> : vector<4x8x8xf32>
    %58 = tpu.matmul %49, %53, %cst_29 {dimension_numbers = #tpu.dot_dimension_numbers<[2], [2], [1], [1], [0, 0, 0, 1, 1, 1], [0], [0]>} : vector<4x8x8xbf16>, vector<4x8x8xbf16>, vector<4x8x8xf32> -> vector<4x8x8xf32>
    "tpu.trace_stop"() : () -> ()
    %cst_30 = arith.constant dense<0xFF800000> : vector<4x8xf32>
    %59 = vector.multi_reduction <maximumf>, %58, %cst_30 [2] : vector<4x8x8xf32> to vector<4x8xf32>
    %60 = vector.shape_cast %59 : vector<4x8xf32> to vector<4x8x1xf32>
    %61 = vector.broadcast %60 : vector<4x8x1xf32> to vector<4x8x8xf32>
    %62 = arith.subf %58, %61 : vector<4x8x8xf32>
    %63 = math.exp %62 : vector<4x8x8xf32>
    %cst_31 = arith.constant dense<0.000000e+00> : vector<4x8xf32>
    %64 = vector.multi_reduction <add>, %63, %cst_31 [2] : vector<4x8x8xf32> to vector<4x8xf32>
    %65 = vector.shape_cast %64 : vector<4x8xf32> to vector<4x8x1xf32>
    %66 = arith.truncf %63 : vector<4x8x8xf32> to vector<4x8x8xbf16>
    "tpu.trace_start"() <{level = 10 : i32, message = "hnm,hmd->hnd"}> : () -> ()
    %cst_32 = arith.constant dense<0.000000e+00> : vector<4x8x8xf32>
    %67 = tpu.matmul %66, %57, %cst_32 {dimension_numbers = #tpu.dot_dimension_numbers<[2], [1], [1], [2], [0, 0, 0, 1, 1, 2], [0], [0]>} : vector<4x8x8xbf16>, vector<4x8x8xbf16>, vector<4x8x8xf32> -> vector<4x8x8xf32>
    "tpu.trace_stop"() : () -> ()
    %68 = tpu.reciprocal %65 {approx = true} : vector<4x8x1xf32> -> vector<4x8x1xf32>
    %69 = vector.broadcast %68 : vector<4x8x1xf32> to vector<4x8x8xf32>
    %70 = arith.mulf %67, %69 : vector<4x8x8xf32>
    %71 = tpu.transpose %70, [1, 0, 2] : vector<4x8x8xf32> -> vector<8x4x8xf32>
    %72 = vector.shape_cast %71 : vector<8x4x8xf32> to vector<8x32xf32>
    %73 = arith.truncf %72 : vector<8x32xf32> to vector<8x32xbf16>
    %cst_33 = arith.constant dense<0.000000e+00> : vector<8x32xf32>
    %74 = tpu.matmul %73, %9, %cst_33 {dimension_numbers = #tpu.dot_dimension_numbers<[1], [0], [0], [1], [0, 0, 1, 1], [], []>} : vector<8x32xbf16>, vector<32x32xbf16>, vector<8x32xf32> -> vector<8x32xf32>
    %75 = vector.shape_cast %11 : vector<32xf32> to vector<1x32xf32>
    %76 = vector.broadcast %75 : vector<1x32xf32> to vector<8x32xf32>
    %77 = arith.addf %74, %76 : vector<8x32xf32>
    %78 = arith.addf %19, %77 : vector<8x32xf32>
    %cst_34 = arith.constant dense<0.000000e+00> : vector<8xf32>
    %79 = vector.multi_reduction <add>, %78, %cst_34 [1] : vector<8x32xf32> to vector<8xf32>
    %80 = vector.shape_cast %79 : vector<8xf32> to vector<8x1xf32>
    %cst_35 = arith.constant 3.200000e+01 : f32
    %81 = vector.broadcast %cst_35 : f32 to vector<8x1xf32>
    %82 = arith.divf %80, %81 : vector<8x1xf32>
    %83 = vector.broadcast %82 : vector<8x1xf32> to vector<8x32xf32>
    %84 = arith.subf %78, %83 : vector<8x32xf32>
    %85 = arith.mulf %84, %84 : vector<8x32xf32>
    %cst_36 = arith.constant dense<0.000000e+00> : vector<8xf32>
    %86 = vector.multi_reduction <add>, %85, %cst_36 [1] : vector<8x32xf32> to vector<8xf32>
    %87 = vector.shape_cast %86 : vector<8xf32> to vector<8x1xf32>
    %cst_37 = arith.constant 3.200000e+01 : f32
    %88 = vector.broadcast %cst_37 : f32 to vector<8x1xf32>
    %89 = arith.divf %87, %88 : vector<8x1xf32>
    %90 = vector.broadcast %82 : vector<8x1xf32> to vector<8x32xf32>
    %91 = arith.subf %78, %90 : vector<8x32xf32>
    %cst_38 = arith.constant 9.99999974E-6 : f32
    %92 = vector.broadcast %cst_38 : f32 to vector<8x1xf32>
    %93 = arith.addf %89, %92 : vector<8x1xf32>
    %94 = math.rsqrt %93 : vector<8x1xf32>
    %95 = vector.broadcast %94 : vector<8x1xf32> to vector<8x32xf32>
    %96 = arith.mulf %91, %95 : vector<8x32xf32>
    %97 = vector.shape_cast %5 : vector<32xf32> to vector<1x32xf32>
    %98 = vector.broadcast %97 : vector<1x32xf32> to vector<8x32xf32>
    %99 = arith.mulf %96, %98 : vector<8x32xf32>
    %100 = vector.shape_cast %7 : vector<32xf32> to vector<1x32xf32>
    %101 = vector.broadcast %100 : vector<1x32xf32> to vector<8x32xf32>
    %102 = arith.addf %99, %101 : vector<8x32xf32>
    %103 = arith.truncf %102 : vector<8x32xf32> to vector<8x32xbf16>
    %cst_39 = arith.constant dense<0.000000e+00> : vector<8x128xf32>
    %104 = tpu.matmul %103, %12, %cst_39 {dimension_numbers = #tpu.dot_dimension_numbers<[1], [0], [0], [1], [0, 0, 1, 1], [], []>} : vector<8x32xbf16>, vector<32x128xbf16>, vector<8x128xf32> -> vector<8x128xf32>
    %105 = vector.shape_cast %14 : vector<128xf32> to vector<1x128xf32>
    %106 = vector.broadcast %105 : vector<1x128xf32> to vector<8x128xf32>
    %107 = arith.addf %104, %106 : vector<8x128xf32>
    %cst_40 = arith.constant 5.000000e-01 : f32
    %108 = vector.broadcast %cst_40 : f32 to vector<8x128xf32>
    %109 = arith.mulf %108, %107 : vector<8x128xf32>
    %cst_41 = arith.constant 0.707106769 : f32
    %110 = vector.broadcast %cst_41 : f32 to vector<8x128xf32>
    %111 = arith.mulf %107, %110 : vector<8x128xf32>
    %112 = math.erf %111 : vector<8x128xf32>
    %cst_42 = arith.constant 1.000000e+00 : f32
    %113 = vector.broadcast %cst_42 : f32 to vector<8x128xf32>
    %114 = arith.addf %113, %112 : vector<8x128xf32>
    %115 = arith.mulf %109, %114 : vector<8x128xf32>
    %116 = arith.truncf %115 : vector<8x128xf32> to vector<8x128xbf16>
    %cst_43 = arith.constant dense<0.000000e+00> : vector<8x32xf32>
    %117 = tpu.matmul %116, %15, %cst_43 {dimension_numbers = #tpu.dot_dimension_numbers<[1], [0], [0], [1], [0, 0, 1, 1], [], []>} : vector<8x128xbf16>, vector<128x32xbf16>, vector<8x32xf32> -> vector<8x32xf32>
    %118 = vector.shape_cast %17 : vector<32xf32> to vector<1x32xf32>
    %119 = vector.broadcast %118 : vector<1x32xf32> to vector<8x32xf32>
    %120 = arith.addf %117, %119 : vector<8x32xf32>
    %121 = arith.addf %78, %120 : vector<8x32xf32>
    %c0_44 = arith.constant 0 : index
    %c0_45 = arith.constant 0 : index
    %c0_46 = arith.constant 0 : index
    %122 = vector.load %arg13[%c0_44, %c0_45, %c0_46] : memref<2x8x32xf32, #tpu.memory_space<vmem>>, vector<1x8x32xf32>
    %123 = vector.shape_cast %122 : vector<1x8x32xf32> to vector<8x32xf32>
    %124 = vector.shape_cast %121 : vector<8x32xf32> to vector<1x8x32xf32>
    tpu.vector_store %arg13[%c0_44, %c0_45, %c0_46], %124 {strides = array<i32>} : memref<2x8x32xf32, #tpu.memory_space<vmem>>, vector<1x8x32xf32>,
    %c1 = arith.constant 1 : index
    %c0_47 = arith.constant 0 : index
    %c0_48 = arith.constant 0 : index
    %125 = vector.load %arg1[%c1, %c0_47, %c0_48] : memref<2x8x32xf32, #tpu.memory_space<vmem>>, vector<1x8x32xf32>
    %126 = vector.shape_cast %125 : vector<1x8x32xf32> to vector<8x32xf32>
    %cst_49 = arith.constant dense<0.000000e+00> : vector<8xf32>
    %127 = vector.multi_reduction <add>, %126, %cst_49 [1] : vector<8x32xf32> to vector<8xf32>
    %128 = vector.shape_cast %127 : vector<8xf32> to vector<8x1xf32>
    %cst_50 = arith.constant 3.200000e+01 : f32
    %129 = vector.broadcast %cst_50 : f32 to vector<8x1xf32>
    %130 = arith.divf %128, %129 : vector<8x1xf32>
    %131 = vector.broadcast %130 : vector<8x1xf32> to vector<8x32xf32>
    %132 = arith.subf %126, %131 : vector<8x32xf32>
    %133 = arith.mulf %132, %132 : vector<8x32xf32>
    %cst_51 = arith.constant dense<0.000000e+00> : vector<8xf32>
    %134 = vector.multi_reduction <add>, %133, %cst_51 [1] : vector<8x32xf32> to vector<8xf32>
    %135 = vector.shape_cast %134 : vector<8xf32> to vector<8x1xf32>
    %cst_52 = arith.constant 3.200000e+01 : f32
    %136 = vector.broadcast %cst_52 : f32 to vector<8x1xf32>
    %137 = arith.divf %135, %136 : vector<8x1xf32>
    %138 = vector.broadcast %130 : vector<8x1xf32> to vector<8x32xf32>
    %139 = arith.subf %126, %138 : vector<8x32xf32>
    %cst_53 = arith.constant 9.99999974E-6 : f32
    %140 = vector.broadcast %cst_53 : f32 to vector<8x1xf32>
    %141 = arith.addf %137, %140 : vector<8x1xf32>
    %142 = math.rsqrt %141 : vector<8x1xf32>
    %143 = vector.broadcast %142 : vector<8x1xf32> to vector<8x32xf32>
    %144 = arith.mulf %139, %143 : vector<8x32xf32>
    %145 = vector.shape_cast %1 : vector<32xf32> to vector<1x32xf32>
    %146 = vector.broadcast %145 : vector<1x32xf32> to vector<8x32xf32>
    %147 = arith.mulf %144, %146 : vector<8x32xf32>
    %148 = vector.shape_cast %3 : vector<32xf32> to vector<1x32xf32>
    %149 = vector.broadcast %148 : vector<1x32xf32> to vector<8x32xf32>
    %150 = arith.addf %147, %149 : vector<8x32xf32>
    %151 = arith.truncf %150 : vector<8x32xf32> to vector<8x32xbf16>
    %cst_54 = arith.constant dense<0.000000e+00> : vector<8x96xf32>
    %152 = tpu.matmul %151, %8, %cst_54 {dimension_numbers = #tpu.dot_dimension_numbers<[1], [0], [0], [1], [0, 0, 1, 1], [], []>} : vector<8x32xbf16>, vector<32x96xbf16>, vector<8x96xf32> -> vector<8x96xf32>
    %153 = vector.extract_strided_slice %152 {offsets = [0, 0], sizes = [8, 32], strides = [1, 1]} : vector<8x96xf32> to vector<8x32xf32>
    %154 = vector.shape_cast %153 : vector<8x32xf32> to vector<8x4x8xf32>
    %155 = tpu.transpose %154, [1, 0, 2] : vector<8x4x8xf32> -> vector<4x8x8xf32>
    %156 = arith.truncf %155 : vector<4x8x8xf32> to vector<4x8x8xbf16>
    %157 = vector.extract_strided_slice %152 {offsets = [0, 32], sizes = [8, 32], strides = [1, 1]} : vector<8x96xf32> to vector<8x32xf32>
    %158 = vector.shape_cast %157 : vector<8x32xf32> to vector<8x4x8xf32>
    %159 = tpu.transpose %158, [1, 0, 2] : vector<8x4x8xf32> -> vector<4x8x8xf32>
    %160 = arith.truncf %159 : vector<4x8x8xf32> to vector<4x8x8xbf16>
    %161 = vector.extract_strided_slice %152 {offsets = [0, 64], sizes = [8, 32], strides = [1, 1]} : vector<8x96xf32> to vector<8x32xf32>
    %162 = vector.shape_cast %161 : vector<8x32xf32> to vector<8x4x8xf32>
    %163 = tpu.transpose %162, [1, 0, 2] : vector<8x4x8xf32> -> vector<4x8x8xf32>
    %164 = arith.truncf %163 : vector<4x8x8xf32> to vector<4x8x8xbf16>
    "tpu.trace_start"() <{level = 10 : i32, message = "hnd,hmd->hnm"}> : () -> ()
    %cst_55 = arith.constant dense<0.000000e+00> : vector<4x8x8xf32>
    %165 = tpu.matmul %156, %160, %cst_55 {dimension_numbers = #tpu.dot_dimension_numbers<[2], [2], [1], [1], [0, 0, 0, 1, 1, 1], [0], [0]>} : vector<4x8x8xbf16>, vector<4x8x8xbf16>, vector<4x8x8xf32> -> vector<4x8x8xf32>
    "tpu.trace_stop"() : () -> ()
    %cst_56 = arith.constant dense<0xFF800000> : vector<4x8xf32>
    %166 = vector.multi_reduction <maximumf>, %165, %cst_56 [2] : vector<4x8x8xf32> to vector<4x8xf32>
    %167 = vector.shape_cast %166 : vector<4x8xf32> to vector<4x8x1xf32>
    %168 = vector.broadcast %167 : vector<4x8x1xf32> to vector<4x8x8xf32>
    %169 = arith.subf %165, %168 : vector<4x8x8xf32>
    %170 = math.exp %169 : vector<4x8x8xf32>
    %cst_57 = arith.constant dense<0.000000e+00> : vector<4x8xf32>
    %171 = vector.multi_reduction <add>, %170, %cst_57 [2] : vector<4x8x8xf32> to vector<4x8xf32>
    %172 = vector.shape_cast %171 : vector<4x8xf32> to vector<4x8x1xf32>
    %173 = arith.truncf %170 : vector<4x8x8xf32> to vector<4x8x8xbf16>
    "tpu.trace_start"() <{level = 10 : i32, message = "hnm,hmd->hnd"}> : () -> ()
    %cst_58 = arith.constant dense<0.000000e+00> : vector<4x8x8xf32>
    %174 = tpu.matmul %173, %164, %cst_58 {dimension_numbers = #tpu.dot_dimension_numbers<[2], [1], [1], [2], [0, 0, 0, 1, 1, 2], [0], [0]>} : vector<4x8x8xbf16>, vector<4x8x8xbf16>, vector<4x8x8xf32> -> vector<4x8x8xf32>
    "tpu.trace_stop"() : () -> ()
    %175 = tpu.reciprocal %172 {approx = true} : vector<4x8x1xf32> -> vector<4x8x1xf32>
    %176 = vector.broadcast %175 : vector<4x8x1xf32> to vector<4x8x8xf32>
    %177 = arith.mulf %174, %176 : vector<4x8x8xf32>
    %178 = tpu.transpose %177, [1, 0, 2] : vector<4x8x8xf32> -> vector<8x4x8xf32>
    %179 = vector.shape_cast %178 : vector<8x4x8xf32> to vector<8x32xf32>
    %180 = arith.truncf %179 : vector<8x32xf32> to vector<8x32xbf16>
    %cst_59 = arith.constant dense<0.000000e+00> : vector<8x32xf32>
    %181 = tpu.matmul %180, %9, %cst_59 {dimension_numbers = #tpu.dot_dimension_numbers<[1], [0], [0], [1], [0, 0, 1, 1], [], []>} : vector<8x32xbf16>, vector<32x32xbf16>, vector<8x32xf32> -> vector<8x32xf32>
    %182 = vector.shape_cast %11 : vector<32xf32> to vector<1x32xf32>
    %183 = vector.broadcast %182 : vector<1x32xf32> to vector<8x32xf32>
    %184 = arith.addf %181, %183 : vector<8x32xf32>
    %185 = arith.addf %126, %184 : vector<8x32xf32>
    %cst_60 = arith.constant dense<0.000000e+00> : vector<8xf32>
    %186 = vector.multi_reduction <add>, %185, %cst_60 [1] : vector<8x32xf32> to vector<8xf32>
    %187 = vector.shape_cast %186 : vector<8xf32> to vector<8x1xf32>
    %cst_61 = arith.constant 3.200000e+01 : f32
    %188 = vector.broadcast %cst_61 : f32 to vector<8x1xf32>
    %189 = arith.divf %187, %188 : vector<8x1xf32>
    %190 = vector.broadcast %189 : vector<8x1xf32> to vector<8x32xf32>
    %191 = arith.subf %185, %190 : vector<8x32xf32>
    %192 = arith.mulf %191, %191 : vector<8x32xf32>
    %cst_62 = arith.constant dense<0.000000e+00> : vector<8xf32>
    %193 = vector.multi_reduction <add>, %192, %cst_62 [1] : vector<8x32xf32> to vector<8xf32>
    %194 = vector.shape_cast %193 : vector<8xf32> to vector<8x1xf32>
    %cst_63 = arith.constant 3.200000e+01 : f32
    %195 = vector.broadcast %cst_63 : f32 to vector<8x1xf32>
    %196 = arith.divf %194, %195 : vector<8x1xf32>
    %197 = vector.broadcast %189 : vector<8x1xf32> to vector<8x32xf32>
    %198 = arith.subf %185, %197 : vector<8x32xf32>
    %cst_64 = arith.constant 9.99999974E-6 : f32
    %199 = vector.broadcast %cst_64 : f32 to vector<8x1xf32>
    %200 = arith.addf %196, %199 : vector<8x1xf32>
    %201 = math.rsqrt %200 : vector<8x1xf32>
    %202 = vector.broadcast %201 : vector<8x1xf32> to vector<8x32xf32>
    %203 = arith.mulf %198, %202 : vector<8x32xf32>
    %204 = vector.shape_cast %5 : vector<32xf32> to vector<1x32xf32>
    %205 = vector.broadcast %204 : vector<1x32xf32> to vector<8x32xf32>
    %206 = arith.mulf %203, %205 : vector<8x32xf32>
    %207 = vector.shape_cast %7 : vector<32xf32> to vector<1x32xf32>
    %208 = vector.broadcast %207 : vector<1x32xf32> to vector<8x32xf32>
    %209 = arith.addf %206, %208 : vector<8x32xf32>
    %210 = arith.truncf %209 : vector<8x32xf32> to vector<8x32xbf16>
    %cst_65 = arith.constant dense<0.000000e+00> : vector<8x128xf32>
    %211 = tpu.matmul %210, %12, %cst_65 {dimension_numbers = #tpu.dot_dimension_numbers<[1], [0], [0], [1], [0, 0, 1, 1], [], []>} : vector<8x32xbf16>, vector<32x128xbf16>, vector<8x128xf32> -> vector<8x128xf32>
    %212 = vector.shape_cast %14 : vector<128xf32> to vector<1x128xf32>
    %213 = vector.broadcast %212 : vector<1x128xf32> to vector<8x128xf32>
    %214 = arith.addf %211, %213 : vector<8x128xf32>
    %cst_66 = arith.constant 5.000000e-01 : f32
    %215 = vector.broadcast %cst_66 : f32 to vector<8x128xf32>
    %216 = arith.mulf %215, %214 : vector<8x128xf32>
    %cst_67 = arith.constant 0.707106769 : f32
    %217 = vector.broadcast %cst_67 : f32 to vector<8x128xf32>
    %218 = arith.mulf %214, %217 : vector<8x128xf32>
    %219 = math.erf %218 : vector<8x128xf32>
    %cst_68 = arith.constant 1.000000e+00 : f32
    %220 = vector.broadcast %cst_68 : f32 to vector<8x128xf32>
    %221 = arith.addf %220, %219 : vector<8x128xf32>
    %222 = arith.mulf %216, %221 : vector<8x128xf32>
    %223 = arith.truncf %222 : vector<8x128xf32> to vector<8x128xbf16>
    %cst_69 = arith.constant dense<0.000000e+00> : vector<8x32xf32>
    %224 = tpu.matmul %223, %15, %cst_69 {dimension_numbers = #tpu.dot_dimension_numbers<[1], [0], [0], [1], [0, 0, 1, 1], [], []>} : vector<8x128xbf16>, vector<128x32xbf16>, vector<8x32xf32> -> vector<8x32xf32>
    %225 = vector.shape_cast %17 : vector<32xf32> to vector<1x32xf32>
    %226 = vector.broadcast %225 : vector<1x32xf32> to vector<8x32xf32>
    %227 = arith.addf %224, %226 : vector<8x32xf32>
    %228 = arith.addf %185, %227 : vector<8x32xf32>
    %c1_70 = arith.constant 1 : index
    %c0_71 = arith.constant 0 : index
    %c0_72 = arith.constant 0 : index
    %229 = vector.load %arg13[%c1_70, %c0_71, %c0_72] : memref<2x8x32xf32, #tpu.memory_space<vmem>>, vector<1x8x32xf32>
    %230 = vector.shape_cast %229 : vector<1x8x32xf32> to vector<8x32xf32>
    %231 = vector.shape_cast %228 : vector<8x32xf32> to vector<1x8x32xf32>
    tpu.vector_store %arg13[%c1_70, %c0_71, %c0_72], %231 {strides = array<i32>} : memref<2x8x32xf32, #tpu.memory_space<vmem>>, vector<1x8x32xf32>,
    return
  }
  func.func @transform_0(%arg0: i32) -> (i32, i32, i32) {
    %c0_i32 = arith.constant 0 : i32
    %c0_i32_0 = arith.constant 0 : i32
    %c0_i32_1 = arith.constant 0 : i32
    return %arg0, %c0_i32, %c0_i32_0 : i32, i32, i32
  }
  func.func @transform_1(%arg0: i32) -> (i32, i32) {
    %c0_i32 = arith.constant 0 : i32
    %c0_i32_0 = arith.constant 0 : i32
    %c0_i32_1 = arith.constant 0 : i32
    return %c0_i32, %c0_i32_0 : i32, i32
  }
  func.func @transform_2(%arg0: i32) -> (i32, i32) {
    %c0_i32 = arith.constant 0 : i32
    %c0_i32_0 = arith.constant 0 : i32
    %c0_i32_1 = arith.constant 0 : i32
    return %c0_i32, %c0_i32_0 : i32, i32
  }
  func.func @transform_3(%arg0: i32) -> (i32, i32) {
    %c0_i32 = arith.constant 0 : i32
    %c0_i32_0 = arith.constant 0 : i32
    %c0_i32_1 = arith.constant 0 : i32
    return %c0_i32, %c0_i32_0 : i32, i32
  }
  func.func @transform_4(%arg0: i32) -> (i32, i32) {
    %c0_i32 = arith.constant 0 : i32
    %c0_i32_0 = arith.constant 0 : i32
    %c0_i32_1 = arith.constant 0 : i32
    return %c0_i32, %c0_i32_0 : i32, i32
  }
  func.func @transform_5(%arg0: i32) -> (i32, i32) {
    %c0_i32 = arith.constant 0 : i32
    %c0_i32_0 = arith.constant 0 : i32
    %c0_i32_1 = arith.constant 0 : i32
    return %c0_i32, %c0_i32_0 : i32, i32
  }
  func.func @transform_6(%arg0: i32) -> (i32, i32) {
    %c0_i32 = arith.constant 0 : i32
    %c0_i32_0 = arith.constant 0 : i32
    %c0_i32_1 = arith.constant 0 : i32
    return %c0_i32, %c0_i32_0 : i32, i32
  }
  func.func @transform_7(%arg0: i32) -> (i32, i32) {
    %c0_i32 = arith.constant 0 : i32
    %c0_i32_0 = arith.constant 0 : i32
    %c0_i32_1 = arith.constant 0 : i32
    return %c0_i32, %c0_i32_0 : i32, i32
  }
  func.func @transform_8(%arg0: i32) -> (i32, i32) {
    %c0_i32 = arith.constant 0 : i32
    %c0_i32_0 = arith.constant 0 : i32
    %c0_i32_1 = arith.constant 0 : i32
    return %c0_i32, %c0_i32_0 : i32, i32
  }
  func.func @transform_9(%arg0: i32) -> (i32, i32) {
    %c0_i32 = arith.constant 0 : i32
    %c0_i32_0 = arith.constant 0 : i32
    %c0_i32_1 = arith.constant 0 : i32
    return %c0_i32, %c0_i32_0 : i32, i32
  }
  func.func @transform_10(%arg0: i32) -> (i32, i32) {
    %c0_i32 = arith.constant 0 : i32
    %c0_i32_0 = arith.constant 0 : i32
    %c0_i32_1 = arith.constant 0 : i32
    return %c0_i32, %c0_i32_0 : i32, i32
  }
  func.func @transform_11(%arg0: i32) -> (i32, i32) {
    %c0_i32 = arith.constant 0 : i32
    %c0_i32_0 = arith.constant 0 : i32
    %c0_i32_1 = arith.constant 0 : i32
    return %c0_i32, %c0_i32_0 : i32, i32
  }
  func.func @transform_12(%arg0: i32) -> (i32, i32, i32) {
    %c0_i32 = arith.constant 0 : i32
    %c0_i32_0 = arith.constant 0 : i32
    %c0_i32_1 = arith.constant 0 : i32
    return %arg0, %c0_i32, %c0_i32_0 : i32, i32, i32
  }
}

module attributes {stable_mosaic.version = 11 : i64} {
  func.func @block_kernel(%arg0: i32, %arg1: memref<2x8x32xf32, #tpu.memory_space<vmem>>, %arg2: memref<1x32xf32, #tpu.memory_space<vmem>>, %arg3: memref<1x32xf32, #tpu.memory_space<vmem>>, %arg4: memref<32x96xbf16, #tpu.memory_space<vmem>>, %arg5: memref<32x32xbf16, #tpu.memory_space<vmem>>, %arg6: memref<1x32xf32, #tpu.memory_space<vmem>>, %arg7: memref<1x32xf32, #tpu.memory_space<vmem>>, %arg8: memref<1x32xf32, #tpu.memory_space<vmem>>, %arg9: memref<32x128xbf16, #tpu.memory_space<vmem>>, %arg10: memref<1x128xf32, #tpu.memory_space<vmem>>, %arg11: memref<128x32xbf16, #tpu.memory_space<vmem>>, %arg12: memref<1x32xf32, #tpu.memory_space<vmem>>, %arg13: memref<2x8x32xf32, #tpu.memory_space<vmem>>, %arg14: memref<4x8x8xbf16, #tpu.memory_space<vmem>>, %arg15: memref<4x8x8xbf16, #tpu.memory_space<vmem>>) attributes {dimension_semantics = [#tpu.dimension_semantics<parallel>], iteration_bounds = array<i64: 1>, scalar_prefetch = 0 : i64, scratch_operands = 2 : i64, tpu.core_type = #tpu.core_type<tc>, window_params = [{transform_indices = @transform_0, window_bounds = array<i64: 2, 8, 32>}, {pipeline_mode = #tpu.pipeline_mode<synchronous>, transform_indices = @transform_1, window_bounds = array<i64: 1, 32>}, {pipeline_mode = #tpu.pipeline_mode<synchronous>, transform_indices = @transform_2, window_bounds = array<i64: 1, 32>}, {pipeline_mode = #tpu.pipeline_mode<synchronous>, transform_indices = @transform_3, window_bounds = array<i64: 32, 96>}, {pipeline_mode = #tpu.pipeline_mode<synchronous>, transform_indices = @transform_4, window_bounds = array<i64: 32, 32>}, {pipeline_mode = #tpu.pipeline_mode<synchronous>, transform_indices = @transform_5, window_bounds = array<i64: 1, 32>}, {pipeline_mode = #tpu.pipeline_mode<synchronous>, transform_indices = @transform_6, window_bounds = array<i64: 1, 32>}, {pipeline_mode = #tpu.pipeline_mode<synchronous>, transform_indices = @transform_7, window_bounds = array<i64: 1, 32>}, {pipeline_mode = #tpu.pipeline_mode<synchronous>, transform_indices = @transform_8, window_bounds = array<i64: 32, 128>}, {pipeline_mode = #tpu.pipeline_mode<synchronous>, transform_indices = @transform_9, window_bounds = array<i64: 1, 128>}, {pipeline_mode = #tpu.pipeline_mode<synchronous>, transform_indices = @transform_10, window_bounds = array<i64: 128, 32>}, {pipeline_mode = #tpu.pipeline_mode<synchronous>, transform_indices = @transform_11, window_bounds = array<i64: 1, 32>}, {transform_indices = @transform_12, window_bounds = array<i64: 2, 8, 32>}]} {
    %c0 = arith.constant 0 : index
    %c0_0 = arith.constant 0 : index
    %0 = vector.load %arg2[%c0, %c0_0] : memref<1x32xf32, #tpu.memory_space<vmem>>, vector<1x32xf32>
    %1 = vector.shape_cast %0 : vector<1x32xf32> to vector<32xf32>
    %c0_1 = arith.constant 0 : index
    %c0_2 = arith.constant 0 : index
    %2 = vector.load %arg3[%c0_1, %c0_2] : memref<1x32xf32, #tpu.memory_space<vmem>>, vector<1x32xf32>
    %3 = vector.shape_cast %2 : vector<1x32xf32> to vector<32xf32>
    %c0_3 = arith.constant 0 : index
    %c0_4 = arith.constant 0 : index
    %4 = vector.load %arg7[%c0_3, %c0_4] : memref<1x32xf32, #tpu.memory_space<vmem>>, vector<1x32xf32>
    %5 = vector.shape_cast %4 : vector<1x32xf32> to vector<32xf32>
    %c0_5 = arith.constant 0 : index
    %c0_6 = arith.constant 0 : index
    %6 = vector.load %arg8[%c0_5, %c0_6] : memref<1x32xf32, #tpu.memory_space<vmem>>, vector<1x32xf32>
    %7 = vector.shape_cast %6 : vector<1x32xf32> to vector<32xf32>
    %c0_7 = arith.constant 0 : index
    %c0_8 = arith.constant 0 : index
    %8 = vector.load %arg4[%c0_7, %c0_8] : memref<32x96xbf16, #tpu.memory_space<vmem>>, vector<32x96xbf16>
    %c0_9 = arith.constant 0 : index
    %c0_10 = arith.constant 0 : index
    %9 = vector.load %arg5[%c0_9, %c0_10] : memref<32x32xbf16, #tpu.memory_space<vmem>>, vector<32x32xbf16>
    %c0_11 = arith.constant 0 : index
    %c0_12 = arith.constant 0 : index
    %10 = vector.load %arg6[%c0_11, %c0_12] : memref<1x32xf32, #tpu.memory_space<vmem>>, vector<1x32xf32>
    %11 = vector.shape_cast %10 : vector<1x32xf32> to vector<32xf32>
    %c0_13 = arith.constant 0 : index
    %c0_14 = arith.constant 0 : index
    %12 = vector.load %arg9[%c0_13, %c0_14] : memref<32x128xbf16, #tpu.memory_space<vmem>>, vector<32x128xbf16>
    %c0_15 = arith.constant 0 : index
    %c0_16 = arith.constant 0 : index
    %13 = vector.load %arg10[%c0_15, %c0_16] : memref<1x128xf32, #tpu.memory_space<vmem>>, vector<1x128xf32>
    %14 = vector.shape_cast %13 : vector<1x128xf32> to vector<128xf32>
    %c0_17 = arith.constant 0 : index
    %c0_18 = arith.constant 0 : index
    %15 = vector.load %arg11[%c0_17, %c0_18] : memref<128x32xbf16, #tpu.memory_space<vmem>>, vector<128x32xbf16>
    %c0_19 = arith.constant 0 : index
    %c0_20 = arith.constant 0 : index
    %16 = vector.load %arg12[%c0_19, %c0_20] : memref<1x32xf32, #tpu.memory_space<vmem>>, vector<1x32xf32>
    %17 = vector.shape_cast %16 : vector<1x32xf32> to vector<32xf32>
    %c0_21 = arith.constant 0 : index
    %c0_22 = arith.constant 0 : index
    %c0_23 = arith.constant 0 : index
    %18 = vector.load %arg1[%c0_21, %c0_22, %c0_23] : memref<2x8x32xf32, #tpu.memory_space<vmem>>, vector<1x8x32xf32>
    %19 = vector.shape_cast %18 : vector<1x8x32xf32> to vector<8x32xf32>
    %cst = arith.constant dense<0.000000e+00> : vector<8xf32>
    %20 = vector.multi_reduction <add>, %19, %cst [1] : vector<8x32xf32> to vector<8xf32>
    %21 = vector.shape_cast %20 : vector<8xf32> to vector<8x1xf32>
    %cst_24 = arith.constant 3.200000e+01 : f32
    %22 = vector.broadcast %cst_24 : f32 to vector<8x1xf32>
    %23 = arith.divf %21, %22 : vector<8x1xf32>
    %24 = vector.broadcast %23 : vector<8x1xf32> to vector<8x32xf32>
    %25 = arith.subf %19, %24 : vector<8x32xf32>
    %26 = arith.mulf %25, %25 : vector<8x32xf32>
    %cst_25 = arith.constant dense<0.000000e+00> : vector<8xf32>
    %27 = vector.multi_reduction <add>, %26, %cst_25 [1] : vector<8x32xf32> to vector<8xf32>
    %28 = vector.shape_cast %27 : vector<8xf32> to vector<8x1xf32>
    %cst_26 = arith.constant 3.200000e+01 : f32
    %29 = vector.broadcast %cst_26 : f32 to vector<8x1xf32>
    %30 = arith.divf %28, %29 : vector<8x1xf32>
    %31 = vector.broadcast %23 : vector<8x1xf32> to vector<8x32xf32>
    %32 = arith.subf %19, %31 : vector<8x32xf32>
    %cst_27 = arith.constant 9.99999974E-6 : f32
    %33 = vector.broadcast %cst_27 : f32 to vector<8x1xf32>
    %34 = arith.addf %30, %33 : vector<8x1xf32>
    %35 = math.rsqrt %34 : vector<8x1xf32>
    %36 = vector.broadcast %35 : vector<8x1xf32> to vector<8x32xf32>
    %37 = arith.mulf %32, %36 : vector<8x32xf32>
    %38 = vector.shape_cast %1 : vector<32xf32> to vector<1x32xf32>
    %39 = vector.broadcast %38 : vector<1x32xf32> to vector<8x32xf32>
    %40 = arith.mulf %37, %39 : vector<8x32xf32>
    %41 = vector.shape_cast %3 : vector<32xf32> to vector<1x32xf32>
    %42 = vector.broadcast %41 : vector<1x32xf32> to vector<8x32xf32>
    %43 = arith.addf %40, %42 : vector<8x32xf32>
    %44 = arith.truncf %43 : vector<8x32xf32> to vector<8x32xbf16>
    %cst_28 = arith.constant dense<0.000000e+00> : vector<8x96xf32>
    %45 = tpu.matmul %44, %8, %cst_28 {dimension_numbers = #tpu.dot_dimension_numbers<[1], [0], [0], [1], [0, 0, 1, 1], [], []>} : vector<8x32xbf16>, vector<32x96xbf16>, vector<8x96xf32> -> vector<8x96xf32>
    %46 = vector.extract_strided_slice %45 {offsets = [0, 0], sizes = [8, 32], strides = [1, 1]} : vector<8x96xf32> to vector<8x32xf32>
    %47 = vector.shape_cast %46 : vector<8x32xf32> to vector<8x4x8xf32>
    %48 = tpu.transpose %47, [1, 0, 2] : vector<8x4x8xf32> -> vector<4x8x8xf32>
    %49 = arith.truncf %48 : vector<4x8x8xf32> to vector<4x8x8xbf16>
    %50 = vector.extract_strided_slice %45 {offsets = [0, 32], sizes = [8, 32], strides = [1, 1]} : vector<8x96xf32> to vector<8x32xf32>
    %51 = vector.shape_cast %50 : vector<8x32xf32> to vector<8x4x8xf32>
    %52 = tpu.transpose %51, [1, 0, 2] : vector<8x4x8xf32> -> vector<4x8x8xf32>
    %53 = arith.truncf %52 : vector<4x8x8xf32> to vector<4x8x8xbf16>
    %54 = vector.extract_strided_slice %45 {offsets = [0, 64], sizes = [8, 32], strides = [1, 1]} : vector<8x96xf32> to vector<8x32xf32>
    %55 = vector.shape_cast %54 : vector<8x32xf32> to vector<8x4x8xf32>
    %56 = tpu.transpose %55, [1, 0, 2] : vector<8x4x8xf32> -> vector<4x8x8xf32>
    %57 = arith.truncf %56 : vector<4x8x8xf32> to vector<4x8x8xbf16>
    "tpu.trace_start"() <{level = 10 : i32, message = "hnd,hmd->hnm"}> : () -> ()
    %cst_29 = arith.constant dense<0.000000e+00> : vector<4x8x8xf32>
    %58 = tpu.matmul %49, %53, %cst_29 {dimension_numbers = #tpu.dot_dimension_numbers<[2], [2], [1], [1], [0, 0, 0, 1, 1, 1], [0], [0]>} : vector<4x8x8xbf16>, vector<4x8x8xbf16>, vector<4x8x8xf32> -> vector<4x8x8xf32>
    "tpu.trace_stop"() : () -> ()
    %cst_30 = arith.constant dense<0xFF800000> : vector<4x8xf32>
    %59 = vector.multi_reduction <maximumf>, %58, %cst_30 [2] : vector<4x8x8xf32> to vector<4x8xf32>
    %60 = vector.shape_cast %59 : vector<4x8xf32> to vector<4x8x1xf32>
    %61 = vector.broadcast %60 : vector<4x8x1xf32> to vector<4x8x8xf32>
    %62 = arith.subf %58, %61 : vector<4x8x8xf32>
    %63 = math.exp %62 : vector<4x8x8xf32>
    %cst_31 = arith.constant dense<0.000000e+00> : vector<4x8xf32>
    %64 = vector.multi_reduction <add>, %63, %cst_31 [2] : vector<4x8x8xf32> to vector<4x8xf32>
    %65 = vector.shape_cast %64 : vector<4x8xf32> to vector<4x8x1xf32>
    %66 = arith.truncf %63 : vector<4x8x8xf32> to vector<4x8x8xbf16>
    "tpu.trace_start"() <{level = 10 : i32, message = "hnm,hmd->hnd"}> : () -> ()
    %cst_32 = arith.constant dense<0.000000e+00> : vector<4x8x8xf32>
    %67 = tpu.matmul %66, %57, %cst_32 {dimension_numbers = #tpu.dot_dimension_numbers<[2], [1], [1], [2], [0, 0, 0, 1, 1, 2], [0], [0]>} : vector<4x8x8xbf16>, vector<4x8x8xbf16>, vector<4x8x8xf32> -> vector<4x8x8xf32>
    "tpu.trace_stop"() : () -> ()
    %68 = tpu.reciprocal %65 {approx = true} : vector<4x8x1xf32> -> vector<4x8x1xf32>
    %69 = vector.broadcast %68 : vector<4x8x1xf32> to vector<4x8x8xf32>
    %70 = arith.mulf %67, %69 : vector<4x8x8xf32>
    %71 = tpu.transpose %70, [1, 0, 2] : vector<4x8x8xf32> -> vector<8x4x8xf32>
    %72 = vector.shape_cast %71 : vector<8x4x8xf32> to vector<8x32xf32>
    %73 = arith.truncf %72 : vector<8x32xf32> to vector<8x32xbf16>
    %cst_33 = arith.constant dense<0.000000e+00> : vector<8x32xf32>
    %74 = tpu.matmul %73, %9, %cst_33 {dimension_numbers = #tpu.dot_dimension_numbers<[1], [0], [0], [1], [0, 0, 1, 1], [], []>} : vector<8x32xbf16>, vector<32x32xbf16>, vector<8x32xf32> -> vector<8x32xf32>
    %75 = vector.shape_cast %11 : vector<32xf32> to vector<1x32xf32>
    %76 = vector.broadcast %75 : vector<1x32xf32> to vector<8x32xf32>
    %77 = arith.addf %74, %76 : vector<8x32xf32>
    %78 = arith.addf %19, %77 : vector<8x32xf32>
    %cst_34 = arith.constant dense<0.000000e+00> : vector<8xf32>
    %79 = vector.multi_reduction <add>, %78, %cst_34 [1] : vector<8x32xf32> to vector<8xf32>
    %80 = vector.shape_cast %79 : vector<8xf32> to vector<8x1xf32>
    %cst_35 = arith.constant 3.200000e+01 : f32
    %81 = vector.broadcast %cst_35 : f32 to vector<8x1xf32>
    %82 = arith.divf %80, %81 : vector<8x1xf32>
    %83 = vector.broadcast %82 : vector<8x1xf32> to vector<8x32xf32>
    %84 = arith.subf %78, %83 : vector<8x32xf32>
    %85 = arith.mulf %84, %84 : vector<8x32xf32>
    %cst_36 = arith.constant dense<0.000000e+00> : vector<8xf32>
    %86 = vector.multi_reduction <add>, %85, %cst_36 [1] : vector<8x32xf32> to vector<8xf32>
    %87 = vector.shape_cast %86 : vector<8xf32> to vector<8x1xf32>
    %cst_37 = arith.constant 3.200000e+01 : f32
    %88 = vector.broadcast %cst_37 : f32 to vector<8x1xf32>
    %89 = arith.divf %87, %88 : vector<8x1xf32>
    %90 = vector.broadcast %82 : vector<8x1xf32> to vector<8x32xf32>
    %91 = arith.subf %78, %90 : vector<8x32xf32>
    %cst_38 = arith.constant 9.99999974E-6 : f32
    %92 = vector.broadcast %cst_38 : f32 to vector<8x1xf32>
    %93 = arith.addf %89, %92 : vector<8x1xf32>
    %94 = math.rsqrt %93 : vector<8x1xf32>
    %95 = vector.broadcast %94 : vector<8x1xf32> to vector<8x32xf32>
    %96 = arith.mulf %91, %95 : vector<8x32xf32>
    %97 = vector.shape_cast %5 : vector<32xf32> to vector<1x32xf32>
    %98 = vector.broadcast %97 : vector<1x32xf32> to vector<8x32xf32>
    %99 = arith.mulf %96, %98 : vector<8x32xf32>
    %100 = vector.shape_cast %7 : vector<32xf32> to vector<1x32xf32>
    %101 = vector.broadcast %100 : vector<1x32xf32> to vector<8x32xf32>
    %102 = arith.addf %99, %101 : vector<8x32xf32>
    %103 = arith.truncf %102 : vector<8x32xf32> to vector<8x32xbf16>
    %cst_39 = arith.constant dense<0.000000e+00> : vector<8x128xf32>
    %104 = tpu.matmul %103, %12, %cst_39 {dimension_numbers = #tpu.dot_dimension_numbers<[1], [0], [0], [1], [0, 0, 1, 1], [], []>} : vector<8x32xbf16>, vector<32x128xbf16>, vector<8x128xf32> -> vector<8x128xf32>
    %105 = vector.shape_cast %14 : vector<128xf32> to vector<1x128xf32>
    %106 = vector.broadcast %105 : vector<1x128xf32> to vector<8x128xf32>
    %107 = arith.addf %104, %106 : vector<8x128xf32>
    %cst_40 = arith.constant 5.000000e-01 : f32
    %108 = vector.broadcast %cst_40 : f32 to vector<8x128xf32>
    %109 = arith.mulf %108, %107 : vector<8x128xf32>
    %cst_41 = arith.constant 0.707106769 : f32
    %110 = vector.broadcast %cst_41 : f32 to vector<8x128xf32>
    %111 = arith.mulf %107, %110 : vector<8x128xf32>
    %112 = math.erf %111 : vector<8x128xf32>
    %cst_42 = arith.constant 1.000000e+00 : f32
    %113 = vector.broadcast %cst_42 : f32 to vector<8x128xf32>
    %114 = arith.addf %113, %112 : vector<8x128xf32>
    %115 = arith.mulf %109, %114 : vector<8x128xf32>
    %116 = arith.truncf %115 : vector<8x128xf32> to vector<8x128xbf16>
    %cst_43 = arith.constant dense<0.000000e+00> : vector<8x32xf32>
    %117 = tpu.matmul %116, %15, %cst_43 {dimension_numbers = #tpu.dot_dimension_numbers<[1], [0], [0], [1], [0, 0, 1, 1], [], []>} : vector<8x128xbf16>, vector<128x32xbf16>, vector<8x32xf32> -> vector<8x32xf32>
    %118 = vector.shape_cast %17 : vector<32xf32> to vector<1x32xf32>
    %119 = vector.broadcast %118 : vector<1x32xf32> to vector<8x32xf32>
    %120 = arith.addf %117, %119 : vector<8x32xf32>
    %121 = arith.addf %78, %120 : vector<8x32xf32>
    %c0_44 = arith.constant 0 : index
    %c0_45 = arith.constant 0 : index
    %c0_46 = arith.constant 0 : index
    %122 = vector.load %arg13[%c0_44, %c0_45, %c0_46] : memref<2x8x32xf32, #tpu.memory_space<vmem>>, vector<1x8x32xf32>
    %123 = vector.shape_cast %122 : vector<1x8x32xf32> to vector<8x32xf32>
    %124 = vector.shape_cast %121 : vector<8x32xf32> to vector<1x8x32xf32>
    tpu.vector_store %arg13[%c0_44, %c0_45, %c0_46], %124 {strides = array<i32>} : memref<2x8x32xf32, #tpu.memory_space<vmem>>, vector<1x8x32xf32>,
    %c1 = arith.constant 1 : index
    %c0_47 = arith.constant 0 : index
    %c0_48 = arith.constant 0 : index
    %125 = vector.load %arg1[%c1, %c0_47, %c0_48] : memref<2x8x32xf32, #tpu.memory_space<vmem>>, vector<1x8x32xf32>
    %126 = vector.shape_cast %125 : vector<1x8x32xf32> to vector<8x32xf32>
    %cst_49 = arith.constant dense<0.000000e+00> : vector<8xf32>
    %127 = vector.multi_reduction <add>, %126, %cst_49 [1] : vector<8x32xf32> to vector<8xf32>
    %128 = vector.shape_cast %127 : vector<8xf32> to vector<8x1xf32>
    %cst_50 = arith.constant 3.200000e+01 : f32
    %129 = vector.broadcast %cst_50 : f32 to vector<8x1xf32>
    %130 = arith.divf %128, %129 : vector<8x1xf32>
    %131 = vector.broadcast %130 : vector<8x1xf32> to vector<8x32xf32>
    %132 = arith.subf %126, %131 : vector<8x32xf32>
    %133 = arith.mulf %132, %132 : vector<8x32xf32>
    %cst_51 = arith.constant dense<0.000000e+00> : vector<8xf32>
    %134 = vector.multi_reduction <add>, %133, %cst_51 [1] : vector<8x32xf32> to vector<8xf32>
    %135 = vector.shape_cast %134 : vector<8xf32> to vector<8x1xf32>
    %cst_52 = arith.constant 3.200000e+01 : f32
    %136 = vector.broadcast %cst_52 : f32 to vector<8x1xf32>
    %137 = arith.divf %135, %136 : vector<8x1xf32>
    %138 = vector.broadcast %130 : vector<8x1xf32> to vector<8x32xf32>
    %139 = arith.subf %126, %138 : vector<8x32xf32>
    %cst_53 = arith.constant 9.99999974E-6 : f32
    %140 = vector.broadcast %cst_53 : f32 to vector<8x1xf32>
    %141 = arith.addf %137, %140 : vector<8x1xf32>
    %142 = math.rsqrt %141 : vector<8x1xf32>
    %143 = vector.broadcast %142 : vector<8x1xf32> to vector<8x32xf32>
    %144 = arith.mulf %139, %143 : vector<8x32xf32>
    %145 = vector.shape_cast %1 : vector<32xf32> to vector<1x32xf32>
    %146 = vector.broadcast %145 : vector<1x32xf32> to vector<8x32xf32>
    %147 = arith.mulf %144, %146 : vector<8x32xf32>
    %148 = vector.shape_cast %3 : vector<32xf32> to vector<1x32xf32>
    %149 = vector.broadcast %148 : vector<1x32xf32> to vector<8x32xf32>
    %150 = arith.addf %147, %149 : vector<8x32xf32>
    %151 = arith.truncf %150 : vector<8x32xf32> to vector<8x32xbf16>
    %cst_54 = arith.constant dense<0.000000e+00> : vector<8x96xf32>
    %152 = tpu.matmul %151, %8, %cst_54 {dimension_numbers = #tpu.dot_dimension_numbers<[1], [0], [0], [1], [0, 0, 1, 1], [], []>} : vector<8x32xbf16>, vector<32x96xbf16>, vector<8x96xf32> -> vector<8x96xf32>
    %153 = vector.extract_strided_slice %152 {offsets = [0, 0], sizes = [8, 32], strides = [1, 1]} : vector<8x96xf32> to vector<8x32xf32>
    %154 = vector.shape_cast %153 : vector<8x32xf32> to vector<8x4x8xf32>
    %155 = tpu.transpose %154, [1, 0, 2] : vector<8x4x8xf32> -> vector<4x8x8xf32>
    %156 = arith.truncf %155 : vector<4x8x8xf32> to vector<4x8x8xbf16>
    %157 = vector.extract_strided_slice %152 {offsets = [0, 32], sizes = [8, 32], strides = [1, 1]} : vector<8x96xf32> to vector<8x32xf32>
    %158 = vector.shape_cast %157 : vector<8x32xf32> to vector<8x4x8xf32>
    %159 = tpu.transpose %158, [1, 0, 2] : vector<8x4x8xf32> -> vector<4x8x8xf32>
    %160 = arith.truncf %159 : vector<4x8x8xf32> to vector<4x8x8xbf16>
    %161 = vector.extract_strided_slice %152 {offsets = [0, 64], sizes = [8, 32], strides = [1, 1]} : vector<8x96xf32> to vector<8x32xf32>
    %162 = vector.shape_cast %161 : vector<8x32xf32> to vector<8x4x8xf32>
    %163 = tpu.transpose %162, [1, 0, 2] : vector<8x4x8xf32> -> vector<4x8x8xf32>
    %164 = arith.truncf %163 : vector<4x8x8xf32> to vector<4x8x8xbf16>
    "tpu.trace_start"() <{level = 10 : i32, message = "hnd,hmd->hnm"}> : () -> ()
    %cst_55 = arith.constant dense<0.000000e+00> : vector<4x8x8xf32>
    %165 = tpu.matmul %156, %160, %cst_55 {dimension_numbers = #tpu.dot_dimension_numbers<[2], [2], [1], [1], [0, 0, 0, 1, 1, 1], [0], [0]>} : vector<4x8x8xbf16>, vector<4x8x8xbf16>, vector<4x8x8xf32> -> vector<4x8x8xf32>
    "tpu.trace_stop"() : () -> ()
    %cst_56 = arith.constant dense<0xFF800000> : vector<4x8xf32>
    %166 = vector.multi_reduction <maximumf>, %165, %cst_56 [2] : vector<4x8x8xf32> to vector<4x8xf32>
    %167 = vector.shape_cast %166 : vector<4x8xf32> to vector<4x8x1xf32>
    %168 = vector.broadcast %167 : vector<4x8x1xf32> to vector<4x8x8xf32>
    %169 = arith.subf %165, %168 : vector<4x8x8xf32>
    %170 = math.exp %169 : vector<4x8x8xf32>
    %cst_57 = arith.constant dense<0.000000e+00> : vector<4x8xf32>
    %171 = vector.multi_reduction <add>, %170, %cst_57 [2] : vector<4x8x8xf32> to vector<4x8xf32>
    %172 = vector.shape_cast %171 : vector<4x8xf32> to vector<4x8x1xf32>
    %173 = arith.truncf %170 : vector<4x8x8xf32> to vector<4x8x8xbf16>
    "tpu.trace_start"() <{level = 10 : i32, message = "hnm,hmd->hnd"}> : () -> ()
    %cst_58 = arith.constant dense<0.000000e+00> : vector<4x8x8xf32>
    %174 = tpu.matmul %173, %164, %cst_58 {dimension_numbers = #tpu.dot_dimension_numbers<[2], [1], [1], [2], [0, 0, 0, 1, 1, 2], [0], [0]>} : vector<4x8x8xbf16>, vector<4x8x8xbf16>, vector<4x8x8xf32> -> vector<4x8x8xf32>
    "tpu.trace_stop"() : () -> ()
    %175 = tpu.reciprocal %172 {approx = true} : vector<4x8x1xf32> -> vector<4x8x1xf32>
    %176 = vector.broadcast %175 : vector<4x8x1xf32> to vector<4x8x8xf32>
    %177 = arith.mulf %174, %176 : vector<4x8x8xf32>
    %178 = tpu.transpose %177, [1, 0, 2] : vector<4x8x8xf32> -> vector<8x4x8xf32>
    %179 = vector.shape_cast %178 : vector<8x4x8xf32> to vector<8x32xf32>
    %180 = arith.truncf %179 : vector<8x32xf32> to vector<8x32xbf16>
    %cst_59 = arith.constant dense<0.000000e+00> : vector<8x32xf32>
    %181 = tpu.matmul %180, %9, %cst_59 {dimension_numbers = #tpu.dot_dimension_numbers<[1], [0], [0], [1], [0, 0, 1, 1], [], []>} : vector<8x32xbf16>, vector<32x32xbf16>, vector<8x32xf32> -> vector<8x32xf32>
    %182 = vector.shape_cast %11 : vector<32xf32> to vector<1x32xf32>
    %183 = vector.broadcast %182 : vector<1x32xf32> to vector<8x32xf32>
    %184 = arith.addf %181, %183 : vector<8x32xf32>
    %185 = arith.addf %126, %184 : vector<8x32xf32>
    %cst_60 = arith.constant dense<0.000000e+00> : vector<8xf32>
    %186 = vector.multi_reduction <add>, %185, %cst_60 [1] : vector<8x32xf32> to vector<8xf32>
    %187 = vector.shape_cast %186 : vector<8xf32> to vector<8x1xf32>
    %cst_61 = arith.constant 3.200000e+01 : f32
    %188 = vector.broadcast %cst_61 : f32 to vector<8x1xf32>
    %189 = arith.divf %187, %188 : vector<8x1xf32>
    %190 = vector.broadcast %189 : vector<8x1xf32> to vector<8x32xf32>
    %191 = arith.subf %185, %190 : vector<8x32xf32>
    %192 = arith.mulf %191, %191 : vector<8x32xf32>
    %cst_62 = arith.constant dense<0.000000e+00> : vector<8xf32>
    %193 = vector.multi_reduction <add>, %192, %cst_62 [1] : vector<8x32xf32> to vector<8xf32>
    %194 = vector.shape_cast %193 : vector<8xf32> to vector<8x1xf32>
    %cst_63 = arith.constant 3.200000e+01 : f32
    %195 = vector.broadcast %cst_63 : f32 to vector<8x1xf32>
    %196 = arith.divf %194, %195 : vector<8x1xf32>
    %197 = vector.broadcast %189 : vector<8x1xf32> to vector<8x32xf32>
    %198 = arith.subf %185, %197 : vector<8x32xf32>
    %cst_64 = arith.constant 9.99999974E-6 : f32
    %199 = vector.broadcast %cst_64 : f32 to vector<8x1xf32>
    %200 = arith.addf %196, %199 : vector<8x1xf32>
    %201 = math.rsqrt %200 : vector<8x1xf32>
    %202 = vector.broadcast %201 : vector<8x1xf32> to vector<8x32xf32>
    %203 = arith.mulf %198, %202 : vector<8x32xf32>
    %204 = vector.shape_cast %5 : vector<32xf32> to vector<1x32xf32>
    %205 = vector.broadcast %204 : vector<1x32xf32> to vector<8x32xf32>
    %206 = arith.mulf %203, %205 : vector<8x32xf32>
    %207 = vector.shape_cast %7 : vector<32xf32> to vector<1x32xf32>
    %208 = vector.broadcast %207 : vector<1x32xf32> to vector<8x32xf32>
    %209 = arith.addf %206, %208 : vector<8x32xf32>
    %210 = arith.truncf %209 : vector<8x32xf32> to vector<8x32xbf16>
    %cst_65 = arith.constant dense<0.000000e+00> : vector<8x128xf32>
    %211 = tpu.matmul %210, %12, %cst_65 {dimension_numbers = #tpu.dot_dimension_numbers<[1], [0], [0], [1], [0, 0, 1, 1], [], []>} : vector<8x32xbf16>, vector<32x128xbf16>, vector<8x128xf32> -> vector<8x128xf32>
    %212 = vector.shape_cast %14 : vector<128xf32> to vector<1x128xf32>
    %213 = vector.broadcast %212 : vector<1x128xf32> to vector<8x128xf32>
    %214 = arith.addf %211, %213 : vector<8x128xf32>
    %cst_66 = arith.constant 5.000000e-01 : f32
    %215 = vector.broadcast %cst_66 : f32 to vector<8x128xf32>
    %216 = arith.mulf %215, %214 : vector<8x128xf32>
    %cst_67 = arith.constant 0.707106769 : f32
    %217 = vector.broadcast %cst_67 : f32 to vector<8x128xf32>
    %218 = arith.mulf %214, %217 : vector<8x128xf32>
    %219 = math.erf %218 : vector<8x128xf32>
    %cst_68 = arith.constant 1.000000e+00 : f32
    %220 = vector.broadcast %cst_68 : f32 to vector<8x128xf32>
    %221 = arith.addf %220, %219 : vector<8x128xf32>
    %222 = arith.mulf %216, %221 : vector<8x128xf32>
    %223 = arith.truncf %222 : vector<8x128xf32> to vector<8x128xbf16>
    %cst_69 = arith.constant dense<0.000000e+00> : vector<8x32xf32>
    %224 = tpu.matmul %223, %15, %cst_69 {dimension_numbers = #tpu.dot_dimension_numbers<[1], [0], [0], [1], [0, 0, 1, 1], [], []>} : vector<8x128xbf16>, vector<128x32xbf16>, vector<8x32xf32> -> vector<8x32xf32>
    %225 = vector.shape_cast %17 : vector<32xf32> to vector<1x32xf32>
    %226 = vector.broadcast %225 : vector<1x32xf32> to vector<8x32xf32>
    %227 = arith.addf %224, %226 : vector<8x32xf32>
    %228 = arith.addf %185, %227 : vector<8x32xf32>
    %c1_70 = arith.constant 1 : index
    %c0_71 = arith.constant 0 : index
    %c0_72 = arith.constant 0 : index
    %229 = vector.load %arg13[%c1_70, %c0_71, %c0_72] : memref<2x8x32xf32, #tpu.memory_space<vmem>>, vector<1x8x32xf32>
    %230 = vector.shape_cast %229 : vector<1x8x32xf32> to vector<8x32xf32>
    %231 = vector.shape_cast %228 : vector<8x32xf32> to vector<1x8x32xf32>
    tpu.vector_store %arg13[%c1_70, %c0_71, %c0_72], %231 {strides = array<i32>} : memref<2x8x32xf32, #tpu.memory_space<vmem>>, vector<1x8x32xf32>,
    return
  }
  func.func @transform_0(%arg0: i32) -> (i32, i32, i32) {
    %c0_i32 = arith.constant 0 : i32
    %c0_i32_0 = arith.constant 0 : i32
    %c0_i32_1 = arith.constant 0 : i32
    return %arg0, %c0_i32, %c0_i32_0 : i32, i32, i32
  }
  func.func @transform_1(%arg0: i32) -> (i32, i32) {
    %c0_i32 = arith.constant 0 : i32
    %c0_i32_0 = arith.constant 0 : i32
    %c0_i32_1 = arith.constant 0 : i32
    return %c0_i32, %c0_i32_0 : i32, i32
  }
  func.func @transform_2(%arg0: i32) -> (i32, i32) {
    %c0_i32 = arith.constant 0 : i32
    %c0_i32_0 = arith.constant 0 : i32
    %c0_i32_1 = arith.constant 0 : i32
    return %c0_i32, %c0_i32_0 : i32, i32
  }
  func.func @transform_3(%arg0: i32) -> (i32, i32) {
    %c0_i32 = arith.constant 0 : i32
    %c0_i32_0 = arith.constant 0 : i32
    %c0_i32_1 = arith.constant 0 : i32
    return %c0_i32, %c0_i32_0 : i32, i32
  }
  func.func @transform_4(%arg0: i32) -> (i32, i32) {
    %c0_i32 = arith.constant 0 : i32
    %c0_i32_0 = arith.constant 0 : i32
    %c0_i32_1 = arith.constant 0 : i32
    return %c0_i32, %c0_i32_0 : i32, i32
  }
  func.func @transform_5(%arg0: i32) -> (i32, i32) {
    %c0_i32 = arith.constant 0 : i32
    %c0_i32_0 = arith.constant 0 : i32
    %c0_i32_1 = arith.constant 0 : i32
    return %c0_i32, %c0_i32_0 : i32, i32
  }
  func.func @transform_6(%arg0: i32) -> (i32, i32) {
    %c0_i32 = arith.constant 0 : i32
    %c0_i32_0 = arith.constant 0 : i32
    %c0_i32_1 = arith.constant 0 : i32
    return %c0_i32, %c0_i32_0 : i32, i32
  }
  func.func @transform_7(%arg0: i32) -> (i32, i32) {
    %c0_i32 = arith.constant 0 : i32
    %c0_i32_0 = arith.constant 0 : i32
    %c0_i32_1 = arith.constant 0 : i32
    return %c0_i32, %c0_i32_0 : i32, i32
  }
  func.func @transform_8(%arg0: i32) -> (i32, i32) {
    %c0_i32 = arith.constant 0 : i32
    %c0_i32_0 = arith.constant 0 : i32
    %c0_i32_1 = arith.constant 0 : i32
    return %c0_i32, %c0_i32_0 : i32, i32
  }
  func.func @transform_9(%arg0: i32) -> (i32, i32) {
    %c0_i32 = arith.constant 0 : i32
    %c0_i32_0 = arith.constant 0 : i32
    %c0_i32_1 = arith.constant 0 : i32
    return %c0_i32, %c0_i32_0 : i32, i32
  }
  func.func @transform_10(%arg0: i32) -> (i32, i32) {
    %c0_i32 = arith.constant 0 : i32
    %c0_i32_0 = arith.constant 0 : i32
    %c0_i32_1 = arith.constant 0 : i32
    return %c0_i32, %c0_i32_0 : i32, i32
  }
  func.func @transform_11(%arg0: i32) -> (i32, i32) {
    %c0_i32 = arith.constant 0 : i32
    %c0_i32_0 = arith.constant 0 : i32
    %c0_i32_1 = arith.constant 0 : i32
    return %c0_i32, %c0_i32_0 : i32, i32
  }
  func.func @transform_12(%arg0: i32) -> (i32, i32, i32) {
    %c0_i32 = arith.constant 0 : i32
    %c0_i32_0 = arith.constant 0 : i32
    %c0_i32_1 = arith.constant 0 : i32
    return %arg0, %c0_i32, %c0_i32_0 : i32, i32, i32
  }
}

</mosaic_0001>

<bundles_post_ra>
// kernel: tpu_custom_call.1
= control target key start
LH: loop header
LB: loop body
LE: loop exit
PB: predicated region body
PF: predicated region fallthrough
CT: control target
= control target key end

     0   :  { %vm79_vm0 = vcmask 261120   ;;  %s3746_s0 = inlined_call_operand.vmem [shape: f32[2,8,32], index: 0, kind: input, shape index: {}]   ;;  %s3747_s1 = inlined_call_operand.vmem [shape: f32[1,32], index: 1, kind: input, shape index: {}]   ;;  %s3748_s2 = inlined_call_operand.vmem [shape: f32[1,32], index: 2, kind: input, shape index: {}]   ;;  %s3749_s3 = inlined_call_operand.vmem [shape: bf16[32,96], index: 3, kind: input, shape index: {}]   ;;  %s3750_s4 = inlined_call_operand.vmem [shape: bf16[32,32], index: 4, kind: input, shape index: {}]   ;;  %s3751_s5 = inlined_call_operand.vmem [shape: f32[1,32], index: 5, kind: input, shape index: {}]   ;;  %s3752_s6 = inlined_call_operand.vmem [shape: f32[1,32], index: 6, kind: input, shape index: {}]   ;;  %s3753_s7 = inlined_call_operand.vmem [shape: f32[1,32], index: 7, kind: input, shape index: {}]   ;;  %s3754_s8 = inlined_call_operand.vmem [shape: bf16[32,128], index: 8, kind: input, shape index: {}]   ;;  %s3755_s9 = inlined_call_operand.vmem [shape: f32[1,128], index: 9, kind: input, shape index: {}]   ;;  %s3756_s10 = inlined_call_operand.vmem [shape: bf16[128,32], index: 10, kind: input, shape index: {}]   ;;  %s3757_s11 = inlined_call_operand.vmem [shape: f32[1,32], index: 11, kind: input, shape index: {}]   ;;  %s3758_s12 = inlined_call_operand.hbm [shape: f32[2,8,32], index: 12, kind: output, shape index: {}]  }
   0x1   :  { %v3184_v0 = vld [vmem:[%s3746_s0] sm:$0xff] }
   0x2   :  { %v80_v1 = vsel %vm79_vm0, %v3184_v0, 0.0 }
   0x3   :  { %81 = vadd.xlane.f32.xlu0 %v80_v1 }
   0x4   :  { %17 = vsyncpa [#allocation5], 0  ;;  %v3193_v7 = vld [vmem:[%s3749_s3] sm:$0xff]   ;;  %v3102_v8 = vmov 0.0   ;;  %vm3103_vm1 = vmmov 0   ;;  %v3202_v9 = vld [vmem:[%s3749_s3 + $0x8] sm:$0xff]   ;;  %v179_v29 = vlaneseq }
   0x5   :  { %2822 = vmatprep.subr.bf16.mxu1 %v3102_v8  ;;  %2826 = vmatprep.mubr.msk.bf16.mxu1 %vm3103_vm1, %v3102_v8  ;;  %v3213_v14 = vld [vmem:[%s3747_s1] ss:$0 sm:$0xff]  ;;  %s3104_s30 = smov 104   ;;  %s3105_s1 = smov 120   ;;  %v3109_v27 = vmov 1983009808  }
   0x6   :  { %2823 = vmatpush3.bf16.msra.mxu1 %v3193_v7  ;;  %2848 = vmatprep.subr.bf16.mxu0 %v3102_v8  ;;  %v3218_v16 = vld [vmem:[%s3748_s2] ss:$0 sm:$0xff]  ;;  %s3106_s2 = smov 112   ;;  %s3107_s13 = smov 96   ;;  %v177_v28 = vunpack.c.l.s4 %v3109_v27  ;;  %v180_v31 = vshrl.u32 %v179_v29, 7  ;;  %vm618_vm2 = vcmask 64512  }
   0x7   :  { %2824 = vmatprep.subr.bf16.mxu1 %v3102_v8  ;;  %2850 = vmatprep.mubr.msk.bf16.mxu0 %vm3103_vm1, %v3102_v8  ;;  %s3108_s14 = smov 64   ;;  %v3110_v33 = vmov 1934713408   ;;  %vm846_vm3 = vcmask 1043456   ;;  %s3112_s19 = smov 8   ;;  %vm1185_vm4 = vcmask 130048  }
   0x8   :  { %v178_v30 = vunpack.c.0.s8 %v177_v28  ;;  %v209_v34 = vunpack.c.l.s4 %v3110_v33  ;;  %s3113_s20 = smov 24   ;;  %vm1187_vm5 = vcmask 195584  }
   0xa   :  { %2825 = vmatpush3.bf16.msra.mxu1 %v3202_v9  ;;  %v3244_v37 = vsub.s32 %v178_v30, %v180_v31  ;;  %v210_v41 = vunpack.c.0.s8 %v209_v34 }
   0xb   :  { %2830 = vmatprep.subr.bf16.mxu1 %v3102_v8 }
   0xc   :  { %v3254_v47 = vsub.s32 %v210_v41, %v180_v31 }
  0x90   :  { %v82_v2 = vpop.xlane.xlu0 %81 }
  0x91   :  { %v84_v3 = vmul.f32 0.03125, %v82_v2 }
  0x93   :  { %v85_v4 = vsub.f32 %v3184_v0, %v84_v3 }
  0x95   :  { %v86_v5 = vmul.f32 %v85_v4, %v85_v4 }
  0x97   :  { %v87_v6 = vsel %vm79_vm0, %v86_v5, 0.0 }
  0x98   :  { %88 = vadd.xlane.f32.xlu0 %v87_v6 }
 0x125   :  { %v89_v10 = vpop.xlane.xlu0 %88 }
 0x126   :  { %v90_v11 = vmul.f32 0.03125, %v89_v10 }
 0x128   :  { %v91_v12 = vadd.f32 1e-05, %v90_v11 }
 0x12a   :  { %3034 = vrsqrt.f32 %v91_v12 }
 0x134   :  { %v3035_v13 = vpop.eup %3034 }
 0x135   :  { %v93_v15 = vmul.f32 %v3035_v13, %v85_v4 }
 0x137   :  { %v100_v17 = vmul.f32 %v3213_v14, %v93_v15 }
 0x139   :  { %v107_v18 = vadd.f32 %v3218_v16, %v100_v17 }
 0x13b   :  { %v108_v19 = vpack.c.bf16 %v107_v18, %v107_v18 }
 0x13d   :  { %2827 = vmatmul.mubr.msk.bf16.vlgmr.msra.gmra.mrb[0].mxu1 %vm79_vm0, %v108_v19 }
 0x13e   :  { %2832 = vmatprep.mubr.msk.bf16.mxu1 %vm3103_vm1, %v3102_v8 }
 0x210   :  { %v158_v20 = vpop.f32.mrb[0].mxu1 }
 0x211   :  { %171 = vrot.lane.b32.xlu0 %v158_v20, %s3104_s30  ;;  %165 = vrot.lane.b32.xlu1 %v158_v20, %s3105_s1  ;;  %v2828_v21 = vpop.f32.mrb[1].mxu1 }
 0x212   :  { %v161_v22 = vpop.f32.mrb[2].mxu1 }
 0x213   :  { %v2829_v23 = vpop.f32.mrb[3].mxu1 }
 0x215   :  { %168 = vrot.lane.b32.xlu1 %v158_v20, %s3106_s2 }
 0x219   :  { %314 = vrot.lane.b32.xlu1 %v158_v20, %s3107_s13 }
 0x283   :  { %v3229_v24 = vpop.permute.xlu1 %165  ;;  %v3237_v26 = vpop.permute.xlu0 %171 }
 0x284   :  { %316 = vrot.lane.b32.xlu1 %v3229_v24, %s3107_s13  ;;  %v190_v38 = vcombine.low %v3229_v24, %v3237_v26  ;;  %v191_v39 = vcombine.high %v3229_v24, %v3237_v26 }
 0x286   :  { %v198_v44 = vrot.slane %v190_v38, %v3244_v37  ;;  %v205_v45 = vrot.slane %v191_v39, %v3244_v37 }
 0x287   :  { %v3233_v25 = vpop.permute.xlu1 %168 }
 0x288   :  { %318 = vrot.lane.b32.xlu1 %v3233_v25, %s3107_s13  ;;  %v174_v35 = vcombine.low %v158_v20, %v3233_v25  ;;  %v175_v36 = vcombine.high %v158_v20, %v3233_v25 }
 0x28a   :  { %v182_v42 = vrot.slane %v174_v35, %v3244_v37  ;;  %v189_v43 = vrot.slane %v175_v36, %v3244_v37 }
 0x28b   :  { %v315_v32 = vpop.permute.xlu1 %314 }
 0x28c   :  { %320 = vrot.lane.b32.xlu1 %v3237_v26, %s3107_s13  ;;  %v206_v48 = vcombine.low %v182_v42, %v198_v44  ;;  %v207_v49 = vcombine.high %v182_v42, %v198_v44  ;;  %v222_v50 = vcombine.low %v189_v43, %v205_v45  ;;  %v223_v51 = vcombine.high %v189_v43, %v205_v45 }
 0x28e   :  { %v214_v57 = vrot.slane %v206_v48, %v3254_v47  ;;  %v221_v58 = vrot.slane %v207_v49, %v3254_v47  ;;  %v230_v59 = vrot.slane %v222_v50, %v3254_v47  ;;  %v237_v60 = vrot.slane %v223_v51, %v3254_v47 }
 0x290   :  { %466 = vrot.lane.b32.xlu1 %v158_v20, %s3108_s14  ;;  %v242_v6 = vcombine.low %v214_v57, %v221_v58  ;;  %v2699_v10 = vcombine.high %v214_v57, %v221_v58  ;;  %v258_v11 = vcombine.low %v230_v59, %v237_v60  ;;  %v2700_v12 = vcombine.high %v230_v59, %v237_v60 }
 0x292   :  { %v249_v23 = vrot.slane %v242_v6, %v3244_v37  ;;  %v257_v27 = vrot.slane %v2699_v10, %v3244_v37  ;;  %v265_v28 = vrot.slane %v258_v11, %v3244_v37  ;;  %v273_v29 = vrot.slane %v2700_v12, %v3244_v37 }
 0x294   :  { %v274_v39 = vcombine.low %v249_v23, %v257_v27  ;;  %v275_v41 = vcombine.high %v249_v23, %v257_v27  ;;  %v291_v42 = vcombine.high %v265_v28, %v273_v29 }
 0x296   :  { %v282_v50 = vrot.slane %v274_v39, %v3254_v47 }
 0x2f6   :  { %v317_v40 = vpop.permute.xlu1 %316 }
 0x2fa   :  { %v319_v46 = vpop.permute.xlu1 %318 }
 0x2fb   :  { %v326_v52 = vcombine.low %v315_v32, %v319_v46  ;;  %v327_v53 = vcombine.high %v315_v32, %v319_v46 }
 0x2fd   :  { %v334_v61 = vrot.slane %v326_v52, %v3244_v37  ;;  %v341_v62 = vrot.slane %v327_v53, %v3244_v37 }
 0x2fe   :  { %v321_v54 = vpop.permute.xlu1 %320 }
 0x2ff   :  { %v342_v55 = vcombine.low %v317_v40, %v321_v54  ;;  %v343_v56 = vcombine.high %v317_v40, %v321_v54  ;;  %v290_v40 = vcombine.low %v265_v28, %v273_v29  ;;  %v289_v54 = vrot.slane %v275_v41, %v3254_v47 }
 0x301   :  { %v350_v63 = vrot.slane %v342_v55, %v3244_v37  ;;  %v357_v1 = vrot.slane %v343_v56, %v3244_v37  ;;  %v298_v51 = vrot.slane %v290_v40, %v3254_v47  ;;  %v305_v55 = vrot.slane %v291_v42, %v3254_v47 }
 0x303   :  { %v358_v2 = vcombine.low %v334_v61, %v350_v63  ;;  %v359_v3 = vcombine.high %v334_v61, %v350_v63  ;;  %v374_v4 = vcombine.low %v341_v62, %v357_v1  ;;  %v375_v5 = vcombine.high %v341_v62, %v357_v1 }
 0x304   :  { %v306_v59 = vcombine.low %v282_v50, %v298_v51  ;;  %v309_v60 = vcombine.high %v289_v54, %v305_v55  ;;  %v308_v10 = vcombine.low %v289_v54, %v305_v55 }
 0x305   :  { %v366_v13 = vrot.slane %v358_v2, %v3254_v47  ;;  %v373_v15 = vrot.slane %v359_v3, %v3254_v47  ;;  %v382_v17 = vrot.slane %v374_v4, %v3254_v47  ;;  %v389_v18 = vrot.slane %v375_v5, %v3254_v47 }
 0x306   :  { %v310_v62 = vpack.c.bf16 %v306_v59, %v306_v59  ;;  %v313_v63 = vpack.c.bf16 %v309_v60, %v309_v60  ;;  %v307_v3 = vcombine.high %v282_v50, %v298_v51  ;;  %v312_v11 = vpack.c.bf16 %v308_v10, %v308_v10 }
 0x307   :  { %v394_v19 = vcombine.low %v366_v13, %v373_v15  ;;  %v2701_v20 = vcombine.high %v366_v13, %v373_v15  ;;  %v410_v21 = vcombine.low %v382_v17, %v389_v18  ;;  %v2702_v22 = vcombine.high %v382_v17, %v389_v18 }
 0x308   :  { %v311_v5 = vpack.c.bf16 %v307_v3, %v307_v3 }
 0x309   :  { %v401_v30 = vrot.slane %v394_v19, %v3244_v37  ;;  %v409_v31 = vrot.slane %v2701_v20, %v3244_v37  ;;  %v417_v32 = vrot.slane %v410_v21, %v3244_v37  ;;  %v425_v33 = vrot.slane %v2702_v22, %v3244_v37 }
 0x30b   :  { %v426_v34 = vcombine.low %v401_v30, %v409_v31  ;;  %v442_v35 = vcombine.low %v417_v32, %v425_v33  ;;  %v427_v36 = vcombine.high %v401_v30, %v409_v31  ;;  %v443_v38 = vcombine.high %v417_v32, %v425_v33 }
 0x30d   :  { %v434_v43 = vrot.slane %v426_v34, %v3254_v47  ;;  %v450_v44 = vrot.slane %v442_v35, %v3254_v47  ;;  %v441_v45 = vrot.slane %v427_v36, %v3254_v47  ;;  %v457_v46 = vrot.slane %v443_v38, %v3254_v47  ;;  %v467_v38 = vpop.permute.xlu1 %466 }
 0x30f   :  { %v458_v48 = vcombine.low %v434_v43, %v450_v44  ;;  %v461_v49 = vcombine.high %v441_v45, %v457_v46  ;;  %v459_v58 = vcombine.high %v434_v43, %v450_v44  ;;  %v460_v2 = vcombine.low %v441_v45, %v457_v46 }
 0x311   :  { %v462_v52 = vpack.c.bf16 %v458_v48, %v458_v48  ;;  %v465_v53 = vpack.c.bf16 %v461_v49, %v461_v49  ;;  %v463_v61 = vpack.c.bf16 %v459_v58, %v459_v58  ;;  %v464_v4 = vpack.c.bf16 %v460_v2, %v460_v2 }
 0x313   :  { %v623_v56 = vsel %vm618_vm2, %v462_v52, 0  ;;  %v761_v57 = vsel %vm618_vm2, %v465_v53, 0  ;;  %v669_v1 = vsel %vm618_vm2, %v463_v61, 0  ;;  %v715_v6 = vsel %vm618_vm2, %v464_v4, 0 }
 0x314   :  { %2831 = vmatpush3.bf16.xpose.msra.mxu1 %v623_v56  ;;  %2849 = vmatpush3.bf16.xpose.msra.mxu0 %v761_v57 }
 0x315   :  { %2836 = vmatprep.subr.bf16.mxu1 %v3102_v8  ;;  %2860 = vmatprep.subr.bf16.mxu0 %v3102_v8 }
 0x31b   :  { %2833 = vmatmul.mubr.msk.bf16.vlgmr.msra.gmra.mrb[4].mxu1 %vm618_vm2, %v310_v62  ;;  %2851 = vmatmul.mubr.msk.bf16.vlgmr.msra.gmra.mrb[0].mxu0 %vm618_vm2, %v313_v63 }
 0x31c   :  { %2837 = vmatpush3.bf16.xpose.msra.mxu1 %v669_v1  ;;  %2838 = vmatprep.mubr.msk.bf16.mxu1 %vm3103_vm1, %v3102_v8 }
 0x31d   :  { %2842 = vmatprep.subr.bf16.mxu1 %v3102_v8  ;;  %2862 = vmatprep.mubr.msk.bf16.mxu0 %vm3103_vm1, %v3102_v8 }
 0x323   :  { %2839 = vmatmul.mubr.msk.bf16.vlgmr.msra.gmra.mrb[8].mxu1 %vm618_vm2, %v311_v5 }
 0x324   :  { %2843 = vmatpush3.bf16.xpose.msra.mxu1 %v715_v6  ;;  %2844 = vmatprep.mubr.msk.bf16.mxu1 %vm3103_vm1, %v3102_v8 }
 0x325   :  { %2854 = vmatprep.subr.bf16.mxu1 %v3102_v8 }
 0x32b   :  { %2845 = vmatmul.mubr.msk.bf16.vlgmr.msra.gmra.mrb[12].mxu1 %vm618_vm2, %v312_v11 }
 0x32c   :  { %2856 = vmatprep.mubr.msk.bf16.mxu1 %vm3103_vm1, %v3102_v8 }
 0x3ee   :  { %v659_v12 = vpop.f32.mrb[4].mxu1  ;;  %v3304_v13 = vpop.f32.mrb[0].mxu0 }
 0x3ef   :  { %v2834_v15 = vpop.f32.mrb[5].mxu1  ;;  %v2852_v17 = vpop.f32.mrb[1].mxu0  ;;  %v803_v18 = vsel %vm618_vm2, %v659_v12, -inf  ;;  %v812_v35 = vsel %vm618_vm2, %v3304_v13, -inf }
 0x3f0   :  { %v800_v19 = vpop.f32.mrb[2].mxu0  ;;  %804 = vmax.xlane.f32.xlu1 %v803_v18  ;;  %v662_v20 = vpop.f32.mrb[6].mxu1 }
 0x3f1   :  { %v2835_v21 = vpop.f32.mrb[7].mxu1  ;;  %v2853_v22 = vpop.f32.mrb[3].mxu0 }
 0x3f6   :  { %v705_v23 = vpop.f32.mrb[8].mxu1 }
 0x3f7   :  { %v2840_v27 = vpop.f32.mrb[9].mxu1  ;;  %v806_v28 = vsel %vm618_vm2, %v705_v23, -inf }
 0x3f8   :  { %807 = vmax.xlane.f32.xlu0 %v806_v28  ;;  %v708_v29 = vpop.f32.mrb[10].mxu1 }
 0x3f9   :  { %v2841_v30 = vpop.f32.mrb[11].mxu1 }
 0x3fe   :  { %v3308_v31 = vpop.f32.mrb[12].mxu1 }
 0x3ff   :  { %v2846_v32 = vpop.f32.mrb[13].mxu1  ;;  %v809_v36 = vsel %vm618_vm2, %v3308_v31, -inf }
 0x400   :  { %v754_v33 = vpop.f32.mrb[14].mxu1 }
 0x401   :  { %470 = vrot.lane.b32.xlu1 %v3233_v25, %s3108_s14  ;;  %v2847_v34 = vpop.f32.mrb[15].mxu1 }
 0x405   :  { %472 = vrot.lane.b32.xlu1 %v3237_v26, %s3108_s14 }
 0x40e   :  { %468 = vrot.lane.b32.xlu0 %v3229_v24, %s3108_s14 }
 0x429   :  { %813 = vmax.xlane.f32.xlu1 %v812_v35 }
 0x42d   :  { %810 = vmax.xlane.f32.xlu0 %v809_v36 }
 0x47d   :  { %v805_v39 = vpop.xlane.xlu1 %804 }
 0x47e   :  { %v815_v40 = vsub.f32 %v659_v12, %v805_v39 }
 0x480   :  { %v819_v41 = vmul.f32 1.442695, %v815_v40 }
 0x481   :  { %v471_v25 = vpop.permute.xlu1 %470 }
 0x482   :  { %3036 = vpow2.f32 %v819_v41  ;;  %v478_v26 = vcombine.low %v467_v38, %v471_v25  ;;  %v479_v44 = vcombine.high %v467_v38, %v471_v25 }
 0x484   :  { %v486_v51 = vrot.slane %v478_v26, %v3244_v37  ;;  %v493_v52 = vrot.slane %v479_v44, %v3244_v37 }
 0x485   :  { %v808_v42 = vpop.xlane.xlu0 %807  ;;  %v473_v24 = vpop.permute.xlu1 %472 }
 0x486   :  { %v816_v43 = vsub.f32 %v705_v23, %v808_v42 }
 0x488   :  { %v821_v45 = vmul.f32 1.442695, %v816_v43 }
 0x489   :  { %v469_v46 = vpop.permute.xlu0 %468 }
 0x48a   :  { %3038 = vpow2.f32 %v821_v45  ;;  %v494_v48 = vcombine.low %v469_v46, %v473_v24  ;;  %v495_v49 = vcombine.high %v469_v46, %v473_v24 }
 0x48c   :  { %v3037_v50 = vpop.eup %3036  ;;  %v502_v53 = vrot.slane %v494_v48, %v3244_v37  ;;  %v509_v54 = vrot.slane %v495_v49, %v3244_v37 }
 0x48d   :  { %v827_v55 = vsel %vm618_vm2, %v3037_v50, 0.0  ;;  %v839_v40 = vpack.c.bf16 %v3037_v50, %v3037_v50 }
 0x48e   :  { %v510_v56 = vcombine.low %v486_v51, %v502_v53  ;;  %v511_v57 = vcombine.high %v486_v51, %v502_v53  ;;  %v526_v58 = vcombine.low %v493_v52, %v509_v54  ;;  %v527_v59 = vcombine.high %v493_v52, %v509_v54  ;;  %828 = vadd.xlane.f32.xlu0 %v827_v55 }
 0x490   :  { %v518_v60 = vrot.slane %v510_v56, %v3254_v47  ;;  %v525_v61 = vrot.slane %v511_v57, %v3254_v47  ;;  %v534_v62 = vrot.slane %v526_v58, %v3254_v47  ;;  %v541_v63 = vrot.slane %v527_v59, %v3254_v47 }
 0x492   :  { %v546_v1 = vcombine.low %v518_v60, %v525_v61  ;;  %v2703_v2 = vcombine.high %v518_v60, %v525_v61  ;;  %v562_v3 = vcombine.low %v534_v62, %v541_v63  ;;  %v2704_v4 = vcombine.high %v534_v62, %v541_v63 }
 0x494   :  { %v3039_v5 = vpop.eup %3038  ;;  %v553_v6 = vrot.slane %v546_v1, %v3244_v37  ;;  %v561_v10 = vrot.slane %v2703_v2, %v3244_v37  ;;  %v569_v11 = vrot.slane %v562_v3, %v3244_v37  ;;  %v577_v12 = vrot.slane %v2704_v4, %v3244_v37 }
 0x495   :  { %v830_v15 = vsel %vm618_vm2, %v3039_v5, 0.0  ;;  %v840_v41 = vpack.c.bf16 %v3039_v5, %v3039_v5 }
 0x496   :  { %831 = vadd.xlane.f32.xlu0 %v830_v15  ;;  %v578_v17 = vcombine.low %v553_v6, %v561_v10  ;;  %v594_v18 = vcombine.low %v569_v11, %v577_v12  ;;  %v579_v19 = vcombine.high %v553_v6, %v561_v10  ;;  %v595_v20 = vcombine.high %v569_v11, %v577_v12 }
 0x498   :  { %v586_v21 = vrot.slane %v578_v17, %v3254_v47  ;;  %v602_v22 = vrot.slane %v594_v18, %v3254_v47  ;;  %v593_v23 = vrot.slane %v579_v19, %v3254_v47  ;;  %v609_v27 = vrot.slane %v595_v20, %v3254_v47 }
 0x49a   :  { %v610_v28 = vcombine.low %v586_v21, %v602_v22  ;;  %v611_v29 = vcombine.high %v586_v21, %v602_v22  ;;  %v612_v30 = vcombine.low %v593_v23, %v609_v27  ;;  %v613_v32 = vcombine.high %v593_v23, %v609_v27 }
 0x49c   :  { %v614_v33 = vpack.c.bf16 %v610_v28, %v610_v28  ;;  %v615_v34 = vpack.c.bf16 %v611_v29, %v611_v29  ;;  %v616_v38 = vpack.c.bf16 %v612_v30, %v612_v30  ;;  %v617_v39 = vpack.c.bf16 %v613_v32, %v613_v32 }
 0x49e   :  { %v848_v35 = vsel %vm846_vm3, %v614_v33, 0  ;;  %v894_v36 = vsel %vm846_vm3, %v615_v34, 0  ;;  %v940_v25 = vsel %vm846_vm3, %v616_v38, 0  ;;  %v986_v42 = vsel %vm846_vm3, %v617_v39, 0 }
 0x49f   :  { %2855 = vmatpush3.bf16.msra.mxu1 %v848_v35  ;;  %2861 = vmatpush3.bf16.msra.mxu0 %v894_v36  ;;  %v3369_v35 = vld [vmem:[%s3750_s4] sm:$0xff]  }
 0x4a0   :  { %2866 = vmatprep.subr.bf16.mxu1 %v3102_v8  ;;  %2872 = vmatprep.subr.bf16.mxu0 %v3102_v8 }
 0x4a2   :  { %2857 = vmatmul.mubr.msk.bf16.vlgmr.msra.gmra.mrb[16].mxu1 %vm618_vm2, %v839_v40  ;;  %2863 = vmatmul.mubr.msk.bf16.vlgmr.msra.gmra.mrb[4].mxu0 %vm618_vm2, %v840_v41 }
 0x4a3   :  { %2867 = vmatpush3.bf16.msra.mxu1 %v940_v25  ;;  %2873 = vmatpush3.bf16.msra.mxu0 %v986_v42 }
 0x4a4   :  { %2874 = vmatprep.mubr.msk.bf16.mxu0 %vm3103_vm1, %v3102_v8  ;;  %2868 = vmatprep.mubr.msk.bf16.mxu1 %vm3103_vm1, %v3102_v8 }
 0x4a5   :  { %2878 = vmatprep.subr.bf16.mxu1 %v3102_v8  ;;  %2886 = vmatprep.subr.bf16.mxu0 %v3102_v8 }
 0x4b6   :  { %v814_v43 = vpop.xlane.xlu1 %813 }
 0x4b7   :  { %v818_v26 = vsub.f32 %v3304_v13, %v814_v43 }
 0x4b9   :  { %v825_v44 = vmul.f32 1.442695, %v818_v26  ;;  %v3380_v26 = vld [vmem:[%s3750_s4 + $0x8] sm:$0xff]   ;;  %s3111_s4 = smov 16  }
 0x4ba   :  { %v811_v45 = vpop.xlane.xlu0 %810 }
 0x4bb   :  { %3040 = vpow2.f32 %v825_v44  ;;  %v817_v24 = vsub.f32 %v3308_v31, %v811_v45 }
 0x4bd   :  { %v823_v46 = vmul.f32 1.442695, %v817_v24 }
 0x4bf   :  { %3042 = vpow2.f32 %v823_v46 }
 0x4c5   :  { %v3041_v48 = vpop.eup %3040 }
 0x4c6   :  { %v836_v49 = vsel %vm618_vm2, %v3041_v48, 0.0  ;;  %v842_v50 = vpack.c.bf16 %v3041_v48, %v3041_v48 }
 0x4c7   :  { %837 = vadd.xlane.f32.xlu0 %v836_v49 }
 0x4c8   :  { %2875 = vmatmul.mubr.msk.bf16.vlgmr.msra.gmra.mrb[8].mxu0 %vm618_vm2, %v842_v50 }
 0x4c9   :  { %v3043_v51 = vpop.eup %3042  ;;  %2890 = vmatprep.mubr.msk.bf16.mxu0 %vm3103_vm1, %v3102_v8 }
 0x4ca   :  { %v833_v13 = vsel %vm618_vm2, %v3043_v51, 0.0  ;;  %v841_v52 = vpack.c.bf16 %v3043_v51, %v3043_v51 }
 0x4cb   :  { %834 = vadd.xlane.f32.xlu1 %v833_v13 }
 0x4cc   :  { %2869 = vmatmul.mubr.msk.bf16.vlgmr.msra.gmra.mrb[20].mxu1 %vm618_vm2, %v841_v52 }
 0x4cd   :  { %2882 = vmatprep.mubr.msk.bf16.mxu1 %vm3103_vm1, %v3102_v8  ;;  %2879 = vmatpush3.bf16.msra.mxu1 %v3369_v35 }
 0x4ce   :  { %2880 = vmatprep.subr.bf16.mxu1 %v3102_v8 }
 0x4d1   :  { %2881 = vmatpush3.bf16.msra.mxu1 %v3380_v26 }
 0x4d2   :  { %2894 = vmatprep.subr.bf16.mxu1 %v3102_v8 }
 0x51b   :  { %v829_v60 = vpop.xlane.xlu0 %828 }
 0x523   :  { %v832_v61 = vpop.xlane.xlu0 %831 }
 0x524   :  { %3044 = vrcp.f32 %v832_v61 }
 0x52e   :  { %v3045_v1 = vpop.eup %3044 }
 0x554   :  { %v838_v62 = vpop.xlane.xlu0 %837 }
 0x555   :  { %3046 = vrcp.f32 %v838_v62  ;;  %v3398_v62 = vld [vmem:[%s3746_s0 + $0x8] sm:$0xff] }
 0x556   :  { %3048 = vrcp.f32 %v829_v60 }
 0x558   :  { %v835_v63 = vpop.xlane.xlu1 %834 }
 0x559   :  { %3050 = vrcp.f32 %v835_v63  ;;  %v1445_v63 = vsel %vm79_vm0, %v3398_v62, 0.0 }
 0x55f   :  { %v3047_v2 = vpop.eup %3046 }
 0x560   :  { %v3049_v11 = vpop.eup %3048 }
 0x563   :  { %v3051_v18 = vpop.eup %3050 }
 0x575   :  { %v884_v31 = vpop.f32.mrb[16].mxu1  ;;  %v930_v53 = vpop.f32.mrb[4].mxu0 }
 0x576   :  { %v2858_v54 = vpop.f32.mrb[17].mxu1  ;;  %v2864_v55 = vpop.f32.mrb[5].mxu0  ;;  %v1033_v4 = vmul.f32 %v3045_v1, %v930_v53  ;;  %v1032_v20 = vmul.f32 %v3049_v11, %v884_v31 }
 0x577   :  { %v887_v56 = vpop.f32.mrb[18].mxu1  ;;  %v933_v57 = vpop.f32.mrb[6].mxu0 }
 0x578   :  { %v2859_v58 = vpop.f32.mrb[19].mxu1  ;;  %v2865_v59 = vpop.f32.mrb[7].mxu0 }
 0x59b   :  { %v1022_v3 = vpop.f32.mrb[8].mxu0 }
 0x59c   :  { %v1035_v5 = vmul.f32 %v3047_v2, %v1022_v3  ;;  %v2876_v6 = vpop.f32.mrb[9].mxu0 }
 0x59d   :  { %v1025_v10 = vpop.f32.mrb[10].mxu0 }
 0x59e   :  { %v1052_v12 = vcombine.low %v1033_v4, %v1035_v5  ;;  %v1053_v15 = vcombine.high %v1033_v4, %v1035_v5  ;;  %v2877_v17 = vpop.f32.mrb[11].mxu0 }
 0x59f   :  { %v976_v19 = vpop.f32.mrb[20].mxu1 }
 0x5a0   :  { %v1034_v21 = vmul.f32 %v3051_v18, %v976_v19  ;;  %v2870_v22 = vpop.f32.mrb[21].mxu1  ;;  %v1060_v30 = vrot.slane %v1052_v12, %v3244_v37  ;;  %v1067_v32 = vrot.slane %v1053_v15, %v3244_v37  ;;  %v3411_v15 = vld [vmem:[%s3751_s5] ss:$0 sm:$0xff] }
 0x5a1   :  { %v979_v23 = vpop.f32.mrb[22].mxu1 }
 0x5a2   :  { %v1036_v27 = vcombine.low %v1032_v20, %v1034_v21  ;;  %v1037_v28 = vcombine.high %v1032_v20, %v1034_v21  ;;  %v2871_v29 = vpop.f32.mrb[23].mxu1 }
 0x5a4   :  { %v1044_v33 = vrot.slane %v1036_v27, %v3244_v37  ;;  %v1051_v34 = vrot.slane %v1037_v28, %v3244_v37 }
 0x5a6   :  { %v1068_v36 = vcombine.low %v1044_v33, %v1060_v30  ;;  %v1069_v38 = vcombine.high %v1044_v33, %v1060_v30  ;;  %v1084_v39 = vcombine.low %v1051_v34, %v1067_v32  ;;  %v1085_v40 = vcombine.high %v1051_v34, %v1067_v32 }
 0x5a8   :  { %v1076_v41 = vrot.slane %v1068_v36, %v3254_v47  ;;  %v1083_v25 = vrot.slane %v1069_v38, %v3254_v47  ;;  %v1092_v42 = vrot.slane %v1084_v39, %v3254_v47  ;;  %v1099_v43 = vrot.slane %v1085_v40, %v3254_v47  ;;  %v3432_v38 = vld [vmem:[%s3754_s8 + $0x8] sm:$0xff]   ;;  %v3440_v39 = vld [vmem:[%s3756_s10] sm:$0xff]  }
 0x5a9   :  { %v3446_v40 = vld [vmem:[%s3756_s10 + $0x8] sm:$0xff]  }
 0x5aa   :  { %v1104_v44 = vcombine.low %v1076_v41, %v1083_v25  ;;  %v2713_v45 = vcombine.high %v1076_v41, %v1083_v25  ;;  %v1120_v24 = vcombine.low %v1092_v42, %v1099_v43  ;;  %v2714_v46 = vcombine.high %v1092_v42, %v1099_v43  ;;  %v3453_v41 = vld [vmem:[%s3756_s10 + $0x10] sm:$0xff]  }
 0x5ac   :  { %v1111_v48 = vrot.slane %v1104_v44, %v3244_v37  ;;  %v1119_v49 = vrot.slane %v2713_v45, %v3244_v37  ;;  %v1127_v50 = vrot.slane %v1120_v24, %v3244_v37  ;;  %v1135_v51 = vrot.slane %v2714_v46, %v3244_v37 }
 0x5ae   :  { %v1137_v13 = vcombine.high %v1111_v48, %v1119_v49  ;;  %v1153_v52 = vcombine.high %v1127_v50, %v1135_v51  ;;  %v1136_v31 = vcombine.low %v1111_v48, %v1119_v49  ;;  %v1152_v53 = vcombine.low %v1127_v50, %v1135_v51  ;;  %v3461_v49 = vld [vmem:[%s3752_s6] ss:$0 sm:$0xff] }
 0x5af   :  { %v3466_v51 = vld [vmem:[%s3753_s7] ss:$0 sm:$0xff] }
 0x5b0   :  { %v1151_v54 = vrot.slane %v1137_v13, %v3254_v47  ;;  %v1167_v55 = vrot.slane %v1153_v52, %v3254_v47  ;;  %v1144_v56 = vrot.slane %v1136_v31, %v3254_v47  ;;  %v1160_v57 = vrot.slane %v1152_v53, %v3254_v47 }
 0x5b2   :  { %v1170_v58 = vcombine.low %v1151_v54, %v1167_v55  ;;  %v1169_v59 = vcombine.high %v1144_v56, %v1160_v57  ;;  %v1171_v60 = vcombine.high %v1151_v54, %v1167_v55  ;;  %v1168_v61 = vcombine.low %v1144_v56, %v1160_v57  ;;  %v3513_v57 = vld [vmem:[%s3756_s10 + $0x38] sm:$0xff]  }
 0x5b4   :  { %1177 = vrot.lane.b32.xlu0 %v1170_v58, %s3111_s4  ;;  %1173 = vrot.lane.b32.xlu1 %v1169_v59, %s3112_s19  ;;  %v3520_v58 = vld [vmem:[%s3755_s9] ss:$0 sm:$0xff] }
 0x5b8   :  { %1181 = vrot.lane.b32.xlu1 %v1171_v60, %s3113_s20 }
 0x5d3   :  { %1446 = vadd.xlane.f32.xlu0 %v1445_v63 }
 0x626   :  { %v1174_v1 = vpop.permute.xlu1 %1173  ;;  %v1178_v2 = vpop.permute.xlu0 %1177 }
 0x627   :  { %v1184_v3 = vsel %vm618_vm2, %v1168_v61, %v1174_v1 }
 0x628   :  { %v1186_v5 = vsel %vm1185_vm4, %v1184_v3, %v1178_v2 }
 0x62a   :  { %v1182_v4 = vpop.permute.xlu1 %1181 }
 0x62b   :  { %v1188_v6 = vsel %vm1187_vm5, %v1186_v5, %v1182_v4 }
 0x62c   :  { %v1189_v10 = vpack.c.bf16 %v1188_v6, %v1188_v6 }
 0x62e   :  { %2883 = vmatmul.mubr.msk.bf16.vlgmr.msra.gmra.mrb[24].mxu1 %vm79_vm0, %v1189_v10 }
 0x62f   :  { %2910 = vmatprep.mubr.msk.bf16.mxu1 %vm3103_vm1, %v3102_v8  ;;  %2895 = vmatpush3.bf16.msra.mxu1 %v3440_v39 }
 0x630   :  { %2896 = vmatprep.subr.bf16.mxu1 %v3102_v8 }
 0x633   :  { %2897 = vmatpush3.bf16.msra.mxu1 %v3446_v40 }
 0x634   :  { %2898 = vmatprep.subr.bf16.mxu1 %v3102_v8 }
 0x637   :  { %2899 = vmatpush3.bf16.msra.mxu1 %v3453_v41 }
 0x638   :  { %2900 = vmatprep.subr.bf16.mxu1 %v3102_v8 }
 0x660   :  { %v1447_v11 = vpop.xlane.xlu0 %1446 }
 0x661   :  { %v1448_v12 = vmul.f32 0.03125, %v1447_v11 }
 0x663   :  { %v1449_v17 = vsub.f32 %v3398_v62, %v1448_v12 }
 0x665   :  { %v1450_v27 = vmul.f32 %v1449_v17, %v1449_v17 }
 0x667   :  { %v1451_v29 = vsel %vm79_vm0, %v1450_v27, 0.0 }
 0x701   :  { %v1245_v18 = vpop.f32.mrb[24].mxu1 }
 0x702   :  { %v1246_v19 = vadd.f32 %v3411_v15, %v1245_v18  ;;  %v2884_v20 = vpop.f32.mrb[25].mxu1 }
 0x703   :  { %v1248_v21 = vpop.f32.mrb[26].mxu1 }
 0x704   :  { %v3416_v22 = vadd.f32 %v1246_v19, %v3184_v0  ;;  %v2885_v23 = vpop.f32.mrb[27].mxu1  ;;  %v3426_v0 = vld [vmem:[%s3754_s8] sm:$0xff]  }
 0x705   :  { %2887 = vmatpush3.bf16.msra.mxu0 %v3426_v0 }
 0x706   :  { %v1252_v28 = vsel %vm79_vm0, %v3416_v22, 0.0  ;;  %2888 = vmatprep.subr.bf16.mxu0 %v3102_v8 }
 0x707   :  { %1253 = vadd.xlane.f32.xlu1 %v1252_v28 }
 0x709   :  { %2889 = vmatpush3.bf16.msra.mxu0 %v3432_v38 }
 0x70a   :  { %2914 = vmatprep.subr.bf16.mxu0 %v3102_v8 }
 0x70b   :  { %1452 = vadd.xlane.f32.xlu1 %v1451_v29 }
 0x794   :  { %v1254_v30 = vpop.xlane.xlu1 %1253 }
 0x795   :  { %v1255_v32 = vmul.f32 0.03125, %v1254_v30 }
 0x797   :  { %v1256_v33 = vsub.f32 %v3416_v22, %v1255_v32 }
 0x798   :  { %v1453_v25 = vpop.xlane.xlu1 %1452 }
 0x799   :  { %v1257_v34 = vmul.f32 %v1256_v33, %v1256_v33  ;;  %v1454_v42 = vmul.f32 0.03125, %v1453_v25 }
 0x79b   :  { %v1258_v36 = vsel %vm79_vm0, %v1257_v34, 0.0  ;;  %v1455_v43 = vadd.f32 1e-05, %v1454_v42 }
 0x79c   :  { %1259 = vadd.xlane.f32.xlu0 %v1258_v36 }
 0x79d   :  { %3052 = vrsqrt.f32 %v1455_v43 }
 0x7a7   :  { %v3053_v46 = vpop.eup %3052 }
 0x7a8   :  { %v1457_v13 = vmul.f32 %v3053_v46, %v1449_v17 }
 0x7aa   :  { %v1458_v54 = vmul.f32 %v3213_v14, %v1457_v13  ;;  %v3499_v14 = vld [vmem:[%s3756_s10 + $0x28] sm:$0xff]  }
 0x7ac   :  { %v1459_v55 = vadd.f32 %v3218_v16, %v1458_v54  ;;  %v3506_v16 = vld [vmem:[%s3756_s10 + $0x30] sm:$0xff]  }
 0x7ae   :  { %v1460_v56 = vpack.c.bf16 %v1459_v55, %v1459_v55 }
 0x829   :  { %v1260_v44 = vpop.xlane.xlu0 %1259 }
 0x82a   :  { %v1261_v45 = vmul.f32 0.03125, %v1260_v44 }
 0x82c   :  { %v1262_v24 = vadd.f32 1e-05, %v1261_v45 }
 0x82e   :  { %3054 = vrsqrt.f32 %v1262_v24 }
 0x838   :  { %v3055_v48 = vpop.eup %3054 }
 0x839   :  { %v1264_v50 = vmul.f32 %v3055_v48, %v1256_v33 }
 0x83b   :  { %v1271_v52 = vmul.f32 %v3461_v49, %v1264_v50 }
 0x83d   :  { %v1278_v31 = vadd.f32 %v3466_v51, %v1271_v52 }
 0x83f   :  { %v1279_v53 = vpack.c.bf16 %v1278_v31, %v1278_v31 }
 0x841   :  { %2891 = vmatmul.mubr.msk.bf16.vlgmr.msra.gmra.mrb[12].mxu0 %vm79_vm0, %v1279_v53 }
 0x842   :  { %2915 = vmatpush3.bf16.msra.mxu0 %v3193_v7  ;;  %2918 = vmatprep.mubr.msk.bf16.mxu0 %vm3103_vm1, %v3102_v8  ;;  %v3485_v7 = vld [vmem:[%s3756_s10 + $0x18] sm:$0xff]  }
 0x843   :  { %2916 = vmatprep.subr.bf16.mxu0 %v3102_v8  ;;  %2901 = vmatpush3.bf16.msra.mxu1 %v3485_v7 }
 0x844   :  { %2902 = vmatprep.subr.bf16.mxu1 %v3102_v8 }
 0x846   :  { %2917 = vmatpush3.bf16.msra.mxu0 %v3202_v9  ;;  %v3492_v9 = vld [vmem:[%s3756_s10 + $0x20] sm:$0xff]  }
 0x847   :  { %2922 = vmatprep.subr.bf16.mxu0 %v3102_v8  ;;  %2903 = vmatpush3.bf16.msra.mxu1 %v3492_v9 }
 0x848   :  { %2904 = vmatprep.subr.bf16.mxu1 %v3102_v8 }
 0x849   :  { %2919 = vmatmul.mubr.msk.bf16.vlgmr.msra.gmra.mrb[16].mxu0 %vm79_vm0, %v1460_v56 }
 0x84a   :  { %2924 = vmatprep.mubr.msk.bf16.mxu0 %vm3103_vm1, %v3102_v8 }
 0x84b   :  { %2905 = vmatpush3.bf16.msra.mxu1 %v3499_v14 }
 0x84c   :  { %2906 = vmatprep.subr.bf16.mxu1 %v3102_v8 }
 0x84f   :  { %2907 = vmatpush3.bf16.msra.mxu1 %v3506_v16 }
 0x850   :  { %2908 = vmatprep.subr.bf16.mxu1 %v3102_v8 }
 0x853   :  { %2909 = vmatpush3.bf16.msra.mxu1 %v3513_v57 }
 0x854   :  { %2940 = vmatprep.subr.bf16.mxu1 %v3102_v8 }
 0x914   :  { %v1335_v59 = vpop.f32.mrb[12].mxu0 }
 0x915   :  { %v1336_v60 = vadd.f32 %v3520_v58, %v1335_v59  ;;  %v2892_v61 = vpop.f32.mrb[13].mxu0 }
 0x916   :  { %v1338_v63 = vpop.f32.mrb[14].mxu0 }
 0x917   :  { %v1342_v1 = vmul.f32 0.70710677, %v1336_v60  ;;  %v2893_v2 = vpop.f32.mrb[15].mxu0  ;;  %v1341_v11 = vmul.f32 0.5, %v1336_v60 }
 0x919   :  { %3056 = verf.f32 %v1342_v1 }
 0x91c   :  { %v1498_v3 = vpop.f32.mrb[16].mxu0 }
 0x91d   :  { %1508 = vrot.lane.b32.xlu1 %v1498_v3, %s3106_s2  ;;  %1505 = vrot.lane.b32.xlu0 %v1498_v3, %s3105_s1  ;;  %v2920_v4 = vpop.f32.mrb[17].mxu0 }
 0x91e   :  { %v1501_v5 = vpop.f32.mrb[18].mxu0 }
 0x91f   :  { %v2921_v6 = vpop.f32.mrb[19].mxu0 }
 0x921   :  { %1511 = vrot.lane.b32.xlu1 %v1498_v3, %s3104_s30  ;;  %1654 = vrot.lane.b32.xlu0 %v1498_v3, %s3107_s13 }
 0x923   :  { %v3057_v10 = vpop.eup %3056 }
 0x924   :  { %v1344_v12 = vadd.f32 1.0, %v3057_v10 }
 0x926   :  { %v1345_v17 = vmul.f32 %v1344_v12, %v1341_v11  ;;  %v3571_v11 = vld [vmem:[%s3757_s11] ss:$0 sm:$0xff]  ;;  %s3114_s11 = smov [#allocation4]  }
 0x927   :  { %s2683_s30 = sshll.u32 %s3114_s11, 4  ;;  %s2684_s30 = int_to_ptr.vmem [resolvable:$true] %s2683_s30 }
 0x928   :  { %v1346_v18 = vpack.c.bf16 %v1345_v17, %v1345_v17  ;;  %s3078_s1 = scalar_lea.vmem %s2684_s30, 256  ;;  %p3083_p1 = scmp.lt.s32.totalorder %s2684_s30, %s2684_s30 }
 0x929   :  { %p3079_p0 = scmp.ne.s32.totalorder %s2684_s30, %s3078_s1  ;;  %p3084_p2 = scmp.lt.s32.totalorder %s3078_s1, %s3078_s1 }
 0x92a   :  { %2911 = vmatmul.mubr.bf16.vlgmr.msra.gmra.mrb[28].mxu1 %v1346_v18 }
 0x92b   :  { %2942 = vmatprep.mubr.msk.bf16.mxu1 %vm3103_vm1, %v3102_v8  ;;  %p3085_p3 = por %p3084_p2, %p3083_p1 }
 0x92d   :  { %p3086_p4 = pnand %p3085_p3, %p3079_p0 }
 0x98f   :  { %v3529_v19 = vpop.permute.xlu1 %1508  ;;  %v1506_v20 = vpop.permute.xlu0 %1505 }
 0x990   :  { %1658 = vrot.lane.b32.xlu0 %v3529_v19, %s3107_s13  ;;  %1656 = vrot.lane.b32.xlu1 %v1506_v20, %s3107_s13  ;;  %v1514_v21 = vcombine.low %v1498_v3, %v3529_v19  ;;  %v1515_v23 = vcombine.high %v1498_v3, %v3529_v19 }
 0x992   :  { %v1522_v30 = vrot.slane %v1514_v21, %v3244_v37  ;;  %v1529_v32 = vrot.slane %v1515_v23, %v3244_v37 }
 0x993   :  { %v3536_v27 = vpop.permute.xlu1 %1511  ;;  %v1655_v17 = vpop.permute.xlu0 %1654 }
 0x994   :  { %v1530_v28 = vcombine.low %v1506_v20, %v3536_v27  ;;  %v1531_v29 = vcombine.high %v1506_v20, %v3536_v27  ;;  %1806 = vrot.lane.b32.xlu0 %v1498_v3, %s3108_s14  ;;  %1660 = vrot.lane.b32.xlu1 %v3536_v27, %s3107_s13 }
 0x996   :  { %v1538_v33 = vrot.slane %v1530_v28, %v3244_v37  ;;  %v1545_v34 = vrot.slane %v1531_v29, %v3244_v37 }
 0x998   :  { %v1546_v36 = vcombine.low %v1522_v30, %v1538_v33  ;;  %v1547_v25 = vcombine.high %v1522_v30, %v1538_v33  ;;  %v1562_v42 = vcombine.low %v1529_v32, %v1545_v34  ;;  %v1563_v43 = vcombine.high %v1529_v32, %v1545_v34  ;;  %1808 = vrot.lane.b32.xlu1 %v1506_v20, %s3108_s14 }
 0x99a   :  { %v1554_v44 = vrot.slane %v1546_v36, %v3254_v47  ;;  %v1561_v45 = vrot.slane %v1547_v25, %v3254_v47  ;;  %v1570_v24 = vrot.slane %v1562_v42, %v3254_v47  ;;  %v1577_v46 = vrot.slane %v1563_v43, %v3254_v47 }
 0x99c   :  { %v1582_v48 = vcombine.low %v1554_v44, %v1561_v45  ;;  %v2736_v50 = vcombine.high %v1554_v44, %v1561_v45  ;;  %v1598_v13 = vcombine.low %v1570_v24, %v1577_v46  ;;  %v2737_v52 = vcombine.high %v1570_v24, %v1577_v46 }
 0x99e   :  { %v1589_v31 = vrot.slane %v1582_v48, %v3244_v37  ;;  %v1597_v53 = vrot.slane %v2736_v50, %v3244_v37  ;;  %v1605_v54 = vrot.slane %v1598_v13, %v3244_v37  ;;  %v1613_v55 = vrot.slane %v2737_v52, %v3244_v37 }
 0x9a0   :  { %v1614_v56 = vcombine.low %v1589_v31, %v1597_v53  ;;  %v1630_v59 = vcombine.low %v1605_v54, %v1613_v55  ;;  %v1615_v60 = vcombine.high %v1589_v31, %v1597_v53  ;;  %v1631_v61 = vcombine.high %v1605_v54, %v1613_v55 }
 0x9a2   :  { %v1622_v63 = vrot.slane %v1614_v56, %v3254_v47  ;;  %v1638_v1 = vrot.slane %v1630_v59, %v3254_v47  ;;  %v1629_v2 = vrot.slane %v1615_v60, %v3254_v47  ;;  %v1645_v3 = vrot.slane %v1631_v61, %v3254_v47 }
 0x9a4   :  { %v3560_v4 = vcombine.low %v1622_v63, %v1638_v1  ;;  %v3562_v5 = vcombine.high %v1629_v2, %v1645_v3  ;;  %v3564_v6 = vcombine.high %v1622_v63, %v1638_v1  ;;  %v3566_v10 = vcombine.low %v1629_v2, %v1645_v3 }
 0x9fd   :  { %v1435_v12 = vpop.f32.mrb[28].mxu1 }
 0x9fe   :  { %v1436_v18 = vadd.f32 %v3571_v11, %v1435_v12  ;;  %v2912_v20 = vpop.f32.mrb[29].mxu1 }
 0x9ff   :  { %v1438_v21 = vpop.f32.mrb[30].mxu1 }
 0xa00   :  { %v1441_v23 = vadd.f32 %v1436_v18, %v3416_v22  ;;  %v2913_v28 = vpop.f32.mrb[31].mxu1 }
 0xa02   :  { %1442 = vst.msk [vmem:[#allocation4] sm:$0xff] %vm79_vm0, %v1441_v23  ;;  %v1657_v29 = vpop.permute.xlu1 %1656  ;;  %v1659_v30 = vpop.permute.xlu0 %1658 }
 0xa03   :  { %v1666_v32 = vcombine.low %v1655_v17, %v1659_v30  ;;  %v1667_v33 = vcombine.high %v1655_v17, %v1659_v30 }
 0xa05   :  { %v1674_v42 = vrot.slane %v1666_v32, %v3244_v37  ;;  %v1681_v43 = vrot.slane %v1667_v33, %v3244_v37 }
 0xa06   :  { %v1661_v34 = vpop.permute.xlu1 %1660 }
 0xa07   :  { %v1682_v36 = vcombine.low %v1657_v29, %v1661_v34  ;;  %v1683_v25 = vcombine.high %v1657_v29, %v1661_v34 }
 0xa09   :  { %v1690_v44 = vrot.slane %v1682_v36, %v3244_v37  ;;  %v1697_v45 = vrot.slane %v1683_v25, %v3244_v37  ;;  %v1650_v25 = vpack.c.bf16 %v3560_v4, %v3560_v4 }
 0xa0b   :  { %v1698_v24 = vcombine.low %v1674_v42, %v1690_v44  ;;  %v1699_v22 = vcombine.high %v1674_v42, %v1690_v44  ;;  %v1714_v46 = vcombine.low %v1681_v43, %v1697_v45  ;;  %v1715_v48 = vcombine.high %v1681_v43, %v1697_v45 }
 0xa0c   :  { %v1653_v42 = vpack.c.bf16 %v3562_v5, %v3562_v5  ;;  %v1651_v5 = vpack.c.bf16 %v3564_v6, %v3564_v6 }
 0xa0d   :  { %v1706_v50 = vrot.slane %v1698_v24, %v3254_v47  ;;  %v1713_v13 = vrot.slane %v1699_v22, %v3254_v47  ;;  %v1722_v52 = vrot.slane %v1714_v46, %v3254_v47  ;;  %v1729_v31 = vrot.slane %v1715_v48, %v3254_v47 }
 0xa0e   :  { %v1652_v24 = vpack.c.bf16 %v3566_v10, %v3566_v10 }
 0xa0f   :  { %v1734_v53 = vcombine.low %v1706_v50, %v1713_v13  ;;  %v2738_v54 = vcombine.high %v1706_v50, %v1713_v13  ;;  %v1750_v55 = vcombine.low %v1722_v52, %v1729_v31  ;;  %v2739_v56 = vcombine.high %v1722_v52, %v1729_v31 }
 0xa11   :  { %v1741_v59 = vrot.slane %v1734_v53, %v3244_v37  ;;  %v1749_v60 = vrot.slane %v2738_v54, %v3244_v37  ;;  %v1757_v61 = vrot.slane %v1750_v55, %v3244_v37  ;;  %v1765_v63 = vrot.slane %v2739_v56, %v3244_v37 }
 0xa13   :  { %v1766_v1 = vcombine.low %v1741_v59, %v1749_v60  ;;  %v1782_v2 = vcombine.low %v1757_v61, %v1765_v63  ;;  %v1767_v3 = vcombine.high %v1741_v59, %v1749_v60  ;;  %v1783_v12 = vcombine.high %v1757_v61, %v1765_v63 }
 0xa15   :  { %v1774_v17 = vrot.slane %v1766_v1, %v3254_v47  ;;  %v1790_v18 = vrot.slane %v1782_v2, %v3254_v47  ;;  %v1781_v20 = vrot.slane %v1767_v3, %v3254_v47  ;;  %v1797_v21 = vrot.slane %v1783_v12, %v3254_v47  ;;  %v1807_v12 = vpop.permute.xlu0 %1806 }
 0xa17   :  { %v1798_v23 = vcombine.low %v1774_v17, %v1790_v18  ;;  %v1801_v28 = vcombine.high %v1781_v20, %v1797_v21  ;;  %v1799_v34 = vcombine.high %v1774_v17, %v1790_v18  ;;  %v1800_v44 = vcombine.low %v1781_v20, %v1797_v21  ;;  %v1809_v21 = vpop.permute.xlu1 %1808 }
 0xa19   :  { %v1802_v29 = vpack.c.bf16 %v1798_v23, %v1798_v23  ;;  %v1805_v30 = vpack.c.bf16 %v1801_v28, %v1801_v28  ;;  %v1803_v36 = vpack.c.bf16 %v1799_v34, %v1799_v34  ;;  %v1804_v4 = vpack.c.bf16 %v1800_v44, %v1800_v44 }
 0xa1b   :  { %v1962_v32 = vsel %vm618_vm2, %v1802_v29, 0  ;;  %v2100_v33 = vsel %vm618_vm2, %v1805_v30, 0  ;;  %v2008_v43 = vsel %vm618_vm2, %v1803_v36, 0  ;;  %v2054_v45 = vsel %vm618_vm2, %v1804_v4, 0 }
 0xa1c   :  { %2923 = vmatpush3.bf16.xpose.msra.mxu0 %v1962_v32  ;;  %2941 = vmatpush3.bf16.xpose.msra.mxu1 %v2100_v33 }
 0xa1d   :  { %2928 = vmatprep.subr.bf16.mxu0 %v3102_v8  ;;  %2952 = vmatprep.subr.bf16.mxu1 %v3102_v8 }
 0xa23   :  { %2925 = vmatmul.mubr.msk.bf16.vlgmr.msra.gmra.mrb[20].mxu0 %vm618_vm2, %v1650_v25  ;;  %2943 = vmatmul.mubr.msk.bf16.vlgmr.msra.gmra.mrb[32].mxu1 %vm618_vm2, %v1653_v42 }
 0xa24   :  { %2929 = vmatpush3.bf16.xpose.msra.mxu0 %v2008_v43  ;;  %2930 = vmatprep.mubr.msk.bf16.mxu0 %vm3103_vm1, %v3102_v8 }
 0xa25   :  { %2934 = vmatprep.subr.bf16.mxu0 %v3102_v8  ;;  %2954 = vmatprep.mubr.msk.bf16.mxu1 %vm3103_vm1, %v3102_v8 }
 0xa2b   :  { %2931 = vmatmul.mubr.msk.bf16.vlgmr.msra.gmra.mrb[24].mxu0 %vm618_vm2, %v1651_v5 }
 0xa2c   :  { %2935 = vmatpush3.bf16.xpose.msra.mxu0 %v2054_v45  ;;  %2936 = vmatprep.mubr.msk.bf16.mxu0 %vm3103_vm1, %v3102_v8 }
 0xa2d   :  { %2946 = vmatprep.subr.bf16.mxu0 %v3102_v8 }
 0xa33   :  { %2937 = vmatmul.mubr.msk.bf16.vlgmr.msra.gmra.mrb[28].mxu0 %vm618_vm2, %v1652_v24 }
 0xa34   :  { %2948 = vmatprep.mubr.msk.bf16.mxu0 %vm3103_vm1, %v3102_v8 }
 0xaf6   :  { %v1998_v22 = vpop.f32.mrb[20].mxu0  ;;  %v3620_v6 = vpop.f32.mrb[32].mxu1 }
 0xaf7   :  { %v2926_v46 = vpop.f32.mrb[21].mxu0  ;;  %v2944_v48 = vpop.f32.mrb[33].mxu1  ;;  %v2142_v50 = vsel %vm618_vm2, %v1998_v22, -inf  ;;  %v2151_v3 = vsel %vm618_vm2, %v3620_v6, -inf }
 0xaf8   :  { %2143 = vmax.xlane.f32.xlu0 %v2142_v50  ;;  %v2001_v13 = vpop.f32.mrb[22].mxu0  ;;  %v2139_v52 = vpop.f32.mrb[34].mxu1 }
 0xaf9   :  { %v2927_v31 = vpop.f32.mrb[23].mxu0  ;;  %v2945_v53 = vpop.f32.mrb[35].mxu1 }
 0xafe   :  { %v2044_v54 = vpop.f32.mrb[24].mxu0 }
 0xaff   :  { %v2932_v55 = vpop.f32.mrb[25].mxu0  ;;  %v2145_v10 = vsel %vm618_vm2, %v2044_v54, -inf }
 0xb00   :  { %2146 = vmax.xlane.f32.xlu1 %v2145_v10  ;;  %v2047_v56 = vpop.f32.mrb[26].mxu0 }
 0xb01   :  { %v2933_v59 = vpop.f32.mrb[27].mxu0 }
 0xb06   :  { %v3624_v60 = vpop.f32.mrb[28].mxu0 }
 0xb07   :  { %v2938_v61 = vpop.f32.mrb[29].mxu0  ;;  %v2148_v2 = vsel %vm618_vm2, %v3624_v60, -inf }
 0xb08   :  { %v2093_v63 = vpop.f32.mrb[30].mxu0 }
 0xb09   :  { %v2939_v1 = vpop.f32.mrb[31].mxu0 }
 0xb0e   :  { %1810 = vrot.lane.b32.xlu0 %v3529_v19, %s3108_s14 }
 0xb11   :  { %1812 = vrot.lane.b32.xlu1 %v3536_v27, %s3108_s14 }
 0xb2d   :  { %2149 = vmax.xlane.f32.xlu0 %v2148_v2 }
 0xb35   :  { %2152 = vmax.xlane.f32.xlu1 %v2151_v3 }
 0xb85   :  { %v2144_v17 = vpop.xlane.xlu0 %2143 }
 0xb86   :  { %v2154_v18 = vsub.f32 %v1998_v22, %v2144_v17 }
 0xb88   :  { %v2158_v20 = vmul.f32 1.442695, %v2154_v18 }
 0xb89   :  { %v1811_v23 = vpop.permute.xlu0 %1810 }
 0xb8a   :  { %3058 = vpow2.f32 %v2158_v20  ;;  %v1818_v29 = vcombine.low %v1807_v12, %v1811_v23  ;;  %v1819_v30 = vcombine.high %v1807_v12, %v1811_v23 }
 0xb8c   :  { %v1826_v25 = vrot.slane %v1818_v29, %v3244_v37  ;;  %v1833_v42 = vrot.slane %v1819_v30, %v3244_v37 }
 0xb8d   :  { %v2147_v28 = vpop.xlane.xlu1 %2146 }
 0xb8e   :  { %v2155_v19 = vsub.f32 %v2044_v54, %v2147_v28 }
 0xb90   :  { %v2160_v27 = vmul.f32 1.442695, %v2155_v19 }
 0xb91   :  { %v1813_v32 = vpop.permute.xlu1 %1812 }
 0xb92   :  { %3060 = vpow2.f32 %v2160_v27  ;;  %v1834_v33 = vcombine.low %v1809_v21, %v1813_v32  ;;  %v1835_v34 = vcombine.high %v1809_v21, %v1813_v32 }
 0xb94   :  { %v3059_v36 = vpop.eup %3058  ;;  %v1842_v43 = vrot.slane %v1834_v33, %v3244_v37  ;;  %v1849_v44 = vrot.slane %v1835_v34, %v3244_v37 }
 0xb95   :  { %v2166_v4 = vsel %vm618_vm2, %v3059_v36, 0.0 }
 0xb96   :  { %v1850_v5 = vcombine.low %v1826_v25, %v1842_v43  ;;  %v1851_v45 = vcombine.high %v1826_v25, %v1842_v43  ;;  %v1866_v24 = vcombine.low %v1833_v42, %v1849_v44  ;;  %v1867_v22 = vcombine.high %v1833_v42, %v1849_v44  ;;  %2167 = vadd.xlane.f32.xlu0 %v2166_v4 }
 0xb97   :  { %v2178_v42 = vpack.c.bf16 %v3059_v36, %v3059_v36 }
 0xb98   :  { %v1858_v46 = vrot.slane %v1850_v5, %v3254_v47  ;;  %v1865_v48 = vrot.slane %v1851_v45, %v3254_v47  ;;  %v1874_v50 = vrot.slane %v1866_v24, %v3254_v47  ;;  %v1881_v13 = vrot.slane %v1867_v22, %v3254_v47 }
 0xb9a   :  { %v1886_v52 = vcombine.low %v1858_v46, %v1865_v48  ;;  %v2740_v31 = vcombine.high %v1858_v46, %v1865_v48  ;;  %v1902_v53 = vcombine.low %v1874_v50, %v1881_v13  ;;  %v2741_v54 = vcombine.high %v1874_v50, %v1881_v13 }
 0xb9c   :  { %v3061_v55 = vpop.eup %3060  ;;  %v1893_v10 = vrot.slane %v1886_v52, %v3244_v37  ;;  %v1901_v56 = vrot.slane %v2740_v31, %v3244_v37  ;;  %v1909_v59 = vrot.slane %v1902_v53, %v3244_v37  ;;  %v1917_v61 = vrot.slane %v2741_v54, %v3244_v37 }
 0xb9d   :  { %v2169_v63 = vsel %vm618_vm2, %v3061_v55, 0.0  ;;  %v2179_v43 = vpack.c.bf16 %v3061_v55, %v3061_v55 }
 0xb9e   :  { %2170 = vadd.xlane.f32.xlu0 %v2169_v63  ;;  %v1918_v1 = vcombine.low %v1893_v10, %v1901_v56  ;;  %v1934_v2 = vcombine.low %v1909_v59, %v1917_v61  ;;  %v1919_v3 = vcombine.high %v1893_v10, %v1901_v56  ;;  %v1935_v12 = vcombine.high %v1909_v59, %v1917_v61 }
 0xba0   :  { %v1926_v17 = vrot.slane %v1918_v1, %v3254_v47  ;;  %v1942_v18 = vrot.slane %v1934_v2, %v3254_v47  ;;  %v1933_v20 = vrot.slane %v1919_v3, %v3254_v47  ;;  %v1949_v21 = vrot.slane %v1935_v12, %v3254_v47 }
 0xba2   :  { %v1950_v23 = vcombine.low %v1926_v17, %v1942_v18  ;;  %v1951_v28 = vcombine.high %v1926_v17, %v1942_v18  ;;  %v1952_v19 = vcombine.low %v1933_v20, %v1949_v21  ;;  %v1953_v29 = vcombine.high %v1933_v20, %v1949_v21 }
 0xba4   :  { %v1954_v30 = vpack.c.bf16 %v1950_v23, %v1950_v23  ;;  %v1955_v27 = vpack.c.bf16 %v1951_v28, %v1951_v28  ;;  %v1956_v34 = vpack.c.bf16 %v1952_v19, %v1952_v19  ;;  %v1957_v25 = vpack.c.bf16 %v1953_v29, %v1953_v29 }
 0xba6   :  { %v2186_v32 = vsel %vm846_vm3, %v1954_v30, 0  ;;  %v2232_v33 = vsel %vm846_vm3, %v1955_v27, 0  ;;  %v2278_v44 = vsel %vm846_vm3, %v1956_v34, 0  ;;  %v2324_v4 = vsel %vm846_vm3, %v1957_v25, 0 }
 0xba7   :  { %2947 = vmatpush3.bf16.msra.mxu0 %v2186_v32  ;;  %2953 = vmatpush3.bf16.msra.mxu1 %v2232_v33 }
 0xba8   :  { %2958 = vmatprep.subr.bf16.mxu0 %v3102_v8  ;;  %2964 = vmatprep.subr.bf16.mxu1 %v3102_v8 }
 0xbaa   :  { %2949 = vmatmul.mubr.msk.bf16.vlgmr.msra.gmra.mrb[32].mxu0 %vm618_vm2, %v2178_v42  ;;  %2955 = vmatmul.mubr.msk.bf16.vlgmr.msra.gmra.mrb[36].mxu1 %vm618_vm2, %v2179_v43 }
 0xbab   :  { %2959 = vmatpush3.bf16.msra.mxu0 %v2278_v44  ;;  %2965 = vmatpush3.bf16.msra.mxu1 %v2324_v4 }
 0xbac   :  { %2960 = vmatprep.mubr.msk.bf16.mxu0 %vm3103_vm1, %v3102_v8  ;;  %2966 = vmatprep.mubr.msk.bf16.mxu1 %vm3103_vm1, %v3102_v8 }
 0xbad   :  { %2970 = vmatprep.subr.bf16.mxu0 %v3102_v8  ;;  %2978 = vmatprep.subr.bf16.mxu1 %v3102_v8 }
 0xbba   :  { %v2150_v36 = vpop.xlane.xlu0 %2149 }
 0xbbb   :  { %v2156_v5 = vsub.f32 %v3624_v60, %v2150_v36 }
 0xbbd   :  { %v2162_v45 = vmul.f32 1.442695, %v2156_v5 }
 0xbbf   :  { %3062 = vpow2.f32 %v2162_v45 }
 0xbc2   :  { %v2153_v24 = vpop.xlane.xlu1 %2152 }
 0xbc3   :  { %v2157_v22 = vsub.f32 %v3620_v6, %v2153_v24 }
 0xbc5   :  { %v2164_v46 = vmul.f32 1.442695, %v2157_v22 }
 0xbc7   :  { %3064 = vpow2.f32 %v2164_v46 }
 0xbc9   :  { %v3063_v48 = vpop.eup %3062 }
 0xbca   :  { %v2172_v50 = vsel %vm618_vm2, %v3063_v48, 0.0  ;;  %v2180_v13 = vpack.c.bf16 %v3063_v48, %v3063_v48 }
 0xbcb   :  { %2173 = vadd.xlane.f32.xlu1 %v2172_v50 }
 0xbcc   :  { %2961 = vmatmul.mubr.msk.bf16.vlgmr.msra.gmra.mrb[36].mxu0 %vm618_vm2, %v2180_v13 }
 0xbcd   :  { %2971 = vmatpush3.bf16.msra.mxu0 %v3369_v35  ;;  %2974 = vmatprep.mubr.msk.bf16.mxu0 %vm3103_vm1, %v3102_v8 }
 0xbce   :  { %2972 = vmatprep.subr.bf16.mxu0 %v3102_v8 }
 0xbd1   :  { %v3065_v60 = vpop.eup %3064  ;;  %2973 = vmatpush3.bf16.msra.mxu0 %v3380_v26 }
 0xbd2   :  { %v2175_v6 = vsel %vm618_vm2, %v3065_v60, 0.0  ;;  %v2181_v52 = vpack.c.bf16 %v3065_v60, %v3065_v60  ;;  %2986 = vmatprep.subr.bf16.mxu0 %v3102_v8 }
 0xbd3   :  { %2176 = vadd.xlane.f32.xlu0 %v2175_v6 }
 0xbd4   :  { %2967 = vmatmul.mubr.msk.bf16.vlgmr.msra.gmra.mrb[40].mxu1 %vm618_vm2, %v2181_v52 }
 0xbd5   :  { %2979 = vmatpush3.bf16.msra.mxu1 %v3426_v0  ;;  %2982 = vmatprep.mubr.msk.bf16.mxu1 %vm3103_vm1, %v3102_v8 }
 0xbd6   :  { %2980 = vmatprep.subr.bf16.mxu1 %v3102_v8 }
 0xbd9   :  { %2981 = vmatpush3.bf16.msra.mxu1 %v3432_v38 }
 0xc23   :  { %v2168_v59 = vpop.xlane.xlu0 %2167 }
 0xc24   :  { %3066 = vrcp.f32 %v2168_v59 }
 0xc2b   :  { %v2171_v0 = vpop.xlane.xlu0 %2170 }
 0xc2e   :  { %v3067_v1 = vpop.eup %3066 }
 0xc58   :  { %v2174_v61 = vpop.xlane.xlu1 %2173 }
 0xc59   :  { %3068 = vrcp.f32 %v2174_v61 }
 0xc5a   :  { %3070 = vrcp.f32 %v2171_v0 }
 0xc60   :  { %v2177_v63 = vpop.xlane.xlu0 %2176 }
 0xc61   :  { %3072 = vrcp.f32 %v2177_v63 }
 0xc63   :  { %v3069_v2 = vpop.eup %3068 }
 0xc64   :  { %v3071_v28 = vpop.eup %3070 }
 0xc6b   :  { %v3073_v19 = vpop.eup %3072 }
 0xc7d   :  { %v2222_v35 = vpop.f32.mrb[32].mxu0  ;;  %v2268_v31 = vpop.f32.mrb[36].mxu1 }
 0xc7e   :  { %v2950_v26 = vpop.f32.mrb[33].mxu0  ;;  %v2956_v53 = vpop.f32.mrb[37].mxu1  ;;  %v2370_v38 = vmul.f32 %v3067_v1, %v2222_v35  ;;  %v2371_v30 = vmul.f32 %v3071_v28, %v2268_v31 }
 0xc7f   :  { %v2225_v54 = vpop.f32.mrb[34].mxu0  ;;  %v2271_v55 = vpop.f32.mrb[38].mxu1 }
 0xc80   :  { %v2951_v10 = vpop.f32.mrb[35].mxu0  ;;  %v2957_v56 = vpop.f32.mrb[39].mxu1 }
 0xc9f   :  { %v2314_v3 = vpop.f32.mrb[36].mxu0 }
 0xca0   :  { %v2372_v12 = vmul.f32 %v3069_v2, %v2314_v3  ;;  %v2962_v17 = vpop.f32.mrb[37].mxu0 }
 0xca1   :  { %v2317_v18 = vpop.f32.mrb[38].mxu0 }
 0xca2   :  { %v2374_v20 = vcombine.low %v2370_v38, %v2372_v12  ;;  %v2375_v21 = vcombine.high %v2370_v38, %v2372_v12  ;;  %v2963_v23 = vpop.f32.mrb[39].mxu0 }
 0xca4   :  { %v2382_v43 = vrot.slane %v2374_v20, %v3244_v37  ;;  %v2389_v44 = vrot.slane %v2375_v21, %v3244_v37 }
 0xca7   :  { %v2360_v29 = vpop.f32.mrb[40].mxu1 }
 0xca8   :  { %v2373_v27 = vmul.f32 %v3073_v19, %v2360_v29  ;;  %v2968_v32 = vpop.f32.mrb[41].mxu1 }
 0xca9   :  { %v2363_v33 = vpop.f32.mrb[42].mxu1 }
 0xcaa   :  { %v2390_v34 = vcombine.low %v2371_v30, %v2373_v27  ;;  %v2391_v25 = vcombine.high %v2371_v30, %v2373_v27  ;;  %v2969_v42 = vpop.f32.mrb[43].mxu1 }
 0xcac   :  { %v2398_v4 = vrot.slane %v2390_v34, %v3244_v37  ;;  %v2405_v36 = vrot.slane %v2391_v25, %v3244_v37 }
 0xcae   :  { %v2406_v5 = vcombine.low %v2382_v43, %v2398_v4  ;;  %v2407_v45 = vcombine.high %v2382_v43, %v2398_v4  ;;  %v2422_v24 = vcombine.low %v2389_v44, %v2405_v36  ;;  %v2423_v22 = vcombine.high %v2389_v44, %v2405_v36 }
 0xcb0   :  { %v2414_v46 = vrot.slane %v2406_v5, %v3254_v47  ;;  %v2421_v48 = vrot.slane %v2407_v45, %v3254_v47  ;;  %v2430_v50 = vrot.slane %v2422_v24, %v3254_v47  ;;  %v2437_v13 = vrot.slane %v2423_v22, %v3254_v47 }
 0xcb2   :  { %v2442_v60 = vcombine.low %v2414_v46, %v2421_v48  ;;  %v2750_v6 = vcombine.high %v2414_v46, %v2421_v48  ;;  %v2458_v52 = vcombine.low %v2430_v50, %v2437_v13  ;;  %v2751_v35 = vcombine.high %v2430_v50, %v2437_v13 }
 0xcb4   :  { %v2449_v31 = vrot.slane %v2442_v60, %v3244_v37  ;;  %v2457_v26 = vrot.slane %v2750_v6, %v3244_v37  ;;  %v2465_v53 = vrot.slane %v2458_v52, %v3244_v37  ;;  %v2473_v54 = vrot.slane %v2751_v35, %v3244_v37 }
 0xcb6   :  { %v2475_v55 = vcombine.high %v2449_v31, %v2457_v26  ;;  %v2491_v10 = vcombine.high %v2465_v53, %v2473_v54  ;;  %v2474_v56 = vcombine.low %v2449_v31, %v2457_v26  ;;  %v2490_v59 = vcombine.low %v2465_v53, %v2473_v54 }
 0xcb8   :  { %v2489_v61 = vrot.slane %v2475_v55, %v3254_v47  ;;  %v2505_v0 = vrot.slane %v2491_v10, %v3254_v47  ;;  %v2482_v63 = vrot.slane %v2474_v56, %v3254_v47  ;;  %v2498_v1 = vrot.slane %v2490_v59, %v3254_v47 }
 0xcba   :  { %v2508_v2 = vcombine.low %v2489_v61, %v2505_v0  ;;  %v2507_v3 = vcombine.high %v2482_v63, %v2498_v1  ;;  %v2509_v38 = vcombine.high %v2489_v61, %v2505_v0  ;;  %v2506_v12 = vcombine.low %v2482_v63, %v2498_v1 }
 0xcbc   :  { %2515 = vrot.lane.b32.xlu0 %v2508_v2, %s3111_s4  ;;  %2511 = vrot.lane.b32.xlu1 %v2507_v3, %s3112_s19 }
 0xcc0   :  { %2519 = vrot.lane.b32.xlu1 %v2509_v38, %s3113_s20 }
 0xd2e   :  { %v2512_v37 = vpop.permute.xlu1 %2511  ;;  %v2516_v17 = vpop.permute.xlu0 %2515 }
 0xd2f   :  { %v2522_v18 = vsel %vm618_vm2, %v2506_v12, %v2512_v37 }
 0xd30   :  { %v2523_v21 = vsel %vm1185_vm4, %v2522_v18, %v2516_v17 }
 0xd32   :  { %v2520_v20 = vpop.permute.xlu1 %2519 }
 0xd33   :  { %v2524_v23 = vsel %vm1187_vm5, %v2523_v21, %v2520_v20 }
 0xd34   :  { %v2525_v47 = vpack.c.bf16 %v2524_v23, %v2524_v23 }
 0xd36   :  { %2975 = vmatmul.mubr.msk.bf16.vlgmr.msra.gmra.mrb[40].mxu0 %vm79_vm0, %v2525_v47 }
 0xd37   :  { %2987 = vmatpush3.bf16.msra.mxu0 %v3440_v39  ;;  %3002 = vmatprep.mubr.msk.bf16.mxu0 %vm3103_vm1, %v3102_v8 }
 0xd38   :  { %2988 = vmatprep.subr.bf16.mxu0 %v3102_v8 }
 0xd3b   :  { %2989 = vmatpush3.bf16.msra.mxu0 %v3446_v40 }
 0xd3c   :  { %2990 = vmatprep.subr.bf16.mxu0 %v3102_v8 }
 0xd3f   :  { %2991 = vmatpush3.bf16.msra.mxu0 %v3453_v41 }
 0xd40   :  { %2992 = vmatprep.subr.bf16.mxu0 %v3102_v8 }
 0xd43   :  { %2993 = vmatpush3.bf16.msra.mxu0 %v3485_v7 }
 0xd44   :  { %2994 = vmatprep.subr.bf16.mxu0 %v3102_v8 }
 0xd47   :  { %2995 = vmatpush3.bf16.msra.mxu0 %v3492_v9 }
 0xd48   :  { %2996 = vmatprep.subr.bf16.mxu0 %v3102_v8 }
 0xd4b   :  { %2997 = vmatpush3.bf16.msra.mxu0 %v3499_v14 }
 0xd4c   :  { %2998 = vmatprep.subr.bf16.mxu0 %v3102_v8 }
 0xd4f   :  { %2999 = vmatpush3.bf16.msra.mxu0 %v3506_v16 }
 0xd50   :  { %3000 = vmatprep.subr.bf16.mxu0 %v3102_v8 }
 0xd53   :  { %3001 = vmatpush3.bf16.msra.mxu0 %v3513_v57 }
 0xe09   :  { %v2563_v39 = vpop.f32.mrb[40].mxu0 }
 0xe0a   :  { %v2564_v40 = vadd.f32 %v3411_v15, %v2563_v39  ;;  %v2976_v41 = vpop.f32.mrb[41].mxu0 }
 0xe0b   :  { %v2566_v7 = vpop.f32.mrb[42].mxu0 }
 0xe0c   :  { %v2569_v28 = vadd.f32 %v3398_v62, %v2564_v40  ;;  %v2977_v9 = vpop.f32.mrb[43].mxu0 }
 0xe0e   :  { %v2570_v19 = vsel %vm79_vm0, %v2569_v28, 0.0 }
 0xe0f   :  { %2571 = vadd.xlane.f32.xlu1 %v2570_v19 }
 0xe9c   :  { %v2572_v14 = vpop.xlane.xlu1 %2571 }
 0xe9d   :  { %v2573_v29 = vmul.f32 0.03125, %v2572_v14 }
 0xe9f   :  { %v2574_v30 = vsub.f32 %v2569_v28, %v2573_v29 }
 0xea1   :  { %v2575_v27 = vmul.f32 %v2574_v30, %v2574_v30 }
 0xea3   :  { %v2576_v16 = vsel %vm79_vm0, %v2575_v27, 0.0 }
 0xea4   :  { %2577 = vadd.xlane.f32.xlu0 %v2576_v16 }
 0xf31   :  { %v2578_v8 = vpop.xlane.xlu0 %2577 }
 0xf32   :  { %v2579_v57 = vmul.f32 0.03125, %v2578_v8 }
 0xf34   :  { %v2580_v32 = vadd.f32 1e-05, %v2579_v57 }
 0xf36   :  { %3074 = vrsqrt.f32 %v2580_v32 }
 0xf40   :  { %v3075_v15 = vpop.eup %3074 }
 0xf41   :  { %v2582_v33 = vmul.f32 %v3075_v15, %v2574_v30 }
 0xf43   :  { %v2583_v34 = vmul.f32 %v3461_v49, %v2582_v33 }
 0xf45   :  { %v2584_v62 = vadd.f32 %v3466_v51, %v2583_v34 }
 0xf47   :  { %v2585_v25 = vpack.c.bf16 %v2584_v62, %v2584_v62 }
 0xf49   :  { %2983 = vmatmul.mubr.msk.bf16.vlgmr.msra.gmra.mrb[44].mxu1 %vm79_vm0, %v2585_v25 }
0x101c   :  { %v2623_v42 = vpop.f32.mrb[44].mxu1 }
0x101d   :  { %v2624_v43 = vadd.f32 %v3520_v58, %v2623_v42  ;;  %v2984_v44 = vpop.f32.mrb[45].mxu1 }
0x101e   :  { %v2626_v4 = vpop.f32.mrb[46].mxu1 }
0x101f   :  { %v2630_v36 = vmul.f32 0.70710677, %v2624_v43  ;;  %v2985_v5 = vpop.f32.mrb[47].mxu1  ;;  %v2629_v24 = vmul.f32 0.5, %v2624_v43 }
0x1021   :  { %3076 = verf.f32 %v2630_v36 }
0x102b   :  { %v3077_v45 = vpop.eup %3076 }
0x102c   :  { %v2632_v22 = vadd.f32 1.0, %v3077_v45 }
0x102e   :  { %v2633_v46 = vmul.f32 %v2632_v22, %v2629_v24 }
0x1030   :  { %v2634_v48 = vpack.c.bf16 %v2633_v46, %v2633_v46 }
0x1032   :  { %3003 = vmatmul.mubr.bf16.vlgmr.msra.gmra.mrb[44].mxu0 %v2634_v48 }
0x1105   :  { %v2669_v49 = vpop.f32.mrb[44].mxu0 }
0x1106   :  { %v2670_v51 = vadd.f32 %v3571_v11, %v2669_v49  ;;  %v3004_v50 = vpop.f32.mrb[45].mxu0 }
0x1107   :  { %v2672_v13 = vpop.f32.mrb[46].mxu0 }
0x1108   :  { %v2675_v60 = vadd.f32 %v2670_v51, %v2569_v28  ;;  %v3005_v58 = vpop.f32.mrb[47].mxu0 }
0x110a   :  { %2677 = vst.msk [vmem:[#allocation4 + $0x8] sm:$0xff] %vm79_vm0, %v2675_v60 }
0x110b   :  { %3089 = shalt.err (!%p3086_p4)
}
0x110c   :  { %s3090_s14 = scalar_lea.hbm %s3758_s12, 256 }
0x110d   :  { %p3091_p5 = scmp.ne.s32.totalorder %s3758_s12, %s3090_s14  ;;  %p3094_p6 = scmp.lt.u32.totalorder %s3090_s14, %s3758_s12 }
0x110f   :  { %p3096_p7 = pnand %p3094_p6, %p3091_p5 }
0x1111   :  { %3099 = shalt.err (!%p3096_p7)
}
0x1112   :  { %s3115_s15 = smov 128  }
0x1113   :  { %2689 = dma.vmem_to_hbm [thread:$0]  %s2684_s30, 256, %s3758_s12, [#allocation5], %s3115_s15, %s3115_s15, %s3112_s19  }
0x1114   :  { %3100 = dma.done.wait [#allocation5], 256  }
0x1115   :  { %3101 = vsyncadd [#allocation5], 4294967040 }
0x1116   :  { %2693 = vsyncpa [#allocation5], 1 }

// kernel: tpu_custom_call.1
= control target key start
LH: loop header
LB: loop body
LE: loop exit
PB: predicated region body
PF: predicated region fallthrough
CT: control target
= control target key end

     0   :  { %vm79_vm0 = vcmask 261120   ;;  %s3746_s0 = inlined_call_operand.vmem [shape: f32[2,8,32], index: 0, kind: input, shape index: {}]   ;;  %s3747_s1 = inlined_call_operand.vmem [shape: f32[1,32], index: 1, kind: input, shape index: {}]   ;;  %s3748_s2 = inlined_call_operand.vmem [shape: f32[1,32], index: 2, kind: input, shape index: {}]   ;;  %s3749_s3 = inlined_call_operand.vmem [shape: bf16[32,96], index: 3, kind: input, shape index: {}]   ;;  %s3750_s4 = inlined_call_operand.vmem [shape: bf16[32,32], index: 4, kind: input, shape index: {}]   ;;  %s3751_s5 = inlined_call_operand.vmem [shape: f32[1,32], index: 5, kind: input, shape index: {}]   ;;  %s3752_s6 = inlined_call_operand.vmem [shape: f32[1,32], index: 6, kind: input, shape index: {}]   ;;  %s3753_s7 = inlined_call_operand.vmem [shape: f32[1,32], index: 7, kind: input, shape index: {}]   ;;  %s3754_s8 = inlined_call_operand.vmem [shape: bf16[32,128], index: 8, kind: input, shape index: {}]   ;;  %s3755_s9 = inlined_call_operand.vmem [shape: f32[1,128], index: 9, kind: input, shape index: {}]   ;;  %s3756_s10 = inlined_call_operand.vmem [shape: bf16[128,32], index: 10, kind: input, shape index: {}]   ;;  %s3757_s11 = inlined_call_operand.vmem [shape: f32[1,32], index: 11, kind: input, shape index: {}]   ;;  %s3758_s12 = inlined_call_operand.hbm [shape: f32[2,8,32], index: 12, kind: output, shape index: {}]  }
   0x1   :  { %v3184_v0 = vld [vmem:[%s3746_s0] sm:$0xff] }
   0x2   :  { %v80_v1 = vsel %vm79_vm0, %v3184_v0, 0.0 }
   0x3   :  { %81 = vadd.xlane.f32.xlu0 %v80_v1 }
   0x4   :  { %17 = vsyncpa [#allocation5], 0  ;;  %v3193_v7 = vld [vmem:[%s3749_s3] sm:$0xff]   ;;  %v3102_v8 = vmov 0.0   ;;  %vm3103_vm1 = vmmov 0   ;;  %v3202_v9 = vld [vmem:[%s3749_s3 + $0x8] sm:$0xff]   ;;  %v179_v29 = vlaneseq }
   0x5   :  { %2822 = vmatprep.subr.bf16.mxu1 %v3102_v8  ;;  %2826 = vmatprep.mubr.msk.bf16.mxu1 %vm3103_vm1, %v3102_v8  ;;  %v3213_v14 = vld [vmem:[%s3747_s1] ss:$0 sm:$0xff]  ;;  %s3104_s30 = smov 104   ;;  %s3105_s1 = smov 120   ;;  %v3109_v27 = vmov 1983009808  }
   0x6   :  { %2823 = vmatpush3.bf16.msra.mxu1 %v3193_v7  ;;  %2848 = vmatprep.subr.bf16.mxu0 %v3102_v8  ;;  %v3218_v16 = vld [vmem:[%s3748_s2] ss:$0 sm:$0xff]  ;;  %s3106_s2 = smov 112   ;;  %s3107_s13 = smov 96   ;;  %v177_v28 = vunpack.c.l.s4 %v3109_v27  ;;  %v180_v31 = vshrl.u32 %v179_v29, 7  ;;  %vm618_vm2 = vcmask 64512  }
   0x7   :  { %2824 = vmatprep.subr.bf16.mxu1 %v3102_v8  ;;  %2850 = vmatprep.mubr.msk.bf16.mxu0 %vm3103_vm1, %v3102_v8  ;;  %s3108_s14 = smov 64   ;;  %v3110_v33 = vmov 1934713408   ;;  %vm846_vm3 = vcmask 1043456   ;;  %s3112_s19 = smov 8   ;;  %vm1185_vm4 = vcmask 130048  }
   0x8   :  { %v178_v30 = vunpack.c.0.s8 %v177_v28  ;;  %v209_v34 = vunpack.c.l.s4 %v3110_v33  ;;  %s3113_s20 = smov 24   ;;  %vm1187_vm5 = vcmask 195584  }
   0xa   :  { %2825 = vmatpush3.bf16.msra.mxu1 %v3202_v9  ;;  %v3244_v37 = vsub.s32 %v178_v30, %v180_v31  ;;  %v210_v41 = vunpack.c.0.s8 %v209_v34 }
   0xb   :  { %2830 = vmatprep.subr.bf16.mxu1 %v3102_v8 }
   0xc   :  { %v3254_v47 = vsub.s32 %v210_v41, %v180_v31 }
  0x90   :  { %v82_v2 = vpop.xlane.xlu0 %81 }
  0x91   :  { %v84_v3 = vmul.f32 0.03125, %v82_v2 }
  0x93   :  { %v85_v4 = vsub.f32 %v3184_v0, %v84_v3 }
  0x95   :  { %v86_v5 = vmul.f32 %v85_v4, %v85_v4 }
  0x97   :  { %v87_v6 = vsel %vm79_vm0, %v86_v5, 0.0 }
  0x98   :  { %88 = vadd.xlane.f32.xlu0 %v87_v6 }
 0x125   :  { %v89_v10 = vpop.xlane.xlu0 %88 }
 0x126   :  { %v90_v11 = vmul.f32 0.03125, %v89_v10 }
 0x128   :  { %v91_v12 = vadd.f32 1e-05, %v90_v11 }
 0x12a   :  { %3034 = vrsqrt.f32 %v91_v12 }
 0x134   :  { %v3035_v13 = vpop.eup %3034 }
 0x135   :  { %v93_v15 = vmul.f32 %v3035_v13, %v85_v4 }
 0x137   :  { %v100_v17 = vmul.f32 %v3213_v14, %v93_v15 }
 0x139   :  { %v107_v18 = vadd.f32 %v3218_v16, %v100_v17 }
 0x13b   :  { %v108_v19 = vpack.c.bf16 %v107_v18, %v107_v18 }
 0x13d   :  { %2827 = vmatmul.mubr.msk.bf16.vlgmr.msra.gmra.mrb[0].mxu1 %vm79_vm0, %v108_v19 }
 0x13e   :  { %2832 = vmatprep.mubr.msk.bf16.mxu1 %vm3103_vm1, %v3102_v8 }
 0x210   :  { %v158_v20 = vpop.f32.mrb[0].mxu1 }
 0x211   :  { %171 = vrot.lane.b32.xlu0 %v158_v20, %s3104_s30  ;;  %165 = vrot.lane.b32.xlu1 %v158_v20, %s3105_s1  ;;  %v2828_v21 = vpop.f32.mrb[1].mxu1 }
 0x212   :  { %v161_v22 = vpop.f32.mrb[2].mxu1 }
 0x213   :  { %v2829_v23 = vpop.f32.mrb[3].mxu1 }
 0x215   :  { %168 = vrot.lane.b32.xlu1 %v158_v20, %s3106_s2 }
 0x219   :  { %314 = vrot.lane.b32.xlu1 %v158_v20, %s3107_s13 }
 0x283   :  { %v3229_v24 = vpop.permute.xlu1 %165  ;;  %v3237_v26 = vpop.permute.xlu0 %171 }
 0x284   :  { %316 = vrot.lane.b32.xlu1 %v3229_v24, %s3107_s13  ;;  %v190_v38 = vcombine.low %v3229_v24, %v3237_v26  ;;  %v191_v39 = vcombine.high %v3229_v24, %v3237_v26 }
 0x286   :  { %v198_v44 = vrot.slane %v190_v38, %v3244_v37  ;;  %v205_v45 = vrot.slane %v191_v39, %v3244_v37 }
 0x287   :  { %v3233_v25 = vpop.permute.xlu1 %168 }
 0x288   :  { %318 = vrot.lane.b32.xlu1 %v3233_v25, %s3107_s13  ;;  %v174_v35 = vcombine.low %v158_v20, %v3233_v25  ;;  %v175_v36 = vcombine.high %v158_v20, %v3233_v25 }
 0x28a   :  { %v182_v42 = vrot.slane %v174_v35, %v3244_v37  ;;  %v189_v43 = vrot.slane %v175_v36, %v3244_v37 }
 0x28b   :  { %v315_v32 = vpop.permute.xlu1 %314 }
 0x28c   :  { %320 = vrot.lane.b32.xlu1 %v3237_v26, %s3107_s13  ;;  %v206_v48 = vcombine.low %v182_v42, %v198_v44  ;;  %v207_v49 = vcombine.high %v182_v42, %v198_v44  ;;  %v222_v50 = vcombine.low %v189_v43, %v205_v45  ;;  %v223_v51 = vcombine.high %v189_v43, %v205_v45 }
 0x28e   :  { %v214_v57 = vrot.slane %v206_v48, %v3254_v47  ;;  %v221_v58 = vrot.slane %v207_v49, %v3254_v47  ;;  %v230_v59 = vrot.slane %v222_v50, %v3254_v47  ;;  %v237_v60 = vrot.slane %v223_v51, %v3254_v47 }
 0x290   :  { %466 = vrot.lane.b32.xlu1 %v158_v20, %s3108_s14  ;;  %v242_v6 = vcombine.low %v214_v57, %v221_v58  ;;  %v2699_v10 = vcombine.high %v214_v57, %v221_v58  ;;  %v258_v11 = vcombine.low %v230_v59, %v237_v60  ;;  %v2700_v12 = vcombine.high %v230_v59, %v237_v60 }
 0x292   :  { %v249_v23 = vrot.slane %v242_v6, %v3244_v37  ;;  %v257_v27 = vrot.slane %v2699_v10, %v3244_v37  ;;  %v265_v28 = vrot.slane %v258_v11, %v3244_v37  ;;  %v273_v29 = vrot.slane %v2700_v12, %v3244_v37 }
 0x294   :  { %v274_v39 = vcombine.low %v249_v23, %v257_v27  ;;  %v275_v41 = vcombine.high %v249_v23, %v257_v27  ;;  %v291_v42 = vcombine.high %v265_v28, %v273_v29 }
 0x296   :  { %v282_v50 = vrot.slane %v274_v39, %v3254_v47 }
 0x2f6   :  { %v317_v40 = vpop.permute.xlu1 %316 }
 0x2fa   :  { %v319_v46 = vpop.permute.xlu1 %318 }
 0x2fb   :  { %v326_v52 = vcombine.low %v315_v32, %v319_v46  ;;  %v327_v53 = vcombine.high %v315_v32, %v319_v46 }
 0x2fd   :  { %v334_v61 = vrot.slane %v326_v52, %v3244_v37  ;;  %v341_v62 = vrot.slane %v327_v53, %v3244_v37 }
 0x2fe   :  { %v321_v54 = vpop.permute.xlu1 %320 }
 0x2ff   :  { %v342_v55 = vcombine.low %v317_v40, %v321_v54  ;;  %v343_v56 = vcombine.high %v317_v40, %v321_v54  ;;  %v290_v40 = vcombine.low %v265_v28, %v273_v29  ;;  %v289_v54 = vrot.slane %v275_v41, %v3254_v47 }
 0x301   :  { %v350_v63 = vrot.slane %v342_v55, %v3244_v37  ;;  %v357_v1 = vrot.slane %v343_v56, %v3244_v37  ;;  %v298_v51 = vrot.slane %v290_v40, %v3254_v47  ;;  %v305_v55 = vrot.slane %v291_v42, %v3254_v47 }
 0x303   :  { %v358_v2 = vcombine.low %v334_v61, %v350_v63  ;;  %v359_v3 = vcombine.high %v334_v61, %v350_v63  ;;  %v374_v4 = vcombine.low %v341_v62, %v357_v1  ;;  %v375_v5 = vcombine.high %v341_v62, %v357_v1 }
 0x304   :  { %v306_v59 = vcombine.low %v282_v50, %v298_v51  ;;  %v309_v60 = vcombine.high %v289_v54, %v305_v55  ;;  %v308_v10 = vcombine.low %v289_v54, %v305_v55 }
 0x305   :  { %v366_v13 = vrot.slane %v358_v2, %v3254_v47  ;;  %v373_v15 = vrot.slane %v359_v3, %v3254_v47  ;;  %v382_v17 = vrot.slane %v374_v4, %v3254_v47  ;;  %v389_v18 = vrot.slane %v375_v5, %v3254_v47 }
 0x306   :  { %v310_v62 = vpack.c.bf16 %v306_v59, %v306_v59  ;;  %v313_v63 = vpack.c.bf16 %v309_v60, %v309_v60  ;;  %v307_v3 = vcombine.high %v282_v50, %v298_v51  ;;  %v312_v11 = vpack.c.bf16 %v308_v10, %v308_v10 }
 0x307   :  { %v394_v19 = vcombine.low %v366_v13, %v373_v15  ;;  %v2701_v20 = vcombine.high %v366_v13, %v373_v15  ;;  %v410_v21 = vcombine.low %v382_v17, %v389_v18  ;;  %v2702_v22 = vcombine.high %v382_v17, %v389_v18 }
 0x308   :  { %v311_v5 = vpack.c.bf16 %v307_v3, %v307_v3 }
 0x309   :  { %v401_v30 = vrot.slane %v394_v19, %v3244_v37  ;;  %v409_v31 = vrot.slane %v2701_v20, %v3244_v37  ;;  %v417_v32 = vrot.slane %v410_v21, %v3244_v37  ;;  %v425_v33 = vrot.slane %v2702_v22, %v3244_v37 }
 0x30b   :  { %v426_v34 = vcombine.low %v401_v30, %v409_v31  ;;  %v442_v35 = vcombine.low %v417_v32, %v425_v33  ;;  %v427_v36 = vcombine.high %v401_v30, %v409_v31  ;;  %v443_v38 = vcombine.high %v417_v32, %v425_v33 }
 0x30d   :  { %v434_v43 = vrot.slane %v426_v34, %v3254_v47  ;;  %v450_v44 = vrot.slane %v442_v35, %v3254_v47  ;;  %v441_v45 = vrot.slane %v427_v36, %v3254_v47  ;;  %v457_v46 = vrot.slane %v443_v38, %v3254_v47  ;;  %v467_v38 = vpop.permute.xlu1 %466 }
 0x30f   :  { %v458_v48 = vcombine.low %v434_v43, %v450_v44  ;;  %v461_v49 = vcombine.high %v441_v45, %v457_v46  ;;  %v459_v58 = vcombine.high %v434_v43, %v450_v44  ;;  %v460_v2 = vcombine.low %v441_v45, %v457_v46 }
 0x311   :  { %v462_v52 = vpack.c.bf16 %v458_v48, %v458_v48  ;;  %v465_v53 = vpack.c.bf16 %v461_v49, %v461_v49  ;;  %v463_v61 = vpack.c.bf16 %v459_v58, %v459_v58  ;;  %v464_v4 = vpack.c.bf16 %v460_v2, %v460_v2 }
 0x313   :  { %v623_v56 = vsel %vm618_vm2, %v462_v52, 0  ;;  %v761_v57 = vsel %vm618_vm2, %v465_v53, 0  ;;  %v669_v1 = vsel %vm618_vm2, %v463_v61, 0  ;;  %v715_v6 = vsel %vm618_vm2, %v464_v4, 0 }
 0x314   :  { %2831 = vmatpush3.bf16.xpose.msra.mxu1 %v623_v56  ;;  %2849 = vmatpush3.bf16.xpose.msra.mxu0 %v761_v57 }
 0x315   :  { %2836 = vmatprep.subr.bf16.mxu1 %v3102_v8  ;;  %2860 = vmatprep.subr.bf16.mxu0 %v3102_v8 }
 0x31b   :  { %2833 = vmatmul.mubr.msk.bf16.vlgmr.msra.gmra.mrb[4].mxu1 %vm618_vm2, %v310_v62  ;;  %2851 = vmatmul.mubr.msk.bf16.vlgmr.msra.gmra.mrb[0].mxu0 %vm618_vm2, %v313_v63 }
 0x31c   :  { %2837 = vmatpush3.bf16.xpose.msra.mxu1 %v669_v1  ;;  %2838 = vmatprep.mubr.msk.bf16.mxu1 %vm3103_vm1, %v3102_v8 }
 0x31d   :  { %2842 = vmatprep.subr.bf16.mxu1 %v3102_v8  ;;  %2862 = vmatprep.mubr.msk.bf16.mxu0 %vm3103_vm1, %v3102_v8 }
 0x323   :  { %2839 = vmatmul.mubr.msk.bf16.vlgmr.msra.gmra.mrb[8].mxu1 %vm618_vm2, %v311_v5 }
 0x324   :  { %2843 = vmatpush3.bf16.xpose.msra.mxu1 %v715_v6  ;;  %2844 = vmatprep.mubr.msk.bf16.mxu1 %vm3103_vm1, %v3102_v8 }
 0x325   :  { %2854 = vmatprep.subr.bf16.mxu1 %v3102_v8 }
 0x32b   :  { %2845 = vmatmul.mubr.msk.bf16.vlgmr.msra.gmra.mrb[12].mxu1 %vm618_vm2, %v312_v11 }
 0x32c   :  { %2856 = vmatprep.mubr.msk.bf16.mxu1 %vm3103_vm1, %v3102_v8 }
 0x3ee   :  { %v659_v12 = vpop.f32.mrb[4].mxu1  ;;  %v3304_v13 = vpop.f32.mrb[0].mxu0 }
 0x3ef   :  { %v2834_v15 = vpop.f32.mrb[5].mxu1  ;;  %v2852_v17 = vpop.f32.mrb[1].mxu0  ;;  %v803_v18 = vsel %vm618_vm2, %v659_v12, -inf  ;;  %v812_v35 = vsel %vm618_vm2, %v3304_v13, -inf }
 0x3f0   :  { %v800_v19 = vpop.f32.mrb[2].mxu0  ;;  %804 = vmax.xlane.f32.xlu1 %v803_v18  ;;  %v662_v20 = vpop.f32.mrb[6].mxu1 }
 0x3f1   :  { %v2835_v21 = vpop.f32.mrb[7].mxu1  ;;  %v2853_v22 = vpop.f32.mrb[3].mxu0 }
 0x3f6   :  { %v705_v23 = vpop.f32.mrb[8].mxu1 }
 0x3f7   :  { %v2840_v27 = vpop.f32.mrb[9].mxu1  ;;  %v806_v28 = vsel %vm618_vm2, %v705_v23, -inf }
 0x3f8   :  { %807 = vmax.xlane.f32.xlu0 %v806_v28  ;;  %v708_v29 = vpop.f32.mrb[10].mxu1 }
 0x3f9   :  { %v2841_v30 = vpop.f32.mrb[11].mxu1 }
 0x3fe   :  { %v3308_v31 = vpop.f32.mrb[12].mxu1 }
 0x3ff   :  { %v2846_v32 = vpop.f32.mrb[13].mxu1  ;;  %v809_v36 = vsel %vm618_vm2, %v3308_v31, -inf }
 0x400   :  { %v754_v33 = vpop.f32.mrb[14].mxu1 }
 0x401   :  { %470 = vrot.lane.b32.xlu1 %v3233_v25, %s3108_s14  ;;  %v2847_v34 = vpop.f32.mrb[15].mxu1 }
 0x405   :  { %472 = vrot.lane.b32.xlu1 %v3237_v26, %s3108_s14 }
 0x40e   :  { %468 = vrot.lane.b32.xlu0 %v3229_v24, %s3108_s14 }
 0x429   :  { %813 = vmax.xlane.f32.xlu1 %v812_v35 }
 0x42d   :  { %810 = vmax.xlane.f32.xlu0 %v809_v36 }
 0x47d   :  { %v805_v39 = vpop.xlane.xlu1 %804 }
 0x47e   :  { %v815_v40 = vsub.f32 %v659_v12, %v805_v39 }
 0x480   :  { %v819_v41 = vmul.f32 1.442695, %v815_v40 }
 0x481   :  { %v471_v25 = vpop.permute.xlu1 %470 }
 0x482   :  { %3036 = vpow2.f32 %v819_v41  ;;  %v478_v26 = vcombine.low %v467_v38, %v471_v25  ;;  %v479_v44 = vcombine.high %v467_v38, %v471_v25 }
 0x484   :  { %v486_v51 = vrot.slane %v478_v26, %v3244_v37  ;;  %v493_v52 = vrot.slane %v479_v44, %v3244_v37 }
 0x485   :  { %v808_v42 = vpop.xlane.xlu0 %807  ;;  %v473_v24 = vpop.permute.xlu1 %472 }
 0x486   :  { %v816_v43 = vsub.f32 %v705_v23, %v808_v42 }
 0x488   :  { %v821_v45 = vmul.f32 1.442695, %v816_v43 }
 0x489   :  { %v469_v46 = vpop.permute.xlu0 %468 }
 0x48a   :  { %3038 = vpow2.f32 %v821_v45  ;;  %v494_v48 = vcombine.low %v469_v46, %v473_v24  ;;  %v495_v49 = vcombine.high %v469_v46, %v473_v24 }
 0x48c   :  { %v3037_v50 = vpop.eup %3036  ;;  %v502_v53 = vrot.slane %v494_v48, %v3244_v37  ;;  %v509_v54 = vrot.slane %v495_v49, %v3244_v37 }
 0x48d   :  { %v827_v55 = vsel %vm618_vm2, %v3037_v50, 0.0  ;;  %v839_v40 = vpack.c.bf16 %v3037_v50, %v3037_v50 }
 0x48e   :  { %v510_v56 = vcombine.low %v486_v51, %v502_v53  ;;  %v511_v57 = vcombine.high %v486_v51, %v502_v53  ;;  %v526_v58 = vcombine.low %v493_v52, %v509_v54  ;;  %v527_v59 = vcombine.high %v493_v52, %v509_v54  ;;  %828 = vadd.xlane.f32.xlu0 %v827_v55 }
 0x490   :  { %v518_v60 = vrot.slane %v510_v56, %v3254_v47  ;;  %v525_v61 = vrot.slane %v511_v57, %v3254_v47  ;;  %v534_v62 = vrot.slane %v526_v58, %v3254_v47  ;;  %v541_v63 = vrot.slane %v527_v59, %v3254_v47 }
 0x492   :  { %v546_v1 = vcombine.low %v518_v60, %v525_v61  ;;  %v2703_v2 = vcombine.high %v518_v60, %v525_v61  ;;  %v562_v3 = vcombine.low %v534_v62, %v541_v63  ;;  %v2704_v4 = vcombine.high %v534_v62, %v541_v63 }
 0x494   :  { %v3039_v5 = vpop.eup %3038  ;;  %v553_v6 = vrot.slane %v546_v1, %v3244_v37  ;;  %v561_v10 = vrot.slane %v2703_v2, %v3244_v37  ;;  %v569_v11 = vrot.slane %v562_v3, %v3244_v37  ;;  %v577_v12 = vrot.slane %v2704_v4, %v3244_v37 }
 0x495   :  { %v830_v15 = vsel %vm618_vm2, %v3039_v5, 0.0  ;;  %v840_v41 = vpack.c.bf16 %v3039_v5, %v3039_v5 }
 0x496   :  { %831 = vadd.xlane.f32.xlu0 %v830_v15  ;;  %v578_v17 = vcombine.low %v553_v6, %v561_v10  ;;  %v594_v18 = vcombine.low %v569_v11, %v577_v12  ;;  %v579_v19 = vcombine.high %v553_v6, %v561_v10  ;;  %v595_v20 = vcombine.high %v569_v11, %v577_v12 }
 0x498   :  { %v586_v21 = vrot.slane %v578_v17, %v3254_v47  ;;  %v602_v22 = vrot.slane %v594_v18, %v3254_v47  ;;  %v593_v23 = vrot.slane %v579_v19, %v3254_v47  ;;  %v609_v27 = vrot.slane %v595_v20, %v3254_v47 }
 0x49a   :  { %v610_v28 = vcombine.low %v586_v21, %v602_v22  ;;  %v611_v29 = vcombine.high %v586_v21, %v602_v22  ;;  %v612_v30 = vcombine.low %v593_v23, %v609_v27  ;;  %v613_v32 = vcombine.high %v593_v23, %v609_v27 }
 0x49c   :  { %v614_v33 = vpack.c.bf16 %v610_v28, %v610_v28  ;;  %v615_v34 = vpack.c.bf16 %v611_v29, %v611_v29  ;;  %v616_v38 = vpack.c.bf16 %v612_v30, %v612_v30  ;;  %v617_v39 = vpack.c.bf16 %v613_v32, %v613_v32 }
 0x49e   :  { %v848_v35 = vsel %vm846_vm3, %v614_v33, 0  ;;  %v894_v36 = vsel %vm846_vm3, %v615_v34, 0  ;;  %v940_v25 = vsel %vm846_vm3, %v616_v38, 0  ;;  %v986_v42 = vsel %vm846_vm3, %v617_v39, 0 }
 0x49f   :  { %2855 = vmatpush3.bf16.msra.mxu1 %v848_v35  ;;  %2861 = vmatpush3.bf16.msra.mxu0 %v894_v36  ;;  %v3369_v35 = vld [vmem:[%s3750_s4] sm:$0xff]  }
 0x4a0   :  { %2866 = vmatprep.subr.bf16.mxu1 %v3102_v8  ;;  %2872 = vmatprep.subr.bf16.mxu0 %v3102_v8 }
 0x4a2   :  { %2857 = vmatmul.mubr.msk.bf16.vlgmr.msra.gmra.mrb[16].mxu1 %vm618_vm2, %v839_v40  ;;  %2863 = vmatmul.mubr.msk.bf16.vlgmr.msra.gmra.mrb[4].mxu0 %vm618_vm2, %v840_v41 }
 0x4a3   :  { %2867 = vmatpush3.bf16.msra.mxu1 %v940_v25  ;;  %2873 = vmatpush3.bf16.msra.mxu0 %v986_v42 }
 0x4a4   :  { %2874 = vmatprep.mubr.msk.bf16.mxu0 %vm3103_vm1, %v3102_v8  ;;  %2868 = vmatprep.mubr.msk.bf16.mxu1 %vm3103_vm1, %v3102_v8 }
 0x4a5   :  { %2878 = vmatprep.subr.bf16.mxu1 %v3102_v8  ;;  %2886 = vmatprep.subr.bf16.mxu0 %v3102_v8 }
 0x4b6   :  { %v814_v43 = vpop.xlane.xlu1 %813 }
 0x4b7   :  { %v818_v26 = vsub.f32 %v3304_v13, %v814_v43 }
 0x4b9   :  { %v825_v44 = vmul.f32 1.442695, %v818_v26  ;;  %v3380_v26 = vld [vmem:[%s3750_s4 + $0x8] sm:$0xff]   ;;  %s3111_s4 = smov 16  }
 0x4ba   :  { %v811_v45 = vpop.xlane.xlu0 %810 }
 0x4bb   :  { %3040 = vpow2.f32 %v825_v44  ;;  %v817_v24 = vsub.f32 %v3308_v31, %v811_v45 }
 0x4bd   :  { %v823_v46 = vmul.f32 1.442695, %v817_v24 }
 0x4bf   :  { %3042 = vpow2.f32 %v823_v46 }
 0x4c5   :  { %v3041_v48 = vpop.eup %3040 }
 0x4c6   :  { %v836_v49 = vsel %vm618_vm2, %v3041_v48, 0.0  ;;  %v842_v50 = vpack.c.bf16 %v3041_v48, %v3041_v48 }
 0x4c7   :  { %837 = vadd.xlane.f32.xlu0 %v836_v49 }
 0x4c8   :  { %2875 = vmatmul.mubr.msk.bf16.vlgmr.msra.gmra.mrb[8].mxu0 %vm618_vm2, %v842_v50 }
 0x4c9   :  { %v3043_v51 = vpop.eup %3042  ;;  %2890 = vmatprep.mubr.msk.bf16.mxu0 %vm3103_vm1, %v3102_v8 }
 0x4ca   :  { %v833_v13 = vsel %vm618_vm2, %v3043_v51, 0.0  ;;  %v841_v52 = vpack.c.bf16 %v3043_v51, %v3043_v51 }
 0x4cb   :  { %834 = vadd.xlane.f32.xlu1 %v833_v13 }
 0x4cc   :  { %2869 = vmatmul.mubr.msk.bf16.vlgmr.msra.gmra.mrb[20].mxu1 %vm618_vm2, %v841_v52 }
 0x4cd   :  { %2882 = vmatprep.mubr.msk.bf16.mxu1 %vm3103_vm1, %v3102_v8  ;;  %2879 = vmatpush3.bf16.msra.mxu1 %v3369_v35 }
 0x4ce   :  { %2880 = vmatprep.subr.bf16.mxu1 %v3102_v8 }
 0x4d1   :  { %2881 = vmatpush3.bf16.msra.mxu1 %v3380_v26 }
 0x4d2   :  { %2894 = vmatprep.subr.bf16.mxu1 %v3102_v8 }
 0x51b   :  { %v829_v60 = vpop.xlane.xlu0 %828 }
 0x523   :  { %v832_v61 = vpop.xlane.xlu0 %831 }
 0x524   :  { %3044 = vrcp.f32 %v832_v61 }
 0x52e   :  { %v3045_v1 = vpop.eup %3044 }
 0x554   :  { %v838_v62 = vpop.xlane.xlu0 %837 }
 0x555   :  { %3046 = vrcp.f32 %v838_v62  ;;  %v3398_v62 = vld [vmem:[%s3746_s0 + $0x8] sm:$0xff] }
 0x556   :  { %3048 = vrcp.f32 %v829_v60 }
 0x558   :  { %v835_v63 = vpop.xlane.xlu1 %834 }
 0x559   :  { %3050 = vrcp.f32 %v835_v63  ;;  %v1445_v63 = vsel %vm79_vm0, %v3398_v62, 0.0 }
 0x55f   :  { %v3047_v2 = vpop.eup %3046 }
 0x560   :  { %v3049_v11 = vpop.eup %3048 }
 0x563   :  { %v3051_v18 = vpop.eup %3050 }
 0x575   :  { %v884_v31 = vpop.f32.mrb[16].mxu1  ;;  %v930_v53 = vpop.f32.mrb[4].mxu0 }
 0x576   :  { %v2858_v54 = vpop.f32.mrb[17].mxu1  ;;  %v2864_v55 = vpop.f32.mrb[5].mxu0  ;;  %v1033_v4 = vmul.f32 %v3045_v1, %v930_v53  ;;  %v1032_v20 = vmul.f32 %v3049_v11, %v884_v31 }
 0x577   :  { %v887_v56 = vpop.f32.mrb[18].mxu1  ;;  %v933_v57 = vpop.f32.mrb[6].mxu0 }
 0x578   :  { %v2859_v58 = vpop.f32.mrb[19].mxu1  ;;  %v2865_v59 = vpop.f32.mrb[7].mxu0 }
 0x59b   :  { %v1022_v3 = vpop.f32.mrb[8].mxu0 }
 0x59c   :  { %v1035_v5 = vmul.f32 %v3047_v2, %v1022_v3  ;;  %v2876_v6 = vpop.f32.mrb[9].mxu0 }
 0x59d   :  { %v1025_v10 = vpop.f32.mrb[10].mxu0 }
 0x59e   :  { %v1052_v12 = vcombine.low %v1033_v4, %v1035_v5  ;;  %v1053_v15 = vcombine.high %v1033_v4, %v1035_v5  ;;  %v2877_v17 = vpop.f32.mrb[11].mxu0 }
 0x59f   :  { %v976_v19 = vpop.f32.mrb[20].mxu1 }
 0x5a0   :  { %v1034_v21 = vmul.f32 %v3051_v18, %v976_v19  ;;  %v2870_v22 = vpop.f32.mrb[21].mxu1  ;;  %v1060_v30 = vrot.slane %v1052_v12, %v3244_v37  ;;  %v1067_v32 = vrot.slane %v1053_v15, %v3244_v37  ;;  %v3411_v15 = vld [vmem:[%s3751_s5] ss:$0 sm:$0xff] }
 0x5a1   :  { %v979_v23 = vpop.f32.mrb[22].mxu1 }
 0x5a2   :  { %v1036_v27 = vcombine.low %v1032_v20, %v1034_v21  ;;  %v1037_v28 = vcombine.high %v1032_v20, %v1034_v21  ;;  %v2871_v29 = vpop.f32.mrb[23].mxu1 }
 0x5a4   :  { %v1044_v33 = vrot.slane %v1036_v27, %v3244_v37  ;;  %v1051_v34 = vrot.slane %v1037_v28, %v3244_v37 }
 0x5a6   :  { %v1068_v36 = vcombine.low %v1044_v33, %v1060_v30  ;;  %v1069_v38 = vcombine.high %v1044_v33, %v1060_v30  ;;  %v1084_v39 = vcombine.low %v1051_v34, %v1067_v32  ;;  %v1085_v40 = vcombine.high %v1051_v34, %v1067_v32 }
 0x5a8   :  { %v1076_v41 = vrot.slane %v1068_v36, %v3254_v47  ;;  %v1083_v25 = vrot.slane %v1069_v38, %v3254_v47  ;;  %v1092_v42 = vrot.slane %v1084_v39, %v3254_v47  ;;  %v1099_v43 = vrot.slane %v1085_v40, %v3254_v47  ;;  %v3432_v38 = vld [vmem:[%s3754_s8 + $0x8] sm:$0xff]   ;;  %v3440_v39 = vld [vmem:[%s3756_s10] sm:$0xff]  }
 0x5a9   :  { %v3446_v40 = vld [vmem:[%s3756_s10 + $0x8] sm:$0xff]  }
 0x5aa   :  { %v1104_v44 = vcombine.low %v1076_v41, %v1083_v25  ;;  %v2713_v45 = vcombine.high %v1076_v41, %v1083_v25  ;;  %v1120_v24 = vcombine.low %v1092_v42, %v1099_v43  ;;  %v2714_v46 = vcombine.high %v1092_v42, %v1099_v43  ;;  %v3453_v41 = vld [vmem:[%s3756_s10 + $0x10] sm:$0xff]  }
 0x5ac   :  { %v1111_v48 = vrot.slane %v1104_v44, %v3244_v37  ;;  %v1119_v49 = vrot.slane %v2713_v45, %v3244_v37  ;;  %v1127_v50 = vrot.slane %v1120_v24, %v3244_v37  ;;  %v1135_v51 = vrot.slane %v2714_v46, %v3244_v37 }
 0x5ae   :  { %v1137_v13 = vcombine.high %v1111_v48, %v1119_v49  ;;  %v1153_v52 = vcombine.high %v1127_v50, %v1135_v51  ;;  %v1136_v31 = vcombine.low %v1111_v48, %v1119_v49  ;;  %v1152_v53 = vcombine.low %v1127_v50, %v1135_v51  ;;  %v3461_v49 = vld [vmem:[%s3752_s6] ss:$0 sm:$0xff] }
 0x5af   :  { %v3466_v51 = vld [vmem:[%s3753_s7] ss:$0 sm:$0xff] }
 0x5b0   :  { %v1151_v54 = vrot.slane %v1137_v13, %v3254_v47  ;;  %v1167_v55 = vrot.slane %v1153_v52, %v3254_v47  ;;  %v1144_v56 = vrot.slane %v1136_v31, %v3254_v47  ;;  %v1160_v57 = vrot.slane %v1152_v53, %v3254_v47 }
 0x5b2   :  { %v1170_v58 = vcombine.low %v1151_v54, %v1167_v55  ;;  %v1169_v59 = vcombine.high %v1144_v56, %v1160_v57  ;;  %v1171_v60 = vcombine.high %v1151_v54, %v1167_v55  ;;  %v1168_v61 = vcombine.low %v1144_v56, %v1160_v57  ;;  %v3513_v57 = vld [vmem:[%s3756_s10 + $0x38] sm:$0xff]  }
 0x5b4   :  { %1177 = vrot.lane.b32.xlu0 %v1170_v58, %s3111_s4  ;;  %1173 = vrot.lane.b32.xlu1 %v1169_v59, %s3112_s19  ;;  %v3520_v58 = vld [vmem:[%s3755_s9] ss:$0 sm:$0xff] }
 0x5b8   :  { %1181 = vrot.lane.b32.xlu1 %v1171_v60, %s3113_s20 }
 0x5d3   :  { %1446 = vadd.xlane.f32.xlu0 %v1445_v63 }
 0x626   :  { %v1174_v1 = vpop.permute.xlu1 %1173  ;;  %v1178_v2 = vpop.permute.xlu0 %1177 }
 0x627   :  { %v1184_v3 = vsel %vm618_vm2, %v1168_v61, %v1174_v1 }
 0x628   :  { %v1186_v5 = vsel %vm1185_vm4, %v1184_v3, %v1178_v2 }
 0x62a   :  { %v1182_v4 = vpop.permute.xlu1 %1181 }
 0x62b   :  { %v1188_v6 = vsel %vm1187_vm5, %v1186_v5, %v1182_v4 }
 0x62c   :  { %v1189_v10 = vpack.c.bf16 %v1188_v6, %v1188_v6 }
 0x62e   :  { %2883 = vmatmul.mubr.msk.bf16.vlgmr.msra.gmra.mrb[24].mxu1 %vm79_vm0, %v1189_v10 }
 0x62f   :  { %2910 = vmatprep.mubr.msk.bf16.mxu1 %vm3103_vm1, %v3102_v8  ;;  %2895 = vmatpush3.bf16.msra.mxu1 %v3440_v39 }
 0x630   :  { %2896 = vmatprep.subr.bf16.mxu1 %v3102_v8 }
 0x633   :  { %2897 = vmatpush3.bf16.msra.mxu1 %v3446_v40 }
 0x634   :  { %2898 = vmatprep.subr.bf16.mxu1 %v3102_v8 }
 0x637   :  { %2899 = vmatpush3.bf16.msra.mxu1 %v3453_v41 }
 0x638   :  { %2900 = vmatprep.subr.bf16.mxu1 %v3102_v8 }
 0x660   :  { %v1447_v11 = vpop.xlane.xlu0 %1446 }
 0x661   :  { %v1448_v12 = vmul.f32 0.03125, %v1447_v11 }
 0x663   :  { %v1449_v17 = vsub.f32 %v3398_v62, %v1448_v12 }
 0x665   :  { %v1450_v27 = vmul.f32 %v1449_v17, %v1449_v17 }
 0x667   :  { %v1451_v29 = vsel %vm79_vm0, %v1450_v27, 0.0 }
 0x701   :  { %v1245_v18 = vpop.f32.mrb[24].mxu1 }
 0x702   :  { %v1246_v19 = vadd.f32 %v3411_v15, %v1245_v18  ;;  %v2884_v20 = vpop.f32.mrb[25].mxu1 }
 0x703   :  { %v1248_v21 = vpop.f32.mrb[26].mxu1 }
 0x704   :  { %v3416_v22 = vadd.f32 %v1246_v19, %v3184_v0  ;;  %v2885_v23 = vpop.f32.mrb[27].mxu1  ;;  %v3426_v0 = vld [vmem:[%s3754_s8] sm:$0xff]  }
 0x705   :  { %2887 = vmatpush3.bf16.msra.mxu0 %v3426_v0 }
 0x706   :  { %v1252_v28 = vsel %vm79_vm0, %v3416_v22, 0.0  ;;  %2888 = vmatprep.subr.bf16.mxu0 %v3102_v8 }
 0x707   :  { %1253 = vadd.xlane.f32.xlu1 %v1252_v28 }
 0x709   :  { %2889 = vmatpush3.bf16.msra.mxu0 %v3432_v38 }
 0x70a   :  { %2914 = vmatprep.subr.bf16.mxu0 %v3102_v8 }
 0x70b   :  { %1452 = vadd.xlane.f32.xlu1 %v1451_v29 }
 0x794   :  { %v1254_v30 = vpop.xlane.xlu1 %1253 }
 0x795   :  { %v1255_v32 = vmul.f32 0.03125, %v1254_v30 }
 0x797   :  { %v1256_v33 = vsub.f32 %v3416_v22, %v1255_v32 }
 0x798   :  { %v1453_v25 = vpop.xlane.xlu1 %1452 }
 0x799   :  { %v1257_v34 = vmul.f32 %v1256_v33, %v1256_v33  ;;  %v1454_v42 = vmul.f32 0.03125, %v1453_v25 }
 0x79b   :  { %v1258_v36 = vsel %vm79_vm0, %v1257_v34, 0.0  ;;  %v1455_v43 = vadd.f32 1e-05, %v1454_v42 }
 0x79c   :  { %1259 = vadd.xlane.f32.xlu0 %v1258_v36 }
 0x79d   :  { %3052 = vrsqrt.f32 %v1455_v43 }
 0x7a7   :  { %v3053_v46 = vpop.eup %3052 }
 0x7a8   :  { %v1457_v13 = vmul.f32 %v3053_v46, %v1449_v17 }
 0x7aa   :  { %v1458_v54 = vmul.f32 %v3213_v14, %v1457_v13  ;;  %v3499_v14 = vld [vmem:[%s3756_s10 + $0x28] sm:$0xff]  }
 0x7ac   :  { %v1459_v55 = vadd.f32 %v3218_v16, %v1458_v54  ;;  %v3506_v16 = vld [vmem:[%s3756_s10 + $0x30] sm:$0xff]  }
 0x7ae   :  { %v1460_v56 = vpack.c.bf16 %v1459_v55, %v1459_v55 }
 0x829   :  { %v1260_v44 = vpop.xlane.xlu0 %1259 }
 0x82a   :  { %v1261_v45 = vmul.f32 0.03125, %v1260_v44 }
 0x82c   :  { %v1262_v24 = vadd.f32 1e-05, %v1261_v45 }
 0x82e   :  { %3054 = vrsqrt.f32 %v1262_v24 }
 0x838   :  { %v3055_v48 = vpop.eup %3054 }
 0x839   :  { %v1264_v50 = vmul.f32 %v3055_v48, %v1256_v33 }
 0x83b   :  { %v1271_v52 = vmul.f32 %v3461_v49, %v1264_v50 }
 0x83d   :  { %v1278_v31 = vadd.f32 %v3466_v51, %v1271_v52 }
 0x83f   :  { %v1279_v53 = vpack.c.bf16 %v1278_v31, %v1278_v31 }
 0x841   :  { %2891 = vmatmul.mubr.msk.bf16.vlgmr.msra.gmra.mrb[12].mxu0 %vm79_vm0, %v1279_v53 }
 0x842   :  { %2915 = vmatpush3.bf16.msra.mxu0 %v3193_v7  ;;  %2918 = vmatprep.mubr.msk.bf16.mxu0 %vm3103_vm1, %v3102_v8  ;;  %v3485_v7 = vld [vmem:[%s3756_s10 + $0x18] sm:$0xff]  }
 0x843   :  { %2916 = vmatprep.subr.bf16.mxu0 %v3102_v8  ;;  %2901 = vmatpush3.bf16.msra.mxu1 %v3485_v7 }
 0x844   :  { %2902 = vmatprep.subr.bf16.mxu1 %v3102_v8 }
 0x846   :  { %2917 = vmatpush3.bf16.msra.mxu0 %v3202_v9  ;;  %v3492_v9 = vld [vmem:[%s3756_s10 + $0x20] sm:$0xff]  }
 0x847   :  { %2922 = vmatprep.subr.bf16.mxu0 %v3102_v8  ;;  %2903 = vmatpush3.bf16.msra.mxu1 %v3492_v9 }
 0x848   :  { %2904 = vmatprep.subr.bf16.mxu1 %v3102_v8 }
 0x849   :  { %2919 = vmatmul.mubr.msk.bf16.vlgmr.msra.gmra.mrb[16].mxu0 %vm79_vm0, %v1460_v56 }
 0x84a   :  { %2924 = vmatprep.mubr.msk.bf16.mxu0 %vm3103_vm1, %v3102_v8 }
 0x84b   :  { %2905 = vmatpush3.bf16.msra.mxu1 %v3499_v14 }
 0x84c   :  { %2906 = vmatprep.subr.bf16.mxu1 %v3102_v8 }
 0x84f   :  { %2907 = vmatpush3.bf16.msra.mxu1 %v3506_v16 }
 0x850   :  { %2908 = vmatprep.subr.bf16.mxu1 %v3102_v8 }
 0x853   :  { %2909 = vmatpush3.bf16.msra.mxu1 %v3513_v57 }
 0x854   :  { %2940 = vmatprep.subr.bf16.mxu1 %v3102_v8 }
 0x914   :  { %v1335_v59 = vpop.f32.mrb[12].mxu0 }
 0x915   :  { %v1336_v60 = vadd.f32 %v3520_v58, %v1335_v59  ;;  %v2892_v61 = vpop.f32.mrb[13].mxu0 }
 0x916   :  { %v1338_v63 = vpop.f32.mrb[14].mxu0 }
 0x917   :  { %v1342_v1 = vmul.f32 0.70710677, %v1336_v60  ;;  %v2893_v2 = vpop.f32.mrb[15].mxu0  ;;  %v1341_v11 = vmul.f32 0.5, %v1336_v60 }
 0x919   :  { %3056 = verf.f32 %v1342_v1 }
 0x91c   :  { %v1498_v3 = vpop.f32.mrb[16].mxu0 }
 0x91d   :  { %1508 = vrot.lane.b32.xlu1 %v1498_v3, %s3106_s2  ;;  %1505 = vrot.lane.b32.xlu0 %v1498_v3, %s3105_s1  ;;  %v2920_v4 = vpop.f32.mrb[17].mxu0 }
 0x91e   :  { %v1501_v5 = vpop.f32.mrb[18].mxu0 }
 0x91f   :  { %v2921_v6 = vpop.f32.mrb[19].mxu0 }
 0x921   :  { %1511 = vrot.lane.b32.xlu1 %v1498_v3, %s3104_s30  ;;  %1654 = vrot.lane.b32.xlu0 %v1498_v3, %s3107_s13 }
 0x923   :  { %v3057_v10 = vpop.eup %3056 }
 0x924   :  { %v1344_v12 = vadd.f32 1.0, %v3057_v10 }
 0x926   :  { %v1345_v17 = vmul.f32 %v1344_v12, %v1341_v11  ;;  %v3571_v11 = vld [vmem:[%s3757_s11] ss:$0 sm:$0xff]  ;;  %s3114_s11 = smov [#allocation4]  }
 0x927   :  { %s2683_s30 = sshll.u32 %s3114_s11, 4  ;;  %s2684_s30 = int_to_ptr.vmem [resolvable:$true] %s2683_s30 }
 0x928   :  { %v1346_v18 = vpack.c.bf16 %v1345_v17, %v1345_v17  ;;  %s3078_s1 = scalar_lea.vmem %s2684_s30, 256  ;;  %p3083_p1 = scmp.lt.s32.totalorder %s2684_s30, %s2684_s30 }
 0x929   :  { %p3079_p0 = scmp.ne.s32.totalorder %s2684_s30, %s3078_s1  ;;  %p3084_p2 = scmp.lt.s32.totalorder %s3078_s1, %s3078_s1 }
 0x92a   :  { %2911 = vmatmul.mubr.bf16.vlgmr.msra.gmra.mrb[28].mxu1 %v1346_v18 }
 0x92b   :  { %2942 = vmatprep.mubr.msk.bf16.mxu1 %vm3103_vm1, %v3102_v8  ;;  %p3085_p3 = por %p3084_p2, %p3083_p1 }
 0x92d   :  { %p3086_p4 = pnand %p3085_p3, %p3079_p0 }
 0x98f   :  { %v3529_v19 = vpop.permute.xlu1 %1508  ;;  %v1506_v20 = vpop.permute.xlu0 %1505 }
 0x990   :  { %1658 = vrot.lane.b32.xlu0 %v3529_v19, %s3107_s13  ;;  %1656 = vrot.lane.b32.xlu1 %v1506_v20, %s3107_s13  ;;  %v1514_v21 = vcombine.low %v1498_v3, %v3529_v19  ;;  %v1515_v23 = vcombine.high %v1498_v3, %v3529_v19 }
 0x992   :  { %v1522_v30 = vrot.slane %v1514_v21, %v3244_v37  ;;  %v1529_v32 = vrot.slane %v1515_v23, %v3244_v37 }
 0x993   :  { %v3536_v27 = vpop.permute.xlu1 %1511  ;;  %v1655_v17 = vpop.permute.xlu0 %1654 }
 0x994   :  { %v1530_v28 = vcombine.low %v1506_v20, %v3536_v27  ;;  %v1531_v29 = vcombine.high %v1506_v20, %v3536_v27  ;;  %1806 = vrot.lane.b32.xlu0 %v1498_v3, %s3108_s14  ;;  %1660 = vrot.lane.b32.xlu1 %v3536_v27, %s3107_s13 }
 0x996   :  { %v1538_v33 = vrot.slane %v1530_v28, %v3244_v37  ;;  %v1545_v34 = vrot.slane %v1531_v29, %v3244_v37 }
 0x998   :  { %v1546_v36 = vcombine.low %v1522_v30, %v1538_v33  ;;  %v1547_v25 = vcombine.high %v1522_v30, %v1538_v33  ;;  %v1562_v42 = vcombine.low %v1529_v32, %v1545_v34  ;;  %v1563_v43 = vcombine.high %v1529_v32, %v1545_v34  ;;  %1808 = vrot.lane.b32.xlu1 %v1506_v20, %s3108_s14 }
 0x99a   :  { %v1554_v44 = vrot.slane %v1546_v36, %v3254_v47  ;;  %v1561_v45 = vrot.slane %v1547_v25, %v3254_v47  ;;  %v1570_v24 = vrot.slane %v1562_v42, %v3254_v47  ;;  %v1577_v46 = vrot.slane %v1563_v43, %v3254_v47 }
 0x99c   :  { %v1582_v48 = vcombine.low %v1554_v44, %v1561_v45  ;;  %v2736_v50 = vcombine.high %v1554_v44, %v1561_v45  ;;  %v1598_v13 = vcombine.low %v1570_v24, %v1577_v46  ;;  %v2737_v52 = vcombine.high %v1570_v24, %v1577_v46 }
 0x99e   :  { %v1589_v31 = vrot.slane %v1582_v48, %v3244_v37  ;;  %v1597_v53 = vrot.slane %v2736_v50, %v3244_v37  ;;  %v1605_v54 = vrot.slane %v1598_v13, %v3244_v37  ;;  %v1613_v55 = vrot.slane %v2737_v52, %v3244_v37 }
 0x9a0   :  { %v1614_v56 = vcombine.low %v1589_v31, %v1597_v53  ;;  %v1630_v59 = vcombine.low %v1605_v54, %v1613_v55  ;;  %v1615_v60 = vcombine.high %v1589_v31, %v1597_v53  ;;  %v1631_v61 = vcombine.high %v1605_v54, %v1613_v55 }
 0x9a2   :  { %v1622_v63 = vrot.slane %v1614_v56, %v3254_v47  ;;  %v1638_v1 = vrot.slane %v1630_v59, %v3254_v47  ;;  %v1629_v2 = vrot.slane %v1615_v60, %v3254_v47  ;;  %v1645_v3 = vrot.slane %v1631_v61, %v3254_v47 }
 0x9a4   :  { %v3560_v4 = vcombine.low %v1622_v63, %v1638_v1  ;;  %v3562_v5 = vcombine.high %v1629_v2, %v1645_v3  ;;  %v3564_v6 = vcombine.high %v1622_v63, %v1638_v1  ;;  %v3566_v10 = vcombine.low %v1629_v2, %v1645_v3 }
 0x9fd   :  { %v1435_v12 = vpop.f32.mrb[28].mxu1 }
 0x9fe   :  { %v1436_v18 = vadd.f32 %v3571_v11, %v1435_v12  ;;  %v2912_v20 = vpop.f32.mrb[29].mxu1 }
 0x9ff   :  { %v1438_v21 = vpop.f32.mrb[30].mxu1 }
 0xa00   :  { %v1441_v23 = vadd.f32 %v1436_v18, %v3416_v22  ;;  %v2913_v28 = vpop.f32.mrb[31].mxu1 }
 0xa02   :  { %1442 = vst.msk [vmem:[#allocation4] sm:$0xff] %vm79_vm0, %v1441_v23  ;;  %v1657_v29 = vpop.permute.xlu1 %1656  ;;  %v1659_v30 = vpop.permute.xlu0 %1658 }
 0xa03   :  { %v1666_v32 = vcombine.low %v1655_v17, %v1659_v30  ;;  %v1667_v33 = vcombine.high %v1655_v17, %v1659_v30 }
 0xa05   :  { %v1674_v42 = vrot.slane %v1666_v32, %v3244_v37  ;;  %v1681_v43 = vrot.slane %v1667_v33, %v3244_v37 }
 0xa06   :  { %v1661_v34 = vpop.permute.xlu1 %1660 }
 0xa07   :  { %v1682_v36 = vcombine.low %v1657_v29, %v1661_v34  ;;  %v1683_v25 = vcombine.high %v1657_v29, %v1661_v34 }
 0xa09   :  { %v1690_v44 = vrot.slane %v1682_v36, %v3244_v37  ;;  %v1697_v45 = vrot.slane %v1683_v25, %v3244_v37  ;;  %v1650_v25 = vpack.c.bf16 %v3560_v4, %v3560_v4 }
 0xa0b   :  { %v1698_v24 = vcombine.low %v1674_v42, %v1690_v44  ;;  %v1699_v22 = vcombine.high %v1674_v42, %v1690_v44  ;;  %v1714_v46 = vcombine.low %v1681_v43, %v1697_v45  ;;  %v1715_v48 = vcombine.high %v1681_v43, %v1697_v45 }
 0xa0c   :  { %v1653_v42 = vpack.c.bf16 %v3562_v5, %v3562_v5  ;;  %v1651_v5 = vpack.c.bf16 %v3564_v6, %v3564_v6 }
 0xa0d   :  { %v1706_v50 = vrot.slane %v1698_v24, %v3254_v47  ;;  %v1713_v13 = vrot.slane %v1699_v22, %v3254_v47  ;;  %v1722_v52 = vrot.slane %v1714_v46, %v3254_v47  ;;  %v1729_v31 = vrot.slane %v1715_v48, %v3254_v47 }
 0xa0e   :  { %v1652_v24 = vpack.c.bf16 %v3566_v10, %v3566_v10 }
 0xa0f   :  { %v1734_v53 = vcombine.low %v1706_v50, %v1713_v13  ;;  %v2738_v54 = vcombine.high %v1706_v50, %v1713_v13  ;;  %v1750_v55 = vcombine.low %v1722_v52, %v1729_v31  ;;  %v2739_v56 = vcombine.high %v1722_v52, %v1729_v31 }
 0xa11   :  { %v1741_v59 = vrot.slane %v1734_v53, %v3244_v37  ;;  %v1749_v60 = vrot.slane %v2738_v54, %v3244_v37  ;;  %v1757_v61 = vrot.slane %v1750_v55, %v3244_v37  ;;  %v1765_v63 = vrot.slane %v2739_v56, %v3244_v37 }
 0xa13   :  { %v1766_v1 = vcombine.low %v1741_v59, %v1749_v60  ;;  %v1782_v2 = vcombine.low %v1757_v61, %v1765_v63  ;;  %v1767_v3 = vcombine.high %v1741_v59, %v1749_v60  ;;  %v1783_v12 = vcombine.high %v1757_v61, %v1765_v63 }
 0xa15   :  { %v1774_v17 = vrot.slane %v1766_v1, %v3254_v47  ;;  %v1790_v18 = vrot.slane %v1782_v2, %v3254_v47  ;;  %v1781_v20 = vrot.slane %v1767_v3, %v3254_v47  ;;  %v1797_v21 = vrot.slane %v1783_v12, %v3254_v47  ;;  %v1807_v12 = vpop.permute.xlu0 %1806 }
 0xa17   :  { %v1798_v23 = vcombine.low %v1774_v17, %v1790_v18  ;;  %v1801_v28 = vcombine.high %v1781_v20, %v1797_v21  ;;  %v1799_v34 = vcombine.high %v1774_v17, %v1790_v18  ;;  %v1800_v44 = vcombine.low %v1781_v20, %v1797_v21  ;;  %v1809_v21 = vpop.permute.xlu1 %1808 }
 0xa19   :  { %v1802_v29 = vpack.c.bf16 %v1798_v23, %v1798_v23  ;;  %v1805_v30 = vpack.c.bf16 %v1801_v28, %v1801_v28  ;;  %v1803_v36 = vpack.c.bf16 %v1799_v34, %v1799_v34  ;;  %v1804_v4 = vpack.c.bf16 %v1800_v44, %v1800_v44 }
 0xa1b   :  { %v1962_v32 = vsel %vm618_vm2, %v1802_v29, 0  ;;  %v2100_v33 = vsel %vm618_vm2, %v1805_v30, 0  ;;  %v2008_v43 = vsel %vm618_vm2, %v1803_v36, 0  ;;  %v2054_v45 = vsel %vm618_vm2, %v1804_v4, 0 }
 0xa1c   :  { %2923 = vmatpush3.bf16.xpose.msra.mxu0 %v1962_v32  ;;  %2941 = vmatpush3.bf16.xpose.msra.mxu1 %v2100_v33 }
 0xa1d   :  { %2928 = vmatprep.subr.bf16.mxu0 %v3102_v8  ;;  %2952 = vmatprep.subr.bf16.mxu1 %v3102_v8 }
 0xa23   :  { %2925 = vmatmul.mubr.msk.bf16.vlgmr.msra.gmra.mrb[20].mxu0 %vm618_vm2, %v1650_v25  ;;  %2943 = vmatmul.mubr.msk.bf16.vlgmr.msra.gmra.mrb[32].mxu1 %vm618_vm2, %v1653_v42 }
 0xa24   :  { %2929 = vmatpush3.bf16.xpose.msra.mxu0 %v2008_v43  ;;  %2930 = vmatprep.mubr.msk.bf16.mxu0 %vm3103_vm1, %v3102_v8 }
 0xa25   :  { %2934 = vmatprep.subr.bf16.mxu0 %v3102_v8  ;;  %2954 = vmatprep.mubr.msk.bf16.mxu1 %vm3103_vm1, %v3102_v8 }
 0xa2b   :  { %2931 = vmatmul.mubr.msk.bf16.vlgmr.msra.gmra.mrb[24].mxu0 %vm618_vm2, %v1651_v5 }
 0xa2c   :  { %2935 = vmatpush3.bf16.xpose.msra.mxu0 %v2054_v45  ;;  %2936 = vmatprep.mubr.msk.bf16.mxu0 %vm3103_vm1, %v3102_v8 }
 0xa2d   :  { %2946 = vmatprep.subr.bf16.mxu0 %v3102_v8 }
 0xa33   :  { %2937 = vmatmul.mubr.msk.bf16.vlgmr.msra.gmra.mrb[28].mxu0 %vm618_vm2, %v1652_v24 }
 0xa34   :  { %2948 = vmatprep.mubr.msk.bf16.mxu0 %vm3103_vm1, %v3102_v8 }
 0xaf6   :  { %v1998_v22 = vpop.f32.mrb[20].mxu0  ;;  %v3620_v6 = vpop.f32.mrb[32].mxu1 }
 0xaf7   :  { %v2926_v46 = vpop.f32.mrb[21].mxu0  ;;  %v2944_v48 = vpop.f32.mrb[33].mxu1  ;;  %v2142_v50 = vsel %vm618_vm2, %v1998_v22, -inf  ;;  %v2151_v3 = vsel %vm618_vm2, %v3620_v6, -inf }
 0xaf8   :  { %2143 = vmax.xlane.f32.xlu0 %v2142_v50  ;;  %v2001_v13 = vpop.f32.mrb[22].mxu0  ;;  %v2139_v52 = vpop.f32.mrb[34].mxu1 }
 0xaf9   :  { %v2927_v31 = vpop.f32.mrb[23].mxu0  ;;  %v2945_v53 = vpop.f32.mrb[35].mxu1 }
 0xafe   :  { %v2044_v54 = vpop.f32.mrb[24].mxu0 }
 0xaff   :  { %v2932_v55 = vpop.f32.mrb[25].mxu0  ;;  %v2145_v10 = vsel %vm618_vm2, %v2044_v54, -inf }
 0xb00   :  { %2146 = vmax.xlane.f32.xlu1 %v2145_v10  ;;  %v2047_v56 = vpop.f32.mrb[26].mxu0 }
 0xb01   :  { %v2933_v59 = vpop.f32.mrb[27].mxu0 }
 0xb06   :  { %v3624_v60 = vpop.f32.mrb[28].mxu0 }
 0xb07   :  { %v2938_v61 = vpop.f32.mrb[29].mxu0  ;;  %v2148_v2 = vsel %vm618_vm2, %v3624_v60, -inf }
 0xb08   :  { %v2093_v63 = vpop.f32.mrb[30].mxu0 }
 0xb09   :  { %v2939_v1 = vpop.f32.mrb[31].mxu0 }
 0xb0e   :  { %1810 = vrot.lane.b32.xlu0 %v3529_v19, %s3108_s14 }
 0xb11   :  { %1812 = vrot.lane.b32.xlu1 %v3536_v27, %s3108_s14 }
 0xb2d   :  { %2149 = vmax.xlane.f32.xlu0 %v2148_v2 }
 0xb35   :  { %2152 = vmax.xlane.f32.xlu1 %v2151_v3 }
 0xb85   :  { %v2144_v17 = vpop.xlane.xlu0 %2143 }
 0xb86   :  { %v2154_v18 = vsub.f32 %v1998_v22, %v2144_v17 }
 0xb88   :  { %v2158_v20 = vmul.f32 1.442695, %v2154_v18 }
 0xb89   :  { %v1811_v23 = vpop.permute.xlu0 %1810 }
 0xb8a   :  { %3058 = vpow2.f32 %v2158_v20  ;;  %v1818_v29 = vcombine.low %v1807_v12, %v1811_v23  ;;  %v1819_v30 = vcombine.high %v1807_v12, %v1811_v23 }
 0xb8c   :  { %v1826_v25 = vrot.slane %v1818_v29, %v3244_v37  ;;  %v1833_v42 = vrot.slane %v1819_v30, %v3244_v37 }
 0xb8d   :  { %v2147_v28 = vpop.xlane.xlu1 %2146 }
 0xb8e   :  { %v2155_v19 = vsub.f32 %v2044_v54, %v2147_v28 }
 0xb90   :  { %v2160_v27 = vmul.f32 1.442695, %v2155_v19 }
 0xb91   :  { %v1813_v32 = vpop.permute.xlu1 %1812 }
 0xb92   :  { %3060 = vpow2.f32 %v2160_v27  ;;  %v1834_v33 = vcombine.low %v1809_v21, %v1813_v32  ;;  %v1835_v34 = vcombine.high %v1809_v21, %v1813_v32 }
 0xb94   :  { %v3059_v36 = vpop.eup %3058  ;;  %v1842_v43 = vrot.slane %v1834_v33, %v3244_v37  ;;  %v1849_v44 = vrot.slane %v1835_v34, %v3244_v37 }
 0xb95   :  { %v2166_v4 = vsel %vm618_vm2, %v3059_v36, 0.0 }
 0xb96   :  { %v1850_v5 = vcombine.low %v1826_v25, %v1842_v43  ;;  %v1851_v45 = vcombine.high %v1826_v25, %v1842_v43  ;;  %v1866_v24 = vcombine.low %v1833_v42, %v1849_v44  ;;  %v1867_v22 = vcombine.high %v1833_v42, %v1849_v44  ;;  %2167 = vadd.xlane.f32.xlu0 %v2166_v4 }
 0xb97   :  { %v2178_v42 = vpack.c.bf16 %v3059_v36, %v3059_v36 }
 0xb98   :  { %v1858_v46 = vrot.slane %v1850_v5, %v3254_v47  ;;  %v1865_v48 = vrot.slane %v1851_v45, %v3254_v47  ;;  %v1874_v50 = vrot.slane %v1866_v24, %v3254_v47  ;;  %v1881_v13 = vrot.slane %v1867_v22, %v3254_v47 }
 0xb9a   :  { %v1886_v52 = vcombine.low %v1858_v46, %v1865_v48  ;;  %v2740_v31 = vcombine.high %v1858_v46, %v1865_v48  ;;  %v1902_v53 = vcombine.low %v1874_v50, %v1881_v13  ;;  %v2741_v54 = vcombine.high %v1874_v50, %v1881_v13 }
 0xb9c   :  { %v3061_v55 = vpop.eup %3060  ;;  %v1893_v10 = vrot.slane %v1886_v52, %v3244_v37  ;;  %v1901_v56 = vrot.slane %v2740_v31, %v3244_v37  ;;  %v1909_v59 = vrot.slane %v1902_v53, %v3244_v37  ;;  %v1917_v61 = vrot.slane %v2741_v54, %v3244_v37 }
 0xb9d   :  { %v2169_v63 = vsel %vm618_vm2, %v3061_v55, 0.0  ;;  %v2179_v43 = vpack.c.bf16 %v3061_v55, %v3061_v55 }
 0xb9e   :  { %2170 = vadd.xlane.f32.xlu0 %v2169_v63  ;;  %v1918_v1 = vcombine.low %v1893_v10, %v1901_v56  ;;  %v1934_v2 = vcombine.low %v1909_v59, %v1917_v61  ;;  %v1919_v3 = vcombine.high %v1893_v10, %v1901_v56  ;;  %v1935_v12 = vcombine.high %v1909_v59, %v1917_v61 }
 0xba0   :  { %v1926_v17 = vrot.slane %v1918_v1, %v3254_v47  ;;  %v1942_v18 = vrot.slane %v1934_v2, %v3254_v47  ;;  %v1933_v20 = vrot.slane %v1919_v3, %v3254_v47  ;;  %v1949_v21 = vrot.slane %v1935_v12, %v3254_v47 }
 0xba2   :  { %v1950_v23 = vcombine.low %v1926_v17, %v1942_v18  ;;  %v1951_v28 = vcombine.high %v1926_v17, %v1942_v18  ;;  %v1952_v19 = vcombine.low %v1933_v20, %v1949_v21  ;;  %v1953_v29 = vcombine.high %v1933_v20, %v1949_v21 }
 0xba4   :  { %v1954_v30 = vpack.c.bf16 %v1950_v23, %v1950_v23  ;;  %v1955_v27 = vpack.c.bf16 %v1951_v28, %v1951_v28  ;;  %v1956_v34 = vpack.c.bf16 %v1952_v19, %v1952_v19  ;;  %v1957_v25 = vpack.c.bf16 %v1953_v29, %v1953_v29 }
 0xba6   :  { %v2186_v32 = vsel %vm846_vm3, %v1954_v30, 0  ;;  %v2232_v33 = vsel %vm846_vm3, %v1955_v27, 0  ;;  %v2278_v44 = vsel %vm846_vm3, %v1956_v34, 0  ;;  %v2324_v4 = vsel %vm846_vm3, %v1957_v25, 0 }
 0xba7   :  { %2947 = vmatpush3.bf16.msra.mxu0 %v2186_v32  ;;  %2953 = vmatpush3.bf16.msra.mxu1 %v2232_v33 }
 0xba8   :  { %2958 = vmatprep.subr.bf16.mxu0 %v3102_v8  ;;  %2964 = vmatprep.subr.bf16.mxu1 %v3102_v8 }
 0xbaa   :  { %2949 = vmatmul.mubr.msk.bf16.vlgmr.msra.gmra.mrb[32].mxu0 %vm618_vm2, %v2178_v42  ;;  %2955 = vmatmul.mubr.msk.bf16.vlgmr.msra.gmra.mrb[36].mxu1 %vm618_vm2, %v2179_v43 }
 0xbab   :  { %2959 = vmatpush3.bf16.msra.mxu0 %v2278_v44  ;;  %2965 = vmatpush3.bf16.msra.mxu1 %v2324_v4 }
 0xbac   :  { %2960 = vmatprep.mubr.msk.bf16.mxu0 %vm3103_vm1, %v3102_v8  ;;  %2966 = vmatprep.mubr.msk.bf16.mxu1 %vm3103_vm1, %v3102_v8 }
 0xbad   :  { %2970 = vmatprep.subr.bf16.mxu0 %v3102_v8  ;;  %2978 = vmatprep.subr.bf16.mxu1 %v3102_v8 }
 0xbba   :  { %v2150_v36 = vpop.xlane.xlu0 %2149 }
 0xbbb   :  { %v2156_v5 = vsub.f32 %v3624_v60, %v2150_v36 }
 0xbbd   :  { %v2162_v45 = vmul.f32 1.442695, %v2156_v5 }
 0xbbf   :  { %3062 = vpow2.f32 %v2162_v45 }
 0xbc2   :  { %v2153_v24 = vpop.xlane.xlu1 %2152 }
 0xbc3   :  { %v2157_v22 = vsub.f32 %v3620_v6, %v2153_v24 }
 0xbc5   :  { %v2164_v46 = vmul.f32 1.442695, %v2157_v22 }
 0xbc7   :  { %3064 = vpow2.f32 %v2164_v46 }
 0xbc9   :  { %v3063_v48 = vpop.eup %3062 }
 0xbca   :  { %v2172_v50 = vsel %vm618_vm2, %v3063_v48, 0.0  ;;  %v2180_v13 = vpack.c.bf16 %v3063_v48, %v3063_v48 }
 0xbcb   :  { %2173 = vadd.xlane.f32.xlu1 %v2172_v50 }
 0xbcc   :  { %2961 = vmatmul.mubr.msk.bf16.vlgmr.msra.gmra.mrb[36].mxu0 %vm618_vm2, %v2180_v13 }
 0xbcd   :  { %2971 = vmatpush3.bf16.msra.mxu0 %v3369_v35  ;;  %2974 = vmatprep.mubr.msk.bf16.mxu0 %vm3103_vm1, %v3102_v8 }
 0xbce   :  { %2972 = vmatprep.subr.bf16.mxu0 %v3102_v8 }
 0xbd1   :  { %v3065_v60 = vpop.eup %3064  ;;  %2973 = vmatpush3.bf16.msra.mxu0 %v3380_v26 }
 0xbd2   :  { %v2175_v6 = vsel %vm618_vm2, %v3065_v60, 0.0  ;;  %v2181_v52 = vpack.c.bf16 %v3065_v60, %v3065_v60  ;;  %2986 = vmatprep.subr.bf16.mxu0 %v3102_v8 }
 0xbd3   :  { %2176 = vadd.xlane.f32.xlu0 %v2175_v6 }
 0xbd4   :  { %2967 = vmatmul.mubr.msk.bf16.vlgmr.msra.gmra.mrb[40].mxu1 %vm618_vm2, %v2181_v52 }
 0xbd5   :  { %2979 = vmatpush3.bf16.msra.mxu1 %v3426_v0  ;;  %2982 = vmatprep.mubr.msk.bf16.mxu1 %vm3103_vm1, %v3102_v8 }
 0xbd6   :  { %2980 = vmatprep.subr.bf16.mxu1 %v3102_v8 }
 0xbd9   :  { %2981 = vmatpush3.bf16.msra.mxu1 %v3432_v38 }
 0xc23   :  { %v2168_v59 = vpop.xlane.xlu0 %2167 }
 0xc24   :  { %3066 = vrcp.f32 %v2168_v59 }
 0xc2b   :  { %v2171_v0 = vpop.xlane.xlu0 %2170 }
 0xc2e   :  { %v3067_v1 = vpop.eup %3066 }
 0xc58   :  { %v2174_v61 = vpop.xlane.xlu1 %2173 }
 0xc59   :  { %3068 = vrcp.f32 %v2174_v61 }
 0xc5a   :  { %3070 = vrcp.f32 %v2171_v0 }
 0xc60   :  { %v2177_v63 = vpop.xlane.xlu0 %2176 }
 0xc61   :  { %3072 = vrcp.f32 %v2177_v63 }
 0xc63   :  { %v3069_v2 = vpop.eup %3068 }
 0xc64   :  { %v3071_v28 = vpop.eup %3070 }
 0xc6b   :  { %v3073_v19 = vpop.eup %3072 }
 0xc7d   :  { %v2222_v35 = vpop.f32.mrb[32].mxu0  ;;  %v2268_v31 = vpop.f32.mrb[36].mxu1 }
 0xc7e   :  { %v2950_v26 = vpop.f32.mrb[33].mxu0  ;;  %v2956_v53 = vpop.f32.mrb[37].mxu1  ;;  %v2370_v38 = vmul.f32 %v3067_v1, %v2222_v35  ;;  %v2371_v30 = vmul.f32 %v3071_v28, %v2268_v31 }
 0xc7f   :  { %v2225_v54 = vpop.f32.mrb[34].mxu0  ;;  %v2271_v55 = vpop.f32.mrb[38].mxu1 }
 0xc80   :  { %v2951_v10 = vpop.f32.mrb[35].mxu0  ;;  %v2957_v56 = vpop.f32.mrb[39].mxu1 }
 0xc9f   :  { %v2314_v3 = vpop.f32.mrb[36].mxu0 }
 0xca0   :  { %v2372_v12 = vmul.f32 %v3069_v2, %v2314_v3  ;;  %v2962_v17 = vpop.f32.mrb[37].mxu0 }
 0xca1   :  { %v2317_v18 = vpop.f32.mrb[38].mxu0 }
 0xca2   :  { %v2374_v20 = vcombine.low %v2370_v38, %v2372_v12  ;;  %v2375_v21 = vcombine.high %v2370_v38, %v2372_v12  ;;  %v2963_v23 = vpop.f32.mrb[39].mxu0 }
 0xca4   :  { %v2382_v43 = vrot.slane %v2374_v20, %v3244_v37  ;;  %v2389_v44 = vrot.slane %v2375_v21, %v3244_v37 }
 0xca7   :  { %v2360_v29 = vpop.f32.mrb[40].mxu1 }
 0xca8   :  { %v2373_v27 = vmul.f32 %v3073_v19, %v2360_v29  ;;  %v2968_v32 = vpop.f32.mrb[41].mxu1 }
 0xca9   :  { %v2363_v33 = vpop.f32.mrb[42].mxu1 }
 0xcaa   :  { %v2390_v34 = vcombine.low %v2371_v30, %v2373_v27  ;;  %v2391_v25 = vcombine.high %v2371_v30, %v2373_v27  ;;  %v2969_v42 = vpop.f32.mrb[43].mxu1 }
 0xcac   :  { %v2398_v4 = vrot.slane %v2390_v34, %v3244_v37  ;;  %v2405_v36 = vrot.slane %v2391_v25, %v3244_v37 }
 0xcae   :  { %v2406_v5 = vcombine.low %v2382_v43, %v2398_v4  ;;  %v2407_v45 = vcombine.high %v2382_v43, %v2398_v4  ;;  %v2422_v24 = vcombine.low %v2389_v44, %v2405_v36  ;;  %v2423_v22 = vcombine.high %v2389_v44, %v2405_v36 }
 0xcb0   :  { %v2414_v46 = vrot.slane %v2406_v5, %v3254_v47  ;;  %v2421_v48 = vrot.slane %v2407_v45, %v3254_v47  ;;  %v2430_v50 = vrot.slane %v2422_v24, %v3254_v47  ;;  %v2437_v13 = vrot.slane %v2423_v22, %v3254_v47 }
 0xcb2   :  { %v2442_v60 = vcombine.low %v2414_v46, %v2421_v48  ;;  %v2750_v6 = vcombine.high %v2414_v46, %v2421_v48  ;;  %v2458_v52 = vcombine.low %v2430_v50, %v2437_v13  ;;  %v2751_v35 = vcombine.high %v2430_v50, %v2437_v13 }
 0xcb4   :  { %v2449_v31 = vrot.slane %v2442_v60, %v3244_v37  ;;  %v2457_v26 = vrot.slane %v2750_v6, %v3244_v37  ;;  %v2465_v53 = vrot.slane %v2458_v52, %v3244_v37  ;;  %v2473_v54 = vrot.slane %v2751_v35, %v3244_v37 }
 0xcb6   :  { %v2475_v55 = vcombine.high %v2449_v31, %v2457_v26  ;;  %v2491_v10 = vcombine.high %v2465_v53, %v2473_v54  ;;  %v2474_v56 = vcombine.low %v2449_v31, %v2457_v26  ;;  %v2490_v59 = vcombine.low %v2465_v53, %v2473_v54 }
 0xcb8   :  { %v2489_v61 = vrot.slane %v2475_v55, %v3254_v47  ;;  %v2505_v0 = vrot.slane %v2491_v10, %v3254_v47  ;;  %v2482_v63 = vrot.slane %v2474_v56, %v3254_v47  ;;  %v2498_v1 = vrot.slane %v2490_v59, %v3254_v47 }
 0xcba   :  { %v2508_v2 = vcombine.low %v2489_v61, %v2505_v0  ;;  %v2507_v3 = vcombine.high %v2482_v63, %v2498_v1  ;;  %v2509_v38 = vcombine.high %v2489_v61, %v2505_v0  ;;  %v2506_v12 = vcombine.low %v2482_v63, %v2498_v1 }
 0xcbc   :  { %2515 = vrot.lane.b32.xlu0 %v2508_v2, %s3111_s4  ;;  %2511 = vrot.lane.b32.xlu1 %v2507_v3, %s3112_s19 }
 0xcc0   :  { %2519 = vrot.lane.b32.xlu1 %v2509_v38, %s3113_s20 }
 0xd2e   :  { %v2512_v37 = vpop.permute.xlu1 %2511  ;;  %v2516_v17 = vpop.permute.xlu0 %2515 }
 0xd2f   :  { %v2522_v18 = vsel %vm618_vm2, %v2506_v12, %v2512_v37 }
 0xd30   :  { %v2523_v21 = vsel %vm1185_vm4, %v2522_v18, %v2516_v17 }
 0xd32   :  { %v2520_v20 = vpop.permute.xlu1 %2519 }
 0xd33   :  { %v2524_v23 = vsel %vm1187_vm5, %v2523_v21, %v2520_v20 }
 0xd34   :  { %v2525_v47 = vpack.c.bf16 %v2524_v23, %v2524_v23 }
 0xd36   :  { %2975 = vmatmul.mubr.msk.bf16.vlgmr.msra.gmra.mrb[40].mxu0 %vm79_vm0, %v2525_v47 }
 0xd37   :  { %2987 = vmatpush3.bf16.msra.mxu0 %v3440_v39  ;;  %3002 = vmatprep.mubr.msk.bf16.mxu0 %vm3103_vm1, %v3102_v8 }
 0xd38   :  { %2988 = vmatprep.subr.bf16.mxu0 %v3102_v8 }
 0xd3b   :  { %2989 = vmatpush3.bf16.msra.mxu0 %v3446_v40 }
 0xd3c   :  { %2990 = vmatprep.subr.bf16.mxu0 %v3102_v8 }
 0xd3f   :  { %2991 = vmatpush3.bf16.msra.mxu0 %v3453_v41 }
 0xd40   :  { %2992 = vmatprep.subr.bf16.mxu0 %v3102_v8 }
 0xd43   :  { %2993 = vmatpush3.bf16.msra.mxu0 %v3485_v7 }
 0xd44   :  { %2994 = vmatprep.subr.bf16.mxu0 %v3102_v8 }
 0xd47   :  { %2995 = vmatpush3.bf16.msra.mxu0 %v3492_v9 }
 0xd48   :  { %2996 = vmatprep.subr.bf16.mxu0 %v3102_v8 }
 0xd4b   :  { %2997 = vmatpush3.bf16.msra.mxu0 %v3499_v14 }
 0xd4c   :  { %2998 = vmatprep.subr.bf16.mxu0 %v3102_v8 }
 0xd4f   :  { %2999 = vmatpush3.bf16.msra.mxu0 %v3506_v16 }
 0xd50   :  { %3000 = vmatprep.subr.bf16.mxu0 %v3102_v8 }
 0xd53   :  { %3001 = vmatpush3.bf16.msra.mxu0 %v3513_v57 }
 0xe09   :  { %v2563_v39 = vpop.f32.mrb[40].mxu0 }
 0xe0a   :  { %v2564_v40 = vadd.f32 %v3411_v15, %v2563_v39  ;;  %v2976_v41 = vpop.f32.mrb[41].mxu0 }
 0xe0b   :  { %v2566_v7 = vpop.f32.mrb[42].mxu0 }
 0xe0c   :  { %v2569_v28 = vadd.f32 %v3398_v62, %v2564_v40  ;;  %v2977_v9 = vpop.f32.mrb[43].mxu0 }
 0xe0e   :  { %v2570_v19 = vsel %vm79_vm0, %v2569_v28, 0.0 }
 0xe0f   :  { %2571 = vadd.xlane.f32.xlu1 %v2570_v19 }
 0xe9c   :  { %v2572_v14 = vpop.xlane.xlu1 %2571 }
 0xe9d   :  { %v2573_v29 = vmul.f32 0.03125, %v2572_v14 }
 0xe9f   :  { %v2574_v30 = vsub.f32 %v2569_v28, %v2573_v29 }
 0xea1   :  { %v2575_v27 = vmul.f32 %v2574_v30, %v2574_v30 }
 0xea3   :  { %v2576_v16 = vsel %vm79_vm0, %v2575_v27, 0.0 }
 0xea4   :  { %2577 = vadd.xlane.f32.xlu0 %v2576_v16 }
 0xf31   :  { %v2578_v8 = vpop.xlane.xlu0 %2577 }
 0xf32   :  { %v2579_v57 = vmul.f32 0.03125, %v2578_v8 }
 0xf34   :  { %v2580_v32 = vadd.f32 1e-05, %v2579_v57 }
 0xf36   :  { %3074 = vrsqrt.f32 %v2580_v32 }
 0xf40   :  { %v3075_v15 = vpop.eup %3074 }
 0xf41   :  { %v2582_v33 = vmul.f32 %v3075_v15, %v2574_v30 }
 0xf43   :  { %v2583_v34 = vmul.f32 %v3461_v49, %v2582_v33 }
 0xf45   :  { %v2584_v62 = vadd.f32 %v3466_v51, %v2583_v34 }
 0xf47   :  { %v2585_v25 = vpack.c.bf16 %v2584_v62, %v2584_v62 }
 0xf49   :  { %2983 = vmatmul.mubr.msk.bf16.vlgmr.msra.gmra.mrb[44].mxu1 %vm79_vm0, %v2585_v25 }
0x101c   :  { %v2623_v42 = vpop.f32.mrb[44].mxu1 }
0x101d   :  { %v2624_v43 = vadd.f32 %v3520_v58, %v2623_v42  ;;  %v2984_v44 = vpop.f32.mrb[45].mxu1 }
0x101e   :  { %v2626_v4 = vpop.f32.mrb[46].mxu1 }
0x101f   :  { %v2630_v36 = vmul.f32 0.70710677, %v2624_v43  ;;  %v2985_v5 = vpop.f32.mrb[47].mxu1  ;;  %v2629_v24 = vmul.f32 0.5, %v2624_v43 }
0x1021   :  { %3076 = verf.f32 %v2630_v36 }
0x102b   :  { %v3077_v45 = vpop.eup %3076 }
0x102c   :  { %v2632_v22 = vadd.f32 1.0, %v3077_v45 }
0x102e   :  { %v2633_v46 = vmul.f32 %v2632_v22, %v2629_v24 }
0x1030   :  { %v2634_v48 = vpack.c.bf16 %v2633_v46, %v2633_v46 }
0x1032   :  { %3003 = vmatmul.mubr.bf16.vlgmr.msra.gmra.mrb[44].mxu0 %v2634_v48 }
0x1105   :  { %v2669_v49 = vpop.f32.mrb[44].mxu0 }
0x1106   :  { %v2670_v51 = vadd.f32 %v3571_v11, %v2669_v49  ;;  %v3004_v50 = vpop.f32.mrb[45].mxu0 }
0x1107   :  { %v2672_v13 = vpop.f32.mrb[46].mxu0 }
0x1108   :  { %v2675_v60 = vadd.f32 %v2670_v51, %v2569_v28  ;;  %v3005_v58 = vpop.f32.mrb[47].mxu0 }
0x110a   :  { %2677 = vst.msk [vmem:[#allocation4 + $0x8] sm:$0xff] %vm79_vm0, %v2675_v60 }
0x110b   :  { %3089 = shalt.err (!%p3086_p4)
}
0x110c   :  { %s3090_s14 = scalar_lea.hbm %s3758_s12, 256 }
0x110d   :  { %p3091_p5 = scmp.ne.s32.totalorder %s3758_s12, %s3090_s14  ;;  %p3094_p6 = scmp.lt.u32.totalorder %s3090_s14, %s3758_s12 }
0x110f   :  { %p3096_p7 = pnand %p3094_p6, %p3091_p5 }
0x1111   :  { %3099 = shalt.err (!%p3096_p7)
}
0x1112   :  { %s3115_s15 = smov 128  }
0x1113   :  { %2689 = dma.vmem_to_hbm [thread:$0]  %s2684_s30, 256, %s3758_s12, [#allocation5], %s3115_s15, %s3115_s15, %s3112_s19  }
0x1114   :  { %3100 = dma.done.wait [#allocation5], 256  }
0x1115   :  { %3101 = vsyncadd [#allocation5], 4294967040 }
0x1116   :  { %2693 = vsyncpa [#allocation5], 1 }

</bundles_post_ra>
